<compile_context>
chip_gen: v7x
topology: tpu7x:2x2x1
jax: 0.10.0
libtpu: 0.0.40
codegen_flags: <defaults>
</compile_context>

<pallas_src>
import jax
import jax.numpy as jnp
from jax import lax
from jax.experimental import pallas as pl
from jax.experimental.pallas import tpu as pltpu

H1 = 1024          # FC1 out
H2 = 512           # FC2 out
H3_RAW = 300       # FC3 out (PyTorch)
H3_PAD = 384       # FC3 out padded to a multiple of 128 (exact-zero columns)
LANE = 128
SUBLANE = 8


def critic_kernel(obs_ref, acts_ref,
                  w1_ref, b1_ref,
                  w2h_ref, w2a_ref, b2_ref,
                  w3_ref, b3_ref,
                  w4t_ref, b4_ref,
                  out_ref):
    bf = jnp.bfloat16
    obs = obs_ref[...].astype(bf)
    acts = acts_ref[...].astype(bf)

    # FC1 + ReLU (bf16 MXU inputs, f32 accumulate, fused ReLU + bf16 cast).
    h1 = jnp.maximum(
        jnp.dot(obs, w1_ref[...], preferred_element_type=jnp.float32)
        + b1_ref[...], 0.0).astype(bf)

    # FC2 on concat([h1, acts], axis=1), split into two matmuls + ReLU.
    h2 = jnp.maximum(
        jnp.dot(h1, w2h_ref[...], preferred_element_type=jnp.float32)
        + jnp.dot(acts, w2a_ref[...], preferred_element_type=jnp.float32)
        + b2_ref[...], 0.0).astype(bf)

    # FC3 + ReLU (width padded 300 -> 384; padded columns are exactly 0).
    h3 = jnp.maximum(
        jnp.dot(h2, w3_ref[...], preferred_element_type=jnp.float32)
        + b3_ref[...], 0.0).astype(bf)

    # FC4 computed transposed:  (1, H3_PAD) contracted with h3 (tb, H3_PAD)
    # over the last dims -> (1, tb) lane-dense row.  ~128x less writeback than
    # a (tb, 128) lane-padded column, and no wrapper slice pass needed.
    out_row = lax.dot_general(
        w4t_ref[...], h3,
        dimension_numbers=(((1,), (1,)), ((), ())),
        preferred_element_type=jnp.float32)
    out_ref[...] = out_row + b4_ref[...]


def _round_up(x, m):
    return (x + m - 1) // m * m


def make_critic_params(key, n_agent, dim_observation, dim_action):
    """f32 parameters mimicking nn.Linear init (uniform +-1/sqrt(fan_in))."""
    obs_dim = dim_observation * n_agent
    act_dim = dim_action * n_agent
    layer_dims = [(obs_dim, H1), (H1 + act_dim, H2), (H2, H3_RAW), (H3_RAW, 1)]
    params = {}
    keys = jax.random.split(key, 2 * len(layer_dims))
    for li, (fan_in, fan_out) in enumerate(layer_dims, start=1):
        bound = 1.0 / float(fan_in) ** 0.5
        params[f"w{li}"] = jax.random.uniform(
            keys[2 * li - 2], (fan_in, fan_out), jnp.float32, -bound, bound)
        params[f"b{li}"] = jax.random.uniform(
            keys[2 * li - 1], (1, fan_out), jnp.float32, -bound, bound)
    return params


def prepare_kernel_params(params):
    """Split W2, zero-pad FC3, transpose FC4 weight, cast weights to bf16."""
    bf = jnp.bfloat16
    w2h = params["w2"][:H1, :]
    w2a = params["w2"][H1:, :]
    w3 = jnp.pad(params["w3"], ((0, 0), (0, H3_PAD - H3_RAW)))
    b3 = jnp.pad(params["b3"], ((0, 0), (0, H3_PAD - H3_RAW)))
    # FC4 weight stored transposed: (1, H3_PAD); padded rows are exact zeros.
    w4t = jnp.pad(params["w4"], ((0, H3_PAD - H3_RAW), (0, 0))).T
    return {
        "w1": params["w1"].astype(bf), "b1": params["b1"],
        "w2h": w2h.astype(bf), "w2a": w2a.astype(bf), "b2": params["b2"],
        "w3": w3.astype(bf), "b3": b3,
        "w4t": w4t.astype(bf), "b4": params["b4"],
    }


def critic_forward(obs, acts, kp, *, batch_tile=512):
    """Runs the Pallas critic kernel. Returns (B, 1) f32."""
    B, obs_dim = obs.shape
    if acts.ndim == 3:
        # PyTorch `discrete` branch: flatten per-agent action dims.
        acts = acts.reshape(B, -1)
    act_dim = acts.shape[1]

    # Adaptive batch tile:
    #  * multiple of 128 so the transposed (1, tb) output tile is lane-dense,
    #  * at least 2 grid steps for B >= 256 so both v7x TensorCores get work,
    #  * no larger than needed so batch-padding waste stays small,
    #  * capped at batch_tile (default 512) to keep VMEM comfortable.
    n_steps = max(pl.cdiv(B, batch_tile), 2 if B >= 2 * LANE else 1)
    tb = min(batch_tile, _round_up(pl.cdiv(B, n_steps), LANE))
    b_pad = _round_up(B, tb)
    if b_pad != B:
        obs = jnp.pad(obs, ((0, b_pad - B), (0, 0)))
        acts = jnp.pad(acts, ((0, b_pad - B), (0, 0)))
    grid = (b_pad // tb,)

    def resident(shape):
        # Full-array block with constant index map -> stays VMEM-resident
        # across all batch-grid iterations (no re-DMA of weights).
        return pl.BlockSpec(shape, lambda i: (0, 0))

    weight_order = ["w1", "b1", "w2h", "w2a", "b2", "w3", "b3", "w4t", "b4"]
    weight_args = [kp[k] for k in weight_order]

    out_row = pl.pallas_call(
        critic_kernel,
        out_shape=jax.ShapeDtypeStruct((1, b_pad), jnp.float32),
        grid_spec=pltpu.PrefetchScalarGridSpec(
            num_scalar_prefetch=0,
            grid=grid,
            in_specs=[pl.BlockSpec((tb, obs_dim), lambda i: (i, 0)),
                      pl.BlockSpec((tb, act_dim), lambda i: (i, 0))]
                     + [resident(w.shape) for w in weight_args],
            out_specs=pl.BlockSpec((1, tb), lambda i: (0, i)),
        ),
        compiler_params=pltpu.CompilerParams(
            dimension_semantics=("parallel",),
            vmem_limit_bytes=32 * 1024 * 1024),
    )(obs, acts, *weight_args)

    # TODO(synk): for the B~8 per-step RL path, per-call latency is dominated
    # by the ~1.5 MiB weight DMA; cross-call VMEM residency (P10) or batching
    # several timesteps per call is the only real lever there.
    return out_row[0, :B][:, None]


def critic_forward_bf16_ref(obs, acts, kp):
    """Pure-JAX reference with the SAME bf16 rounding as the kernel."""
    bf = jnp.bfloat16
    h1 = jnp.maximum(
        jnp.dot(obs.astype(bf), kp["w1"], preferred_element_type=jnp.float32)
        + kp["b1"], 0.0)
    h2 = jnp.maximum(
        jnp.dot(h1.astype(bf), kp["w2h"], preferred_element_type=jnp.float32)
        + jnp.dot(acts.astype(bf), kp["w2a"], preferred_element_type=jnp.float32)
        + kp["b2"], 0.0)
    h3 = jnp.maximum(
        jnp.dot(h2.astype(bf), kp["w3"], preferred_element_type=jnp.float32)
        + kp["b3"], 0.0)
    out = (jnp.dot(h3.astype(bf), kp["w4t"].T, preferred_element_type=jnp.float32)
           + kp["b4"])
    return out


def critic_forward_f32_ref(obs, acts, params):
    """Pure f32 reference identical to the PyTorch forward (concat form)."""
    h1 = jax.nn.relu(obs @ params["w1"] + params["b1"])
    combined = jnp.concatenate([h1, acts], axis=1)
    h2 = jax.nn.relu(combined @ params["w2"] + params["b2"])
    h3 = jax.nn.relu(h2 @ params["w3"] + params["b3"])
    return h3 @ params["w4"] + params["b4"]


if __name__ == "__main__":
    n_agent, dim_observation, dim_action = 2, 16, 4
    obs_dim = n_agent * dim_observation   # 32
    act_dim = n_agent * dim_action        # 8

    key = jax.random.PRNGKey(0)
    k_params, k_data = jax.random.split(key)

    params = make_critic_params(k_params, n_agent, dim_observation, dim_action)
    kp = prepare_kernel_params(params)

    # B=8 exercises the single-tile latency path; B=300 exercises the adaptive
    # multi-tile (grid=2, tb=256) path incl. batch padding and the parallel grid.
    for B in (8, 300):
        k_obs, k_acts = jax.random.split(jax.random.fold_in(k_data, B))
        obs = jax.random.normal(k_obs, (B, obs_dim), jnp.float32)
        acts = jax.random.normal(k_acts, (B, act_dim), jnp.float32)

        out = jax.block_until_ready(critic_forward(obs, acts, kp))
        assert out.shape == (B, 1)

        # Tight check vs. a bf16-matched pure-JAX reference.
        ref_bf16 = critic_forward_bf16_ref(obs, acts, kp)
        assert jnp.allclose(out, ref_bf16, atol=5e-3, rtol=5e-3), (
            f"B={B}: mismatch vs bf16-matched reference")

        # Loose check vs. the full-f32 PyTorch-equivalent reference
        # (tolerance loosened because weights are stored in bf16).
        ref_f32 = critic_forward_f32_ref(obs, acts, params)
        assert jnp.allclose(out, ref_f32, atol=5e-2, rtol=5e-2), (
            f"B={B}: mismatch vs f32 reference")

    print("KERNEL_OK")
</pallas_src>

<mosaic_0001>
module attributes {stable_mosaic.version = 11 : i64} {
  func.func @critic_kernel(%arg0: i32, %arg1: memref<128x32xf32, #tpu.memory_space<vmem>>, %arg2: memref<128x8xf32, #tpu.memory_space<vmem>>, %arg3: memref<32x1024xbf16, #tpu.memory_space<vmem>>, %arg4: memref<1x1024xf32, #tpu.memory_space<vmem>>, %arg5: memref<1024x512xbf16, #tpu.memory_space<vmem>>, %arg6: memref<8x512xbf16, #tpu.memory_space<vmem>>, %arg7: memref<1x512xf32, #tpu.memory_space<vmem>>, %arg8: memref<512x384xbf16, #tpu.memory_space<vmem>>, %arg9: memref<1x384xf32, #tpu.memory_space<vmem>>, %arg10: memref<1x384xbf16, #tpu.memory_space<vmem>>, %arg11: memref<1x1xf32, #tpu.memory_space<vmem>>, %arg12: memref<1x128xf32, #tpu.memory_space<vmem>>) attributes {dimension_semantics = [#tpu.dimension_semantics<parallel>], iteration_bounds = array<i64: 1>, scalar_prefetch = 0 : i64, scratch_operands = 0 : i64, tpu.core_type = #tpu.core_type<tc>, window_params = [{transform_indices = @transform_0, window_bounds = array<i64: 128, 32>}, {transform_indices = @transform_1, window_bounds = array<i64: 128, 8>}, {pipeline_mode = #tpu.pipeline_mode<synchronous>, transform_indices = @transform_2, window_bounds = array<i64: 32, 1024>}, {pipeline_mode = #tpu.pipeline_mode<synchronous>, transform_indices = @transform_3, window_bounds = array<i64: 1, 1024>}, {pipeline_mode = #tpu.pipeline_mode<synchronous>, transform_indices = @transform_4, window_bounds = array<i64: 1024, 512>}, {pipeline_mode = #tpu.pipeline_mode<synchronous>, transform_indices = @transform_5, window_bounds = array<i64: 8, 512>}, {pipeline_mode = #tpu.pipeline_mode<synchronous>, transform_indices = @transform_6, window_bounds = array<i64: 1, 512>}, {pipeline_mode = #tpu.pipeline_mode<synchronous>, transform_indices = @transform_7, window_bounds = array<i64: 512, 384>}, {pipeline_mode = #tpu.pipeline_mode<synchronous>, transform_indices = @transform_8, window_bounds = array<i64: 1, 384>}, {pipeline_mode = #tpu.pipeline_mode<synchronous>, transform_indices = @transform_9, window_bounds = array<i64: 1, 384>}, {pipeline_mode = #tpu.pipeline_mode<synchronous>, transform_indices = @transform_10, window_bounds = array<i64: 1, 1>}, {transform_indices = @transform_11, window_bounds = array<i64: 1, 128>}]} {
    %c0 = arith.constant 0 : index
    %c0_0 = arith.constant 0 : index
    %0 = vector.load %arg1[%c0, %c0_0] : memref<128x32xf32, #tpu.memory_space<vmem>>, vector<128x32xf32>
    %1 = arith.truncf %0 : vector<128x32xf32> to vector<128x32xbf16>
    %c0_1 = arith.constant 0 : index
    %c0_2 = arith.constant 0 : index
    %2 = vector.load %arg2[%c0_1, %c0_2] : memref<128x8xf32, #tpu.memory_space<vmem>>, vector<128x8xf32>
    %3 = arith.truncf %2 : vector<128x8xf32> to vector<128x8xbf16>
    %c0_3 = arith.constant 0 : index
    %c0_4 = arith.constant 0 : index
    %4 = vector.load %arg3[%c0_3, %c0_4] : memref<32x1024xbf16, #tpu.memory_space<vmem>>, vector<32x1024xbf16>
    %cst = arith.constant dense<0.000000e+00> : vector<128x1024xf32>
    %5 = tpu.matmul %1, %4, %cst {dimension_numbers = #tpu.dot_dimension_numbers<[1], [0], [0], [1], [0, 0, 1, 1], [], []>} : vector<128x32xbf16>, vector<32x1024xbf16>, vector<128x1024xf32> -> vector<128x1024xf32>
    %c0_5 = arith.constant 0 : index
    %c0_6 = arith.constant 0 : index
    %6 = vector.load %arg4[%c0_5, %c0_6] : memref<1x1024xf32, #tpu.memory_space<vmem>>, vector<1x1024xf32>
    %7 = vector.broadcast %6 : vector<1x1024xf32> to vector<128x1024xf32>
    %8 = arith.addf %5, %7 : vector<128x1024xf32>
    %cst_7 = arith.constant 0.000000e+00 : f32
    %9 = vector.broadcast %cst_7 : f32 to vector<128x1024xf32>
    %10 = arith.maximumf %8, %9 : vector<128x1024xf32>
    %11 = arith.truncf %10 : vector<128x1024xf32> to vector<128x1024xbf16>
    %c0_8 = arith.constant 0 : index
    %c0_9 = arith.constant 0 : index
    %12 = vector.load %arg5[%c0_8, %c0_9] : memref<1024x512xbf16, #tpu.memory_space<vmem>>, vector<1024x512xbf16>
    %cst_10 = arith.constant dense<0.000000e+00> : vector<128x512xf32>
    %13 = tpu.matmul %11, %12, %cst_10 {dimension_numbers = #tpu.dot_dimension_numbers<[1], [0], [0], [1], [0, 0, 1, 1], [], []>} : vector<128x1024xbf16>, vector<1024x512xbf16>, vector<128x512xf32> -> vector<128x512xf32>
    %c0_11 = arith.constant 0 : index
    %c0_12 = arith.constant 0 : index
    %14 = vector.load %arg6[%c0_11, %c0_12] : memref<8x512xbf16, #tpu.memory_space<vmem>>, vector<8x512xbf16>
    %cst_13 = arith.constant dense<0.000000e+00> : vector<128x512xf32>
    %15 = tpu.matmul %3, %14, %cst_13 {dimension_numbers = #tpu.dot_dimension_numbers<[1], [0], [0], [1], [0, 0, 1, 1], [], []>} : vector<128x8xbf16>, vector<8x512xbf16>, vector<128x512xf32> -> vector<128x512xf32>
    %16 = arith.addf %13, %15 : vector<128x512xf32>
    %c0_14 = arith.constant 0 : index
    %c0_15 = arith.constant 0 : index
    %17 = vector.load %arg7[%c0_14, %c0_15] : memref<1x512xf32, #tpu.memory_space<vmem>>, vector<1x512xf32>
    %18 = vector.broadcast %17 : vector<1x512xf32> to vector<128x512xf32>
    %19 = arith.addf %16, %18 : vector<128x512xf32>
    %cst_16 = arith.constant 0.000000e+00 : f32
    %20 = vector.broadcast %cst_16 : f32 to vector<128x512xf32>
    %21 = arith.maximumf %19, %20 : vector<128x512xf32>
    %22 = arith.truncf %21 : vector<128x512xf32> to vector<128x512xbf16>
    %c0_17 = arith.constant 0 : index
    %c0_18 = arith.constant 0 : index
    %23 = vector.load %arg8[%c0_17, %c0_18] : memref<512x384xbf16, #tpu.memory_space<vmem>>, vector<512x384xbf16>
    %cst_19 = arith.constant dense<0.000000e+00> : vector<128x384xf32>
    %24 = tpu.matmul %22, %23, %cst_19 {dimension_numbers = #tpu.dot_dimension_numbers<[1], [0], [0], [1], [0, 0, 1, 1], [], []>} : vector<128x512xbf16>, vector<512x384xbf16>, vector<128x384xf32> -> vector<128x384xf32>
    %c0_20 = arith.constant 0 : index
    %c0_21 = arith.constant 0 : index
    %25 = vector.load %arg9[%c0_20, %c0_21] : memref<1x384xf32, #tpu.memory_space<vmem>>, vector<1x384xf32>
    %26 = vector.broadcast %25 : vector<1x384xf32> to vector<128x384xf32>
    %27 = arith.addf %24, %26 : vector<128x384xf32>
    %cst_22 = arith.constant 0.000000e+00 : f32
    %28 = vector.broadcast %cst_22 : f32 to vector<128x384xf32>
    %29 = arith.maximumf %27, %28 : vector<128x384xf32>
    %30 = arith.truncf %29 : vector<128x384xf32> to vector<128x384xbf16>
    %c0_23 = arith.constant 0 : index
    %c0_24 = arith.constant 0 : index
    %31 = vector.load %arg10[%c0_23, %c0_24] : memref<1x384xbf16, #tpu.memory_space<vmem>>, vector<1x384xbf16>
    %cst_25 = arith.constant dense<0.000000e+00> : vector<1x128xf32>
    %32 = tpu.matmul %31, %30, %cst_25 {dimension_numbers = #tpu.dot_dimension_numbers<[1], [1], [0], [0], [0, 0, 1, 0], [], []>} : vector<1x384xbf16>, vector<128x384xbf16>, vector<1x128xf32> -> vector<1x128xf32>
    %c0_26 = arith.constant 0 : index
    %c0_27 = arith.constant 0 : index
    %33 = vector.load %arg11[%c0_26, %c0_27] : memref<1x1xf32, #tpu.memory_space<vmem>>, vector<1x1xf32>
    %34 = vector.broadcast %33 : vector<1x1xf32> to vector<1x128xf32>
    %35 = arith.addf %32, %34 : vector<1x128xf32>
    %c0_28 = arith.constant 0 : index
    %c0_29 = arith.constant 0 : index
    %36 = vector.load %arg12[%c0_28, %c0_29] : memref<1x128xf32, #tpu.memory_space<vmem>>, vector<1x128xf32>
    tpu.vector_store %arg12[%c0_28, %c0_29], %35 {strides = array<i32>} : memref<1x128xf32, #tpu.memory_space<vmem>>, vector<1x128xf32>,
    return
  }
  func.func @transform_0(%arg0: i32) -> (i32, i32) {
    %c0_i32 = arith.constant 0 : i32
    %c0_i32_0 = arith.constant 0 : i32
    return %arg0, %c0_i32 : i32, i32
  }
  func.func @transform_1(%arg0: i32) -> (i32, i32) {
    %c0_i32 = arith.constant 0 : i32
    %c0_i32_0 = arith.constant 0 : i32
    return %arg0, %c0_i32 : i32, i32
  }
  func.func @transform_2(%arg0: i32) -> (i32, i32) {
    %c0_i32 = arith.constant 0 : i32
    %c0_i32_0 = arith.constant 0 : i32
    %c0_i32_1 = arith.constant 0 : i32
    return %c0_i32, %c0_i32_0 : i32, i32
  }
  func.func @transform_3(%arg0: i32) -> (i32, i32) {
    %c0_i32 = arith.constant 0 : i32
    %c0_i32_0 = arith.constant 0 : i32
    %c0_i32_1 = arith.constant 0 : i32
    return %c0_i32, %c0_i32_0 : i32, i32
  }
  func.func @transform_4(%arg0: i32) -> (i32, i32) {
    %c0_i32 = arith.constant 0 : i32
    %c0_i32_0 = arith.constant 0 : i32
    %c0_i32_1 = arith.constant 0 : i32
    return %c0_i32, %c0_i32_0 : i32, i32
  }
  func.func @transform_5(%arg0: i32) -> (i32, i32) {
    %c0_i32 = arith.constant 0 : i32
    %c0_i32_0 = arith.constant 0 : i32
    %c0_i32_1 = arith.constant 0 : i32
    return %c0_i32, %c0_i32_0 : i32, i32
  }
  func.func @transform_6(%arg0: i32) -> (i32, i32) {
    %c0_i32 = arith.constant 0 : i32
    %c0_i32_0 = arith.constant 0 : i32
    %c0_i32_1 = arith.constant 0 : i32
    return %c0_i32, %c0_i32_0 : i32, i32
  }
  func.func @transform_7(%arg0: i32) -> (i32, i32) {
    %c0_i32 = arith.constant 0 : i32
    %c0_i32_0 = arith.constant 0 : i32
    %c0_i32_1 = arith.constant 0 : i32
    return %c0_i32, %c0_i32_0 : i32, i32
  }
  func.func @transform_8(%arg0: i32) -> (i32, i32) {
    %c0_i32 = arith.constant 0 : i32
    %c0_i32_0 = arith.constant 0 : i32
    %c0_i32_1 = arith.constant 0 : i32
    return %c0_i32, %c0_i32_0 : i32, i32
  }
  func.func @transform_9(%arg0: i32) -> (i32, i32) {
    %c0_i32 = arith.constant 0 : i32
    %c0_i32_0 = arith.constant 0 : i32
    %c0_i32_1 = arith.constant 0 : i32
    return %c0_i32, %c0_i32_0 : i32, i32
  }
  func.func @transform_10(%arg0: i32) -> (i32, i32) {
    %c0_i32 = arith.constant 0 : i32
    %c0_i32_0 = arith.constant 0 : i32
    %c0_i32_1 = arith.constant 0 : i32
    return %c0_i32, %c0_i32_0 : i32, i32
  }
  func.func @transform_11(%arg0: i32) -> (i32, i32) {
    %c0_i32 = arith.constant 0 : i32
    %c0_i32_0 = arith.constant 0 : i32
    return %c0_i32, %arg0 : i32, i32
  }
}

</mosaic_0001>

<bundles_post_ra>
// kernel: tpu_custom_call.1
= control target key start
LH: loop header
LB: loop body
LE: loop exit
PB: predicated region body
PF: predicated region fallthrough
CT: control target
= control target key end

     0   :  { %s7627_s0 = inlined_call_operand.vmem [shape: f32[128,32], index: 0, kind: input, shape index: {}]   ;;  %s7628_s1 = inlined_call_operand.vmem [shape: f32[128,8], index: 1, kind: input, shape index: {}]   ;;  %s7629_s2 = inlined_call_operand.vmem [shape: bf16[32,1024], index: 2, kind: input, shape index: {}]   ;;  %s7630_s3 = inlined_call_operand.vmem [shape: f32[1,1024], index: 3, kind: input, shape index: {}]   ;;  %s7631_s4 = inlined_call_operand.hbm [shape: bf16[1024,512], index: 4, kind: input, shape index: {}]   ;;  %s7632_s5 = inlined_call_operand.vmem [shape: bf16[8,512], index: 5, kind: input, shape index: {}]   ;;  %s7633_s6 = inlined_call_operand.vmem [shape: f32[1,512], index: 6, kind: input, shape index: {}]   ;;  %s7634_s7 = inlined_call_operand.hbm [shape: bf16[512,384], index: 7, kind: input, shape index: {}]   ;;  %s7635_s8 = inlined_call_operand.vmem [shape: f32[1,384], index: 8, kind: input, shape index: {}]   ;;  %s7636_s9 = inlined_call_operand.vmem [shape: bf16[1,384], index: 9, kind: input, shape index: {}]   ;;  %s7637_s10 = inlined_call_operand.<no memory space> [shape: f32[1,1], index: 10, kind: input, shape index: {}]   ;;  %s7638_s11 = inlined_call_operand.hbm [shape: f32[1,128], index: 11, kind: output, shape index: {}]  }
   0x1   :  { %v16_v0 = vstv %s7637_s10 }
   0x2   :  { %17 = vst [vmem:[#allocation2] sm:$0x1] %v16_v0 }
   0x3   :  { %18 = vsyncpa [#allocation4], 0 }
   0x4   :  { %19 = vsyncpa [#allocation7], 0 }
   0x5   :  { %20 = vsyncpa [#allocation5], 0  ;;  %s6609_s19 = smov [#allocation3]   ;;  %s6537_s23 = scalar_lea.hbm %s7631_s4, 32768 }
   0x6   :  { %s34_s20 = sshll.u32 %s6609_s19, 4  ;;  %p6538_p0 = scmp.ne.s32.totalorder %s7631_s4, %s6537_s23  ;;  %s35_s20 = int_to_ptr.vmem [resolvable:$true] %s34_s20 }
   0x7   :  { %p6541_p1 = scmp.lt.u32.totalorder %s6537_s23, %s7631_s4 }
   0x9   :  { %p6543_p2 = pnand %p6541_p1, %p6538_p0 }
   0xb   :  { %6546 = shalt.err (!%p6543_p2)
}
   0xc   :  { %s6547_s10 = scalar_lea.vmem %s35_s20, 32768  ;;  %p6552_p4 = scmp.lt.s32.totalorder %s35_s20, %s35_s20 }
   0xd   :  { %p6548_p3 = scmp.ne.s32.totalorder %s35_s20, %s6547_s10  ;;  %p6553_p5 = scmp.lt.s32.totalorder %s6547_s10, %s6547_s10 }
   0xf   :  { %p6554_p6 = por %p6553_p5, %p6552_p4 }
  0x11   :  { %p6555_p7 = pnand %p6554_p6, %p6548_p3 }
  0x13   :  { %6558 = shalt.err (!%p6555_p7)
}
  0x14   :  { %s6610_s28 = smov 256   ;;  %s6611_s29 = smov 16  }
  0x15   :  { %40 = dma.hbm_to_vmem [thread:$0]  %s7631_s4, 32768, %s35_s20, [#allocation4], %s6610_s28, %s6610_s28, %s6611_s29  }
  0x16   :  { %s6612_s13 = smov [#allocation6]   ;;  %s6559_s17 = scalar_lea.hbm %s7634_s7, 12288 }
  0x17   :  { %s50_s14 = sshll.u32 %s6612_s13, 4  ;;  %p6560_p8 = scmp.ne.s32.totalorder %s7634_s7, %s6559_s17  ;;  %s51_s14 = int_to_ptr.vmem [resolvable:$true] %s50_s14 }
  0x18   :  { %p6563_p9 = scmp.lt.u32.totalorder %s6559_s17, %s7634_s7 }
  0x1a   :  { %p6565_p10 = pnand %p6563_p9, %p6560_p8 }
  0x1c   :  { %6568 = shalt.err (!%p6565_p10)
}
  0x1d   :  { %s6569_s23 = scalar_lea.vmem %s51_s14, 12288  ;;  %p6574_p12 = scmp.lt.s32.totalorder %s51_s14, %s51_s14 }
  0x1e   :  { %p6570_p11 = scmp.ne.s32.totalorder %s51_s14, %s6569_s23  ;;  %p6575_p13 = scmp.lt.s32.totalorder %s6569_s23, %s6569_s23 }
  0x20   :  { %p6576_p0 = por %p6575_p13, %p6574_p12 }
  0x22   :  { %p6577_p1 = pnand %p6576_p0, %p6570_p11 }
  0x24   :  { %6580 = shalt.err (!%p6577_p1)
}
  0x25   :  { %s6613_s4 = smov 192   ;;  %s6614_s20 = smov 12  }
  0x26   :  { %56 = dma.hbm_to_vmem [thread:$0]  %s7634_s7, 12288, %s51_s14, [#allocation7], %s6613_s4, %s6613_s4, %s6614_s20  }
  0x27   :  { %6603 = dma.done.wait [#allocation4], 32768  }
  0x28   :  { %6604 = vsyncadd [#allocation4], 4294934528 }
  0x29   :  { %6605 = dma.done.wait [#allocation7], 12288  }
  0x2a   :  { %6606 = vsyncadd [#allocation7], 4294955008  ;;  %v6615_v1 = vmov 0   ;;  %v118_v2 = vld [vmem:[%s7629_s2] sm:$0xff]  ;;  %v119_v9 = vld [vmem:[%s7629_s2 + $0x8] sm:$0xff]  ;;  %vm256_vm0 = vcmask 261120  }
  0x2b   :  { %313 = vmatprep.mubr.bf16.mxu0 %v6615_v1  ;;  %426 = vmatprep.mubr.bf16.mxu1 %v6615_v1  ;;  %v122_v3 = vld [vmem:[%s7629_s2 + $0x20] sm:$0xff]  ;;  %v123_v10 = vld [vmem:[%s7629_s2 + $0x28] sm:$0xff]  ;;  %v120_v18 = vld [vmem:[%s7629_s2 + $0x10] sm:$0xff]  ;;  %vm1218_vm1 = vcmask 1043456   ;;  %vm1193_vm2 = vcmask 64512   ;;  %vm6618_vm3 = vmmov 0  }
  0x2c   :  { %6020 = vset.pattern.permute.xlu0 %v6615_v1  ;;  %v126_v4 = vld [vmem:[%s7629_s2 + $0x40] sm:$0xff]  ;;  %v5108_v5 = vcombine.high %v118_v2, %v122_v3  ;;  %v5107_v6 = vcombine.low %v118_v2, %v122_v3  ;;  %v71_v13 = vld [vmem:[%s7627_s0 + $0x8] sm:$0xff]  ;;  %v5110_v14 = vcombine.high %v119_v9, %v123_v10  ;;  %v5109_v15 = vcombine.low %v119_v9, %v123_v10  ;;  %v124_v19 = vld [vmem:[%s7629_s2 + $0x30] sm:$0xff] }
  0x2d   :  { %v130_v7 = vld [vmem:[%s7629_s2 + $0x60] sm:$0xff]  ;;  %v127_v16 = vld [vmem:[%s7629_s2 + $0x48] sm:$0xff]  ;;  %v5112_v21 = vcombine.high %v120_v18, %v124_v19  ;;  %v5111_v24 = vcombine.low %v120_v18, %v124_v19  ;;  %v128_v25 = vld [vmem:[%s7629_s2 + $0x50] sm:$0xff] }
  0x2e   :  { %v5116_v8 = vcombine.high %v126_v4, %v130_v7  ;;  %281 = vmatprep.subr.bf16.mxu0 %v5108_v5  ;;  %v5115_v11 = vcombine.low %v126_v4, %v130_v7  ;;  %v70_v12 = vld [vmem:[%s7627_s0] sm:$0xff]  ;;  %v131_v17 = vld [vmem:[%s7629_s2 + $0x68] sm:$0xff]  ;;  %394 = vmatprep.subr.bf16.mxu1 %v5110_v14  ;;  %v132_v26 = vld [vmem:[%s7629_s2 + $0x70] sm:$0xff] }
  0x2f   :  { %282 = vmatpush1.bf16.msra.mxu0 %v5107_v6  ;;  %v5118_v20 = vcombine.high %v127_v16, %v131_v17  ;;  %v6746_v22 = vpack.c.bf16 %v71_v13, %v70_v12  ;;  %395 = vmatpush1.bf16.msra.mxu1 %v5109_v15  ;;  %v5117_v23 = vcombine.low %v127_v16, %v131_v17  ;;  %v121_v27 = vld [vmem:[%s7629_s2 + $0x18] sm:$0xff]  ;;  %v6769_v33 = vld [vmem:[%s7632_s5] sm:$0xff]  ;;  %v72_v34 = vld [vmem:[%s7627_s0 + $0x10] sm:$0xff] }
  0x30   :  { %283 = vmatprep.subr.bf16.mxu0 %v5116_v8  ;;  %v125_v28 = vld [vmem:[%s7629_s2 + $0x38] sm:$0xff]  ;;  %v5120_v29 = vcombine.high %v128_v25, %v132_v26  ;;  %v6782_v37 = vld [vmem:[%s7632_s5 + $0x8] sm:$0xff]  ;;  %v5119_v38 = vcombine.low %v128_v25, %v132_v26  ;;  %v5156_v40 = vcombine.high %v6769_v33, %v6769_v33  ;;  %v74_v44 = vld [vmem:[%s7627_s0 + $0x20] sm:$0xff]  ;;  %v5155_v62 = vcombine.low %v6769_v33, %v6769_v33 }
  0x31   :  { %396 = vmatprep.subr.bf16.mxu1 %v5118_v20  ;;  %v5114_v30 = vcombine.high %v121_v27, %v125_v28  ;;  %v129_v31 = vld [vmem:[%s7629_s2 + $0x58] sm:$0xff]  ;;  %v5113_v36 = vcombine.low %v121_v27, %v125_v28  ;;  %v5158_v43 = vcombine.high %v6782_v37, %v6782_v37  ;;  %v75_v45 = vld [vmem:[%s7627_s0 + $0x28] sm:$0xff]  ;;  %v76_v47 = vld [vmem:[%s7627_s0 + $0x30] sm:$0xff]  ;;  %v5157_v0 = vcombine.low %v6782_v37, %v6782_v37 }
  0x32   :  { %v133_v32 = vld [vmem:[%s7629_s2 + $0x78] sm:$0xff]  ;;  %v88_v46 = vpack.c.bf16 %v75_v45, %v74_v44  ;;  %v78_v50 = vld [vmem:[%s7627_s0 + $0x40] sm:$0xff]  ;;  %v79_v51 = vld [vmem:[%s7627_s0 + $0x48] sm:$0xff]  ;;  %v1220_v2 = vsel %vm1218_vm1, %v5155_v62, 0 }
  0x33   :  { %284 = vmatpush1.bf16.msra.mxu0 %v5115_v11  ;;  %v73_v35 = vld [vmem:[%s7627_s0 + $0x18] sm:$0xff]  ;;  %397 = vmatpush1.bf16.msra.mxu1 %v5117_v23  ;;  %v5122_v39 = vcombine.high %v129_v31, %v133_v32  ;;  %v5121_v42 = vcombine.low %v129_v31, %v133_v32  ;;  %v90_v52 = vpack.c.bf16 %v79_v51, %v78_v50  ;;  %v80_v53 = vld [vmem:[%s7627_s0 + $0x50] sm:$0xff]  ;;  %v82_v56 = vld [vmem:[%s7627_s0 + $0x60] sm:$0xff]  ;;  %v1226_v4 = vsel %vm1218_vm1, %v5157_v0, 0 }
  0x34   :  { %507 = vmatprep.subr.bf16.mxu0 %v5112_v21  ;;  %620 = vmatprep.subr.bf16.mxu1 %v5114_v30  ;;  %v6789_v41 = vpack.c.bf16 %v73_v35, %v72_v34  ;;  %v77_v48 = vld [vmem:[%s7627_s0 + $0x38] sm:$0xff]  ;;  %v83_v57 = vld [vmem:[%s7627_s0 + $0x68] sm:$0xff]  ;;  %v84_v59 = vld [vmem:[%s7627_s0 + $0x70] sm:$0xff] }
  0x35   :  { %v89_v49 = vpack.c.bf16 %v77_v48, %v76_v47  ;;  %v81_v54 = vld [vmem:[%s7627_s0 + $0x58] sm:$0xff]  ;;  %v92_v58 = vpack.c.bf16 %v83_v57, %v82_v56  ;;  %v94_v5 = vld [vmem:[%s7628_s1] sm:$0xff]  ;;  %v95_v6 = vld [vmem:[%s7628_s1 + $0x8] sm:$0xff] }
  0x36   :  { %5123 = vmatmul.mubr.msk.bf16.vlgmr.msra.gmra.mrb[0].mxu0 %vm256_vm0, %v6746_v22  ;;  %5131 = vmatmul.mubr.msk.bf16.vlgmr.msra.gmra.mrb[0].mxu1 %vm256_vm0, %v6746_v22  ;;  %v91_v55 = vpack.c.bf16 %v81_v54, %v80_v53  ;;  %v85_v60 = vld [vmem:[%s7627_s0 + $0x78] sm:$0xff]  ;;  %v110_v7 = vpack.c.bf16 %v95_v6, %v94_v5  ;;  %v6025_v8 = vld [vmem:[#allocation3] ss:$16 sps:$4 sm:$0xff]   ;;  %v99_v25 = vld [vmem:[%s7628_s1 + $0x28] sm:$0xff] }
  0x37   :  { %323 = vmatprep.mubr.bf16.mxu0 %v6615_v1  ;;  %508 = vmatpush1.bf16.msra.mxu0 %v5111_v24  ;;  %v93_v61 = vpack.c.bf16 %v85_v60, %v84_v59  ;;  %v6027_v63 = vld [vmem:[#allocation3 + $0x4] ss:$16 sps:$4 sm:$0xff]   ;;  %v6030_v3 = vld [vmem:[#allocation3 + $0xc] ss:$16 sps:$4 sm:$0xff]   ;;  %v6028_v10 = vld [vmem:[#allocation3 + $0x8] ss:$16 sps:$4 sm:$0xff]  }
  0x38   :  { %509 = vmatprep.subr.bf16.mxu0 %v5120_v29  ;;  %436 = vmatprep.mubr.bf16.mxu1 %v6615_v1  ;;  %v6033_v9 = vld [vmem:[#allocation3 + $0x24] ss:$16 sps:$4 sm:$0xff]   ;;  %v6031_v11 = vld [vmem:[#allocation3 + $0x20] ss:$16 sps:$4 sm:$0xff]   ;;  %v6036_v12 = vld [vmem:[#allocation3 + $0x2c] ss:$16 sps:$4 sm:$0xff]  }
  0x39   :  { %621 = vmatpush1.bf16.msra.mxu1 %v5113_v36  ;;  %v96_v13 = vld [vmem:[%s7628_s1 + $0x10] sm:$0xff]  ;;  %v97_v14 = vld [vmem:[%s7628_s1 + $0x18] sm:$0xff]  ;;  %v98_v24 = vld [vmem:[%s7628_s1 + $0x20] sm:$0xff] }
  0x3a   :  { %622 = vmatprep.subr.bf16.mxu1 %v5122_v39  ;;  %v6039_v15 = vld [vmem:[#allocation3 + $0x44] ss:$16 sps:$4 sm:$0xff]   ;;  %v6034_v16 = vld [vmem:[#allocation3 + $0x28] ss:$16 sps:$4 sm:$0xff]   ;;  %v111_v17 = vpack.c.bf16 %v97_v14, %v96_v13  ;;  %v6037_v18 = vld [vmem:[#allocation3 + $0x40] ss:$16 sps:$4 sm:$0xff]   ;;  %v112_v28 = vpack.c.bf16 %v99_v25, %v98_v24 }
  0x3b   :  { %510 = vmatpush1.bf16.msra.mxu0 %v5119_v38  ;;  %v6042_v19 = vld [vmem:[#allocation3 + $0x4c] ss:$16 sps:$4 sm:$0xff]   ;;  %v6045_v20 = vld [vmem:[#allocation3 + $0x64] ss:$16 sps:$4 sm:$0xff]   ;;  %v6040_v21 = vld [vmem:[#allocation3 + $0x48] ss:$16 sps:$4 sm:$0xff]  }
  0x3c   :  { %5159 = vmatprep.subr.msk.bf16.mxu0 %vm1218_vm1, %v5156_v40  ;;  %v6048_v23 = vld [vmem:[#allocation3 + $0x6c] ss:$16 sps:$4 sm:$0xff]   ;;  %v6051_v26 = vld [vmem:[#allocation3 + $0x84] ss:$16 sps:$4 sm:$0xff]   ;;  %v6046_v27 = vld [vmem:[#allocation3 + $0x68] ss:$16 sps:$4 sm:$0xff]  }
  0x3d   :  { %623 = vmatpush1.bf16.msra.mxu1 %v5121_v42  ;;  %v6049_v29 = vld [vmem:[#allocation3 + $0x80] ss:$16 sps:$4 sm:$0xff]   ;;  %v6054_v30 = vld [vmem:[#allocation3 + $0x8c] ss:$16 sps:$4 sm:$0xff]   ;;  %v6057_v31 = vld [vmem:[#allocation3 + $0xa4] ss:$16 sps:$4 sm:$0xff]  }
  0x3e   :  { %5124 = vmatmul.mubr.msk.bf16.gmra.mrb[4].mxu0 %vm256_vm0, %v6789_v41  ;;  %5168 = vmatprep.subr.msk.bf16.mxu1 %vm1218_vm1, %v5158_v43  ;;  %v6052_v32 = vld [vmem:[#allocation3 + $0x88] ss:$16 sps:$4 sm:$0xff]   ;;  %v6055_v33 = vld [vmem:[#allocation3 + $0xa0] ss:$16 sps:$4 sm:$0xff]   ;;  %v6060_v34 = vld [vmem:[#allocation3 + $0xac] ss:$16 sps:$4 sm:$0xff]  }
  0x3f   :  { %333 = vmatprep.mubr.bf16.mxu0 %v6615_v1  ;;  %5132 = vmatmul.mubr.msk.bf16.gmra.mrb[4].mxu1 %vm256_vm0, %v6789_v41  ;;  %v100_v35 = vld [vmem:[%s7628_s1 + $0x30] sm:$0xff]  ;;  %v101_v36 = vld [vmem:[%s7628_s1 + $0x38] sm:$0xff]  ;;  %v103_v47 = vld [vmem:[%s7628_s1 + $0x48] sm:$0xff] }
  0x40   :  { %446 = vmatprep.mubr.bf16.mxu1 %v6615_v1  ;;  %v6063_v37 = vld [vmem:[#allocation3 + $0xc4] ss:$16 sps:$4 sm:$0xff]   ;;  %v6058_v38 = vld [vmem:[#allocation3 + $0xa8] ss:$16 sps:$4 sm:$0xff]   ;;  %v113_v39 = vpack.c.bf16 %v101_v36, %v100_v35  ;;  %v6061_v40 = vld [vmem:[#allocation3 + $0xc0] ss:$16 sps:$4 sm:$0xff]  }
  0x41   :  { %v6069_v42 = vld [vmem:[#allocation3 + $0xe4] ss:$16 sps:$4 sm:$0xff]   ;;  %v6064_v43 = vld [vmem:[#allocation3 + $0xc8] ss:$16 sps:$4 sm:$0xff]   ;;  %v6067_v44 = vld [vmem:[#allocation3 + $0xe0] ss:$16 sps:$4 sm:$0xff]  }
  0x42   :  { %v6072_v45 = vld [vmem:[#allocation3 + $0xec] ss:$16 sps:$4 sm:$0xff]   ;;  %v6075_v48 = vld [vmem:[#allocation3 + $0x104] ss:$16 sps:$4 sm:$0xff]   ;;  %v6073_v51 = vld [vmem:[#allocation3 + $0x100] ss:$16 sps:$4 sm:$0xff]  }
  0x43   :  { %v6081_v53 = vld [vmem:[#allocation3 + $0x124] ss:$16 sps:$4 sm:$0xff]   ;;  %v6076_v54 = vld [vmem:[#allocation3 + $0x108] ss:$16 sps:$4 sm:$0xff]   ;;  %v6084_v56 = vld [vmem:[#allocation3 + $0x12c] ss:$16 sps:$4 sm:$0xff]  }
  0x44   :  { %v104_v57 = vld [vmem:[%s7628_s1 + $0x50] sm:$0xff]  ;;  %v6082_v60 = vld [vmem:[#allocation3 + $0x128] ss:$16 sps:$4 sm:$0xff]   ;;  %v106_v5 = vld [vmem:[%s7628_s1 + $0x60] sm:$0xff] }
  0x45   :  { %v6087_v59 = vld [vmem:[#allocation3 + $0x144] ss:$16 sps:$4 sm:$0xff]   ;;  %v6085_v62 = vld [vmem:[#allocation3 + $0x140] ss:$16 sps:$4 sm:$0xff]   ;;  %v6100_v13 = vld [vmem:[#allocation3 + $0x188] ss:$16 sps:$4 sm:$0xff]  }
  0x46   :  { %5125 = vmatmul.mubr.msk.bf16.gmra.mrb[8].mxu0 %vm256_vm0, %v88_v46  ;;  %v6093_v0 = vld [vmem:[#allocation3 + $0x164] ss:$16 sps:$4 sm:$0xff]   ;;  %v6103_v14 = vld [vmem:[#allocation3 + $0x1a0] ss:$16 sps:$4 sm:$0xff]   ;;  %v6112_v24 = vld [vmem:[#allocation3 + $0x1c8] ss:$16 sps:$4 sm:$0xff]  }
  0x47   :  { %343 = vmatprep.mubr.bf16.mxu0 %v6615_v1  ;;  %5133 = vmatmul.mubr.msk.bf16.gmra.mrb[8].mxu1 %vm256_vm0, %v88_v46  ;;  %v107_v6 = vld [vmem:[%s7628_s1 + $0x68] sm:$0xff]  ;;  %v6115_v25 = vld [vmem:[#allocation3 + $0x1e0] ss:$16 sps:$4 sm:$0xff]  }
  0x48   :  { %456 = vmatprep.mubr.bf16.mxu1 %v6615_v1 }
  0x4e   :  { %5126 = vmatmul.mubr.msk.bf16.gmra.mrb[12].mxu0 %vm256_vm0, %v89_v49 }
  0x4f   :  { %353 = vmatprep.mubr.bf16.mxu0 %v6615_v1  ;;  %5134 = vmatmul.mubr.msk.bf16.gmra.mrb[12].mxu1 %vm256_vm0, %v89_v49 }
  0x50   :  { %466 = vmatprep.mubr.bf16.mxu1 %v6615_v1 }
  0x56   :  { %5127 = vmatmul.mubr.msk.bf16.gmra.mrb[16].mxu0 %vm256_vm0, %v90_v52 }
  0x57   :  { %363 = vmatprep.mubr.bf16.mxu0 %v6615_v1  ;;  %5135 = vmatmul.mubr.msk.bf16.gmra.mrb[16].mxu1 %vm256_vm0, %v90_v52 }
  0x58   :  { %476 = vmatprep.mubr.bf16.mxu1 %v6615_v1 }
  0x5e   :  { %5128 = vmatmul.mubr.msk.bf16.gmra.mrb[20].mxu0 %vm256_vm0, %v91_v55 }
  0x5f   :  { %373 = vmatprep.mubr.bf16.mxu0 %v6615_v1  ;;  %5136 = vmatmul.mubr.msk.bf16.gmra.mrb[20].mxu1 %vm256_vm0, %v91_v55 }
  0x60   :  { %486 = vmatprep.mubr.bf16.mxu1 %v6615_v1 }
  0x66   :  { %5129 = vmatmul.mubr.msk.bf16.gmra.mrb[24].mxu0 %vm256_vm0, %v92_v58 }
  0x67   :  { %383 = vmatprep.mubr.bf16.mxu0 %v6615_v1  ;;  %5137 = vmatmul.mubr.msk.bf16.gmra.mrb[24].mxu1 %vm256_vm0, %v92_v58 }
  0x68   :  { %496 = vmatprep.mubr.bf16.mxu1 %v6615_v1 }
  0x6e   :  { %5130 = vmatmul.mubr.msk.bf16.gmra.mrb[28].mxu0 %vm256_vm0, %v93_v61 }
  0x6f   :  { %539 = vmatprep.mubr.bf16.mxu0 %v6615_v1  ;;  %5138 = vmatmul.mubr.msk.bf16.gmra.mrb[28].mxu1 %vm256_vm0, %v93_v61 }
  0x70   :  { %652 = vmatprep.mubr.bf16.mxu1 %v6615_v1 }
  0x76   :  { %5139 = vmatmul.mubr.msk.bf16.vlgmr.msra.gmra.mrb[32].mxu0 %vm256_vm0, %v6746_v22 }
  0x77   :  { %1232 = vmatpush1.bf16.msra.mxu0 %v1220_v2  ;;  %549 = vmatprep.mubr.bf16.mxu0 %v6615_v1  ;;  %v6088_v2 = vld [vmem:[#allocation3 + $0x148] ss:$16 sps:$4 sm:$0xff]  }
  0x78   :  { %2737 = vmatprep.subr.bf16.mxu0 %v6027_v63  ;;  %5147 = vmatmul.mubr.msk.bf16.vlgmr.msra.gmra.mrb[32].mxu1 %vm256_vm0, %v6746_v22  ;;  %v6043_v22 = vld [vmem:[#allocation3 + $0x60] ss:$16 sps:$4 sm:$0xff]   ;;  %v6090_v63 = vld [vmem:[#allocation3 + $0x14c] ss:$16 sps:$4 sm:$0xff]  }
  0x79   :  { %662 = vmatprep.mubr.bf16.mxu1 %v6615_v1  ;;  %1345 = vmatpush1.bf16.msra.mxu1 %v1226_v4  ;;  %v6096_v4 = vld [vmem:[#allocation3 + $0x16c] ss:$16 sps:$4 sm:$0xff]  }
  0x7a   :  { %3189 = vmatprep.subr.bf16.mxu1 %v6030_v3  ;;  %v6091_v3 = vld [vmem:[#allocation3 + $0x160] ss:$16 sps:$4 sm:$0xff]  }
  0x7e   :  { %5140 = vmatmul.mubr.msk.bf16.gmra.mrb[36].mxu0 %vm256_vm0, %v6789_v41 }
  0x7f   :  { %559 = vmatprep.mubr.bf16.mxu0 %v6615_v1 }
  0x80   :  { %5148 = vmatmul.mubr.msk.bf16.gmra.mrb[36].mxu1 %vm256_vm0, %v6789_v41  ;;  %v6066_v41 = vld [vmem:[#allocation3 + $0xcc] ss:$16 sps:$4 sm:$0xff]  }
  0x81   :  { %672 = vmatprep.mubr.bf16.mxu1 %v6615_v1 }
  0x86   :  { %5141 = vmatmul.mubr.msk.bf16.gmra.mrb[40].mxu0 %vm256_vm0, %v88_v46 }
  0x87   :  { %569 = vmatprep.mubr.bf16.mxu0 %v6615_v1 }
  0x88   :  { %5149 = vmatmul.mubr.msk.bf16.gmra.mrb[40].mxu1 %vm256_vm0, %v88_v46  ;;  %v102_v46 = vld [vmem:[%s7628_s1 + $0x40] sm:$0xff] }
  0x89   :  { %682 = vmatprep.mubr.bf16.mxu1 %v6615_v1  ;;  %v114_v50 = vpack.c.bf16 %v103_v47, %v102_v46 }
  0x8e   :  { %5142 = vmatmul.mubr.msk.bf16.gmra.mrb[44].mxu0 %vm256_vm0, %v89_v49 }
  0x8f   :  { %579 = vmatprep.mubr.bf16.mxu0 %v6615_v1 }
  0x90   :  { %5150 = vmatmul.mubr.msk.bf16.gmra.mrb[44].mxu1 %vm256_vm0, %v89_v49  ;;  %v6070_v49 = vld [vmem:[#allocation3 + $0xe8] ss:$16 sps:$4 sm:$0xff]  }
  0x91   :  { %692 = vmatprep.mubr.bf16.mxu1 %v6615_v1 }
  0x96   :  { %5143 = vmatmul.mubr.msk.bf16.gmra.mrb[48].mxu0 %vm256_vm0, %v90_v52 }
  0x97   :  { %589 = vmatprep.mubr.bf16.mxu0 %v6615_v1 }
  0x98   :  { %5151 = vmatmul.mubr.msk.bf16.gmra.mrb[48].mxu1 %vm256_vm0, %v90_v52  ;;  %v6078_v52 = vld [vmem:[#allocation3 + $0x10c] ss:$16 sps:$4 sm:$0xff]  }
  0x99   :  { %702 = vmatprep.mubr.bf16.mxu1 %v6615_v1 }
  0x9e   :  { %5144 = vmatmul.mubr.msk.bf16.gmra.mrb[52].mxu0 %vm256_vm0, %v91_v55 }
  0x9f   :  { %599 = vmatprep.mubr.bf16.mxu0 %v6615_v1 }
  0xa0   :  { %5152 = vmatmul.mubr.msk.bf16.gmra.mrb[52].mxu1 %vm256_vm0, %v91_v55  ;;  %v6079_v55 = vld [vmem:[#allocation3 + $0x120] ss:$16 sps:$4 sm:$0xff]  }
  0xa1   :  { %712 = vmatprep.mubr.bf16.mxu1 %v6615_v1 }
  0xa6   :  { %5145 = vmatmul.mubr.msk.bf16.gmra.mrb[56].mxu0 %vm256_vm0, %v92_v58 }
  0xa7   :  { %609 = vmatprep.mubr.bf16.mxu0 %v6615_v1 }
  0xa8   :  { %5153 = vmatmul.mubr.msk.bf16.gmra.mrb[56].mxu1 %vm256_vm0, %v92_v58  ;;  %v105_v58 = vld [vmem:[%s7628_s1 + $0x58] sm:$0xff] }
  0xa9   :  { %722 = vmatprep.mubr.bf16.mxu1 %v6615_v1 }
  0xae   :  { %5146 = vmatmul.mubr.msk.bf16.gmra.mrb[60].mxu0 %vm256_vm0, %v93_v61 }
  0xaf   :  { %1263 = vmatprep.mubr.bf16.mxu0 %v6615_v1 }
  0xb0   :  { %5154 = vmatmul.mubr.msk.bf16.gmra.mrb[60].mxu1 %vm256_vm0, %v93_v61  ;;  %v115_v61 = vpack.c.bf16 %v105_v58, %v104_v57 }
  0xb1   :  { %1376 = vmatprep.mubr.bf16.mxu1 %v6615_v1 }
  0xb6   :  { %5160 = vmatmul.mubr.msk.bf16.vlgmr.msra.gmra.mrb[64].mxu0 %vm1193_vm2, %v110_v7 }
  0xb7   :  { %2738 = vmatpush1.bf16.msra.mxu0 %v6025_v8  ;;  %1273 = vmatprep.mubr.bf16.mxu0 %v6615_v1  ;;  %v6094_v8 = vld [vmem:[#allocation3 + $0x168] ss:$16 sps:$4 sm:$0xff]  }
  0xb8   :  { %2739 = vmatprep.subr.bf16.mxu0 %v6033_v9  ;;  %5169 = vmatmul.mubr.msk.bf16.vlgmr.msra.gmra.mrb[64].mxu1 %vm1193_vm2, %v110_v7  ;;  %v6099_v7 = vld [vmem:[#allocation3 + $0x184] ss:$16 sps:$4 sm:$0xff]   ;;  %v116_v9 = vpack.c.bf16 %v107_v6, %v106_v5 }
  0xb9   :  { %3190 = vmatpush1.bf16.msra.mxu1 %v6028_v10  ;;  %1386 = vmatprep.mubr.bf16.mxu1 %v6615_v1  ;;  %v6097_v10 = vld [vmem:[#allocation3 + $0x180] ss:$16 sps:$4 sm:$0xff]  }
  0xba   :  { %3191 = vmatprep.subr.bf16.mxu1 %v6036_v12  ;;  %v6105_v12 = vld [vmem:[#allocation3 + $0x1a4] ss:$16 sps:$4 sm:$0xff]  }
  0xbb   :  { %2740 = vmatpush1.bf16.msra.mxu0 %v6031_v11  ;;  %v6102_v11 = vld [vmem:[#allocation3 + $0x18c] ss:$16 sps:$4 sm:$0xff]  }
  0xbc   :  { %2741 = vmatprep.subr.bf16.mxu0 %v6039_v15  ;;  %v6108_v15 = vld [vmem:[#allocation3 + $0x1ac] ss:$16 sps:$4 sm:$0xff]  }
  0xbd   :  { %3192 = vmatpush1.bf16.msra.mxu1 %v6034_v16  ;;  %v108_v16 = vld [vmem:[%s7628_s1 + $0x70] sm:$0xff] }
  0xbe   :  { %5161 = vmatmul.mubr.msk.bf16.gmra.mrb[68].mxu0 %vm1193_vm2, %v111_v17  ;;  %3193 = vmatprep.subr.bf16.mxu1 %v6042_v19  ;;  %v6106_v19 = vld [vmem:[#allocation3 + $0x1a8] ss:$16 sps:$4 sm:$0xff]  }
  0xbf   :  { %2742 = vmatpush1.bf16.msra.mxu0 %v6037_v18  ;;  %1283 = vmatprep.mubr.bf16.mxu0 %v6615_v1  ;;  %v6111_v18 = vld [vmem:[#allocation3 + $0x1c4] ss:$16 sps:$4 sm:$0xff]  }
  0xc0   :  { %2743 = vmatprep.subr.bf16.mxu0 %v6045_v20  ;;  %5170 = vmatmul.mubr.msk.bf16.gmra.mrb[68].mxu1 %vm1193_vm2, %v111_v17  ;;  %v109_v17 = vld [vmem:[%s7628_s1 + $0x78] sm:$0xff] }
  0xc1   :  { %3194 = vmatpush1.bf16.msra.mxu1 %v6040_v21  ;;  %1396 = vmatprep.mubr.bf16.mxu1 %v6615_v1  ;;  %v117_v20 = vpack.c.bf16 %v109_v17, %v108_v16  ;;  %v6114_v21 = vld [vmem:[#allocation3 + $0x1cc] ss:$16 sps:$4 sm:$0xff]  }
  0xc2   :  { %3195 = vmatprep.subr.bf16.mxu1 %v6048_v23  ;;  %v6117_v23 = vld [vmem:[#allocation3 + $0x1e4] ss:$16 sps:$4 sm:$0xff]  }
  0xc3   :  { %2744 = vmatpush1.bf16.msra.mxu0 %v6043_v22  ;;  %v6109_v22 = vld [vmem:[#allocation3 + $0x1c0] ss:$16 sps:$4 sm:$0xff]  }
  0xc4   :  { %2745 = vmatprep.subr.bf16.mxu0 %v6051_v26  ;;  %v6120_v26 = vld [vmem:[#allocation3 + $0x1ec] ss:$16 sps:$4 sm:$0xff]  }
  0xc5   :  { %3196 = vmatpush1.bf16.msra.mxu1 %v6046_v27  ;;  %v6123_v27 = vld [vmem:[#allocation3 + $0x204] ss:$16 sps:$4 sm:$0xff]  }
  0xc6   :  { %5162 = vmatmul.mubr.msk.bf16.gmra.mrb[72].mxu0 %vm1193_vm2, %v112_v28  ;;  %3197 = vmatprep.subr.bf16.mxu1 %v6054_v30 }
  0xc7   :  { %2746 = vmatpush1.bf16.msra.mxu0 %v6049_v29  ;;  %1293 = vmatprep.mubr.bf16.mxu0 %v6615_v1  ;;  %v136_v29 = vlaneseq }
  0xc8   :  { %2747 = vmatprep.subr.bf16.mxu0 %v6057_v31  ;;  %5171 = vmatmul.mubr.msk.bf16.gmra.mrb[72].mxu1 %vm1193_vm2, %v112_v28  ;;  %v6126_v28 = vld [vmem:[#allocation3 + $0x20c] ss:$16 sps:$4 sm:$0xff]  }
  0xc9   :  { %3198 = vmatpush1.bf16.msra.mxu1 %v6052_v32  ;;  %1406 = vmatprep.mubr.bf16.mxu1 %v6615_v1  ;;  %v6982_v30 = vshrl.u32 %v136_v29, 7  ;;  %v6990_v32 = vld [vmem:[%s7630_s3] sm:$0xff] }
  0xca   :  { %3199 = vmatprep.subr.bf16.mxu1 %v6060_v34 }
  0xcb   :  { %2748 = vmatpush1.bf16.msra.mxu0 %v6055_v33  ;;  %v6985_v31 = vsub.s32 0, %v6982_v30  ;;  %v6993_v33 = vsub.s32 1, %v6982_v30  ;;  %v6996_v34 = vsub.s32 2, %v6982_v30  ;;  %v150_v36 = vsub.s32 3, %v6982_v30 }
  0xcc   :  { %2749 = vmatprep.subr.bf16.mxu0 %v6063_v37 }
  0xcd   :  { %3200 = vmatpush1.bf16.msra.mxu1 %v6058_v38  ;;  %v7000_v35 = vrot.slane %v6990_v32, %v6985_v31  ;;  %v7005_v37 = vrot.slane %v6990_v32, %v6993_v33 }
  0xce   :  { %5163 = vmatmul.mubr.msk.bf16.gmra.mrb[76].mxu0 %vm1193_vm2, %v113_v39  ;;  %3201 = vmatprep.subr.bf16.mxu1 %v6066_v41 }
  0xcf   :  { %2750 = vmatpush1.bf16.msra.mxu0 %v6061_v40  ;;  %1303 = vmatprep.mubr.bf16.mxu0 %v6615_v1 }
  0xd0   :  { %2751 = vmatprep.subr.bf16.mxu0 %v6069_v42  ;;  %5172 = vmatmul.mubr.msk.bf16.gmra.mrb[76].mxu1 %vm1193_vm2, %v113_v39  ;;  %v7009_v39 = vrot.slane %v6990_v32, %v6996_v34  ;;  %v7015_v42 = vrot.slane %v6990_v32, %v150_v36 }
  0xd1   :  { %3202 = vmatpush1.bf16.msra.mxu1 %v6064_v43  ;;  %1416 = vmatprep.mubr.bf16.mxu1 %v6615_v1 }
  0xd2   :  { %3203 = vmatprep.subr.bf16.mxu1 %v6072_v45 }
  0xd3   :  { %2752 = vmatpush1.bf16.msra.mxu0 %v6067_v44 }
  0xd4   :  { %2753 = vmatprep.subr.bf16.mxu0 %v6075_v48 }
  0xd5   :  { %3204 = vmatpush1.bf16.msra.mxu1 %v6070_v49 }
  0xd6   :  { %5164 = vmatmul.mubr.msk.bf16.gmra.mrb[80].mxu0 %vm1193_vm2, %v114_v50  ;;  %3205 = vmatprep.subr.bf16.mxu1 %v6078_v52 }
  0xd7   :  { %2754 = vmatpush1.bf16.msra.mxu0 %v6073_v51  ;;  %1313 = vmatprep.mubr.bf16.mxu0 %v6615_v1 }
  0xd8   :  { %2755 = vmatprep.subr.bf16.mxu0 %v6081_v53  ;;  %5173 = vmatmul.mubr.msk.bf16.gmra.mrb[80].mxu1 %vm1193_vm2, %v114_v50 }
  0xd9   :  { %3206 = vmatpush1.bf16.msra.mxu1 %v6076_v54  ;;  %1426 = vmatprep.mubr.bf16.mxu1 %v6615_v1 }
  0xda   :  { %3207 = vmatprep.subr.bf16.mxu1 %v6084_v56 }
  0xdb   :  { %2756 = vmatpush1.bf16.msra.mxu0 %v6079_v55 }
  0xdc   :  { %2757 = vmatprep.subr.bf16.mxu0 %v6087_v59 }
  0xdd   :  { %3208 = vmatpush1.bf16.msra.mxu1 %v6082_v60 }
  0xde   :  { %5165 = vmatmul.mubr.msk.bf16.gmra.mrb[84].mxu0 %vm1193_vm2, %v115_v61  ;;  %3209 = vmatprep.subr.bf16.mxu1 %v6090_v63 }
  0xdf   :  { %2758 = vmatpush1.bf16.msra.mxu0 %v6085_v62  ;;  %1323 = vmatprep.mubr.bf16.mxu0 %v6615_v1 }
  0xe0   :  { %2759 = vmatprep.subr.bf16.mxu0 %v6093_v0  ;;  %5174 = vmatmul.mubr.msk.bf16.gmra.mrb[84].mxu1 %vm1193_vm2, %v115_v61 }
  0xe1   :  { %3210 = vmatpush1.bf16.msra.mxu1 %v6088_v2  ;;  %1436 = vmatprep.mubr.bf16.mxu1 %v6615_v1  ;;  %v6121_v2 = vld [vmem:[#allocation3 + $0x200] ss:$16 sps:$4 sm:$0xff]  }
  0xe2   :  { %3211 = vmatprep.subr.bf16.mxu1 %v6096_v4 }
  0xe3   :  { %2760 = vmatpush1.bf16.msra.mxu0 %v6091_v3  ;;  %v6124_v3 = vld [vmem:[#allocation3 + $0x208] ss:$16 sps:$4 sm:$0xff]  }
  0xe4   :  { %2761 = vmatprep.subr.bf16.mxu0 %v6099_v7  ;;  %v6129_v7 = vld [vmem:[#allocation3 + $0x224] ss:$16 sps:$4 sm:$0xff]  }
  0xe5   :  { %3212 = vmatpush1.bf16.msra.mxu1 %v6094_v8  ;;  %v6132_v8 = vld [vmem:[#allocation3 + $0x22c] ss:$16 sps:$4 sm:$0xff]  }
  0xe6   :  { %5166 = vmatmul.mubr.msk.bf16.gmra.mrb[88].mxu0 %vm1193_vm2, %v116_v9  ;;  %3213 = vmatprep.subr.bf16.mxu1 %v6102_v11 }
  0xe7   :  { %2762 = vmatpush1.bf16.msra.mxu0 %v6097_v10  ;;  %1333 = vmatprep.mubr.bf16.mxu0 %v6615_v1 }
  0xe8   :  { %2763 = vmatprep.subr.bf16.mxu0 %v6105_v12  ;;  %5175 = vmatmul.mubr.msk.bf16.gmra.mrb[88].mxu1 %vm1193_vm2, %v116_v9 }
  0xe9   :  { %3214 = vmatpush1.bf16.msra.mxu1 %v6100_v13  ;;  %1446 = vmatprep.mubr.bf16.mxu1 %v6615_v1  ;;  %v6118_v1 = vld [vmem:[#allocation3 + $0x1e8] ss:$16 sps:$4 sm:$0xff]  }
  0xea   :  { %3215 = vmatprep.subr.bf16.mxu1 %v6108_v15  ;;  %v6127_v15 = vld [vmem:[#allocation3 + $0x220] ss:$16 sps:$4 sm:$0xff]  }
  0xeb   :  { %2764 = vmatpush1.bf16.msra.mxu0 %v6103_v14 }
  0xec   :  { %2765 = vmatprep.subr.bf16.mxu0 %v6111_v18 }
  0xed   :  { %3216 = vmatpush1.bf16.msra.mxu1 %v6106_v19  ;;  %v6130_v19 = vld [vmem:[#allocation3 + $0x228] ss:$16 sps:$4 sm:$0xff]  }
  0xee   :  { %5167 = vmatmul.mubr.msk.bf16.gmra.mrb[92].mxu0 %vm1193_vm2, %v117_v20  ;;  %3217 = vmatprep.subr.bf16.mxu1 %v6114_v21 }
  0xef   :  { %2766 = vmatpush1.bf16.msra.mxu0 %v6109_v22 }
  0xf0   :  { %2767 = vmatprep.subr.bf16.mxu0 %v6117_v23  ;;  %5176 = vmatmul.mubr.msk.bf16.gmra.mrb[92].mxu1 %vm1193_vm2, %v117_v20  ;;  %v6135_v20 = vld [vmem:[#allocation3 + $0x244] ss:$16 sps:$4 sm:$0xff]  }
  0xf1   :  { %3218 = vmatpush1.bf16.msra.mxu1 %v6112_v24 }
  0xf2   :  { %3219 = vmatprep.subr.bf16.mxu1 %v6120_v26 }
  0xf3   :  { %2768 = vmatpush1.bf16.msra.mxu0 %v6115_v25  ;;  %v6138_v25 = vld [vmem:[#allocation3 + $0x24c] ss:$16 sps:$4 sm:$0xff]  }
  0xf4   :  { %2850 = vmatprep.subr.bf16.mxu0 %v6123_v27 }
  0xf5   :  { %3220 = vmatpush1.bf16.msra.mxu1 %v6118_v1 }
  0xf6   :  { %3302 = vmatprep.subr.bf16.mxu1 %v6126_v28 }
 0x109   :  { %v315_v38 = vpop.f32.mrb[0].mxu0  ;;  %v428_v47 = vpop.f32.mrb[0].mxu1 }
 0x10a   :  { %v316_v40 = vadd.f32 %v315_v38, %v7000_v35  ;;  %v317_v41 = vpop.f32.mrb[1].mxu0  ;;  %v429_v49 = vadd.f32 %v428_v47, %v7009_v39  ;;  %v430_v50 = vpop.f32.mrb[1].mxu1  ;;  %v6133_v47 = vld [vmem:[#allocation3 + $0x240] ss:$16 sps:$4 sm:$0xff]  }
 0x10b   :  { %v318_v43 = vadd.f32 %v317_v41, %v7005_v37  ;;  %v319_v44 = vpop.f32.mrb[2].mxu0  ;;  %v431_v53 = vadd.f32 %v430_v50, %v7015_v42  ;;  %v432_v54 = vpop.f32.mrb[2].mxu1 }
 0x10c   :  { %v320_v45 = vadd.f32 %v319_v44, %v7000_v35  ;;  %v321_v46 = vpop.f32.mrb[3].mxu0  ;;  %v733_v51 = vmax.f32 %v316_v40, 0.0  ;;  %v735_v57 = vmax.f32 %v429_v49, 0.0  ;;  %v433_v58 = vadd.f32 %v432_v54, %v7009_v39  ;;  %v434_v59 = vpop.f32.mrb[3].mxu1 }
 0x10d   :  { %v322_v48 = vadd.f32 %v321_v46, %v7005_v37  ;;  %v734_v55 = vmax.f32 %v318_v43, 0.0  ;;  %v736_v61 = vmax.f32 %v431_v53, 0.0  ;;  %v435_v62 = vadd.f32 %v434_v59, %v7015_v42  ;;  %v6144_v53 = vld [vmem:[#allocation3 + $0x26c] ss:$16 sps:$4 sm:$0xff]  }
 0x10e   :  { %v741_v52 = vmax.f32 %v320_v45, 0.0  ;;  %v743_v4 = vmax.f32 %v433_v58, 0.0 }
 0x10f   :  { %v742_v56 = vmax.f32 %v322_v48, 0.0  ;;  %v744_v9 = vmax.f32 %v435_v62, 0.0  ;;  %v6136_v48 = vld [vmem:[#allocation3 + $0x248] ss:$16 sps:$4 sm:$0xff]  }
 0x110   :  { %v861_v60 = vpack.c.bf16 %v741_v52, %v733_v51  ;;  %v7026_v12 = vpack.c.bf16 %v743_v4, %v735_v57  ;;  %v6141_v52 = vld [vmem:[#allocation3 + $0x264] ss:$16 sps:$4 sm:$0xff]  }
 0x111   :  { %v862_v63 = vpack.c.bf16 %v742_v56, %v734_v55  ;;  %v325_v0 = vpop.f32.mrb[4].mxu0  ;;  %v7029_v16 = vpack.c.bf16 %v744_v9, %v736_v61 }
 0x112   :  { %v326_v5 = vadd.f32 %v325_v0, %v7000_v35  ;;  %v327_v6 = vpop.f32.mrb[5].mxu0  ;;  %v438_v17 = vpop.f32.mrb[4].mxu1  ;;  %v6142_v0 = vld [vmem:[#allocation3 + $0x268] ss:$16 sps:$4 sm:$0xff]  }
 0x113   :  { %v328_v10 = vadd.f32 %v327_v6, %v7005_v37  ;;  %v329_v11 = vpop.f32.mrb[6].mxu0  ;;  %2769 = vmatprep.mubr.bf16.mxu0 %v862_v63  ;;  %3221 = vmatprep.mubr.bf16.mxu1 %v862_v63  ;;  %v439_v21 = vadd.f32 %v438_v17, %v7009_v39  ;;  %v440_v22 = vpop.f32.mrb[5].mxu1 }
 0x114   :  { %v330_v13 = vadd.f32 %v329_v11, %v7000_v35  ;;  %v331_v14 = vpop.f32.mrb[7].mxu0  ;;  %2770 = vmatmul.mubr.bf16.vlgmr.msra.gmra.mrb[64].mxu0 %v861_v60  ;;  %3222 = vmatmul.mubr.bf16.vlgmr.msra.gmra.mrb[64].mxu1 %v861_v60  ;;  %v749_v23 = vmax.f32 %v326_v5, 0.0  ;;  %v441_v26 = vadd.f32 %v440_v22, %v7015_v42  ;;  %v442_v27 = vpop.f32.mrb[6].mxu1  ;;  %v6139_v60 = vld [vmem:[#allocation3 + $0x260] ss:$16 sps:$4 sm:$0xff]  }
 0x115   :  { %v332_v18 = vadd.f32 %v331_v14, %v7005_v37  ;;  %2851 = vmatpush1.bf16.msra.mxu0 %v6121_v2  ;;  %3303 = vmatpush1.bf16.msra.mxu1 %v6124_v3  ;;  %v750_v1 = vmax.f32 %v328_v10, 0.0  ;;  %v751_v29 = vmax.f32 %v439_v21, 0.0  ;;  %v443_v38 = vadd.f32 %v442_v27, %v7009_v39  ;;  %v444_v40 = vpop.f32.mrb[7].mxu1  ;;  %v6147_v2 = vld [vmem:[#allocation3 + $0x284] ss:$16 sps:$4 sm:$0xff]  }
 0x116   :  { %v757_v24 = vmax.f32 %v330_v13, 0.0  ;;  %2852 = vmatprep.subr.bf16.mxu0 %v6129_v7  ;;  %3304 = vmatprep.subr.bf16.mxu1 %v6132_v8  ;;  %v752_v43 = vmax.f32 %v441_v26, 0.0  ;;  %v445_v44 = vadd.f32 %v444_v40, %v7015_v42  ;;  %v6150_v7 = vld [vmem:[#allocation3 + $0x28c] ss:$16 sps:$4 sm:$0xff]   ;;  %v6145_v22 = vld [vmem:[#allocation3 + $0x280] ss:$16 sps:$4 sm:$0xff]  }
 0x117   :  { %v758_v28 = vmax.f32 %v332_v18, 0.0  ;;  %v759_v49 = vmax.f32 %v443_v38, 0.0  ;;  %v6153_v27 = vld [vmem:[#allocation3 + $0x2a4] ss:$16 sps:$4 sm:$0xff]  }
 0x118   :  { %v869_v41 = vpack.c.bf16 %v757_v24, %v749_v23  ;;  %v760_v54 = vmax.f32 %v445_v44, 0.0  ;;  %v6148_v23 = vld [vmem:[#allocation3 + $0x288] ss:$16 sps:$4 sm:$0xff]   ;;  %v6151_v44 = vld [vmem:[#allocation3 + $0x2a0] ss:$16 sps:$4 sm:$0xff]  }
 0x119   :  { %v870_v45 = vpack.c.bf16 %v758_v28, %v750_v1  ;;  %v335_v46 = vpop.f32.mrb[8].mxu0  ;;  %2853 = vmatpush1.bf16.msra.mxu0 %v6127_v15  ;;  %3305 = vmatpush1.bf16.msra.mxu1 %v6130_v19  ;;  %v7038_v57 = vpack.c.bf16 %v759_v49, %v751_v29  ;;  %v6156_v1 = vld [vmem:[#allocation3 + $0x2ac] ss:$16 sps:$4 sm:$0xff]   ;;  %v6159_v49 = vld [vmem:[#allocation3 + $0x2c4] ss:$16 sps:$4 sm:$0xff]  }
 0x11a   :  { %v336_v50 = vadd.f32 %v335_v46, %v7000_v35  ;;  %v337_v51 = vpop.f32.mrb[9].mxu0  ;;  %2854 = vmatprep.subr.bf16.mxu0 %v6135_v20  ;;  %3306 = vmatprep.subr.bf16.mxu1 %v6138_v25  ;;  %v7041_v61 = vpack.c.bf16 %v760_v54, %v752_v43  ;;  %v448_v62 = vpop.f32.mrb[8].mxu1  ;;  %v6162_v54 = vld [vmem:[#allocation3 + $0x2cc] ss:$16 sps:$4 sm:$0xff]  }
 0x11b   :  { %v338_v55 = vadd.f32 %v337_v51, %v7005_v37  ;;  %v339_v56 = vpop.f32.mrb[10].mxu0  ;;  %2779 = vmatprep.mubr.bf16.mxu0 %v870_v45  ;;  %3231 = vmatprep.mubr.bf16.mxu1 %v870_v45  ;;  %v449_v3 = vadd.f32 %v448_v62, %v7009_v39  ;;  %v450_v4 = vpop.f32.mrb[9].mxu1 }
 0x11c   :  { %v340_v58 = vadd.f32 %v339_v56, %v7000_v35  ;;  %v341_v59 = vpop.f32.mrb[11].mxu0  ;;  %2780 = vmatmul.mubr.bf16.gmra.mrb[68].mxu0 %v869_v41  ;;  %3232 = vmatmul.mubr.bf16.gmra.mrb[68].mxu1 %v869_v41  ;;  %v765_v5 = vmax.f32 %v336_v50, 0.0  ;;  %v451_v8 = vadd.f32 %v450_v4, %v7015_v42  ;;  %v452_v9 = vpop.f32.mrb[10].mxu1 }
 0x11d   :  { %v342_v63 = vadd.f32 %v341_v59, %v7005_v37  ;;  %2855 = vmatpush1.bf16.msra.mxu0 %v6133_v47  ;;  %3307 = vmatpush1.bf16.msra.mxu1 %v6136_v48  ;;  %v766_v10 = vmax.f32 %v338_v55, 0.0  ;;  %v767_v13 = vmax.f32 %v449_v3, 0.0  ;;  %v453_v14 = vadd.f32 %v452_v9, %v7009_v39  ;;  %v454_v15 = vpop.f32.mrb[11].mxu1  ;;  %v6154_v48 = vld [vmem:[#allocation3 + $0x2a8] ss:$16 sps:$4 sm:$0xff]  }
 0x11e   :  { %v773_v6 = vmax.f32 %v340_v58, 0.0  ;;  %2856 = vmatprep.subr.bf16.mxu0 %v6141_v52  ;;  %3308 = vmatprep.subr.bf16.mxu1 %v6144_v53  ;;  %v768_v18 = vmax.f32 %v451_v8, 0.0  ;;  %v455_v19 = vadd.f32 %v454_v15, %v7015_v42 }
 0x11f   :  { %v774_v11 = vmax.f32 %v342_v63, 0.0  ;;  %v775_v24 = vmax.f32 %v453_v14, 0.0 }
 0x120   :  { %v877_v17 = vpack.c.bf16 %v773_v6, %v765_v5  ;;  %v776_v28 = vmax.f32 %v455_v19, 0.0  ;;  %v6157_v6 = vld [vmem:[#allocation3 + $0x2c0] ss:$16 sps:$4 sm:$0xff]  }
 0x121   :  { %v878_v20 = vpack.c.bf16 %v774_v11, %v766_v10  ;;  %v345_v21 = vpop.f32.mrb[12].mxu0  ;;  %2857 = vmatpush1.bf16.msra.mxu0 %v6139_v60  ;;  %3309 = vmatpush1.bf16.msra.mxu1 %v6142_v0  ;;  %v7050_v40 = vpack.c.bf16 %v775_v24, %v767_v13  ;;  %v6165_v11 = vld [vmem:[#allocation3 + $0x2e4] ss:$16 sps:$4 sm:$0xff]   ;;  %v6168_v13 = vld [vmem:[#allocation3 + $0x2ec] ss:$16 sps:$4 sm:$0xff]  }
 0x122   :  { %v346_v25 = vadd.f32 %v345_v21, %v7000_v35  ;;  %v347_v26 = vpop.f32.mrb[13].mxu0  ;;  %2858 = vmatprep.subr.bf16.mxu0 %v6147_v2  ;;  %3310 = vmatprep.subr.bf16.mxu1 %v6150_v7  ;;  %v7053_v45 = vpack.c.bf16 %v776_v28, %v768_v18  ;;  %v458_v46 = vpop.f32.mrb[12].mxu1  ;;  %v6160_v7 = vld [vmem:[#allocation3 + $0x2c8] ss:$16 sps:$4 sm:$0xff]   ;;  %v6163_v21 = vld [vmem:[#allocation3 + $0x2e0] ss:$16 sps:$4 sm:$0xff]  }
 0x123   :  { %v348_v29 = vadd.f32 %v347_v26, %v7005_v37  ;;  %v349_v38 = vpop.f32.mrb[14].mxu0  ;;  %2789 = vmatprep.mubr.bf16.mxu0 %v878_v20  ;;  %3241 = vmatprep.mubr.bf16.mxu1 %v878_v20  ;;  %v459_v50 = vadd.f32 %v458_v46, %v7009_v39  ;;  %v460_v51 = vpop.f32.mrb[13].mxu1  ;;  %v6171_v26 = vld [vmem:[#allocation3 + $0x304] ss:$16 sps:$4 sm:$0xff]  }
 0x124   :  { %v350_v41 = vadd.f32 %v349_v38, %v7000_v35  ;;  %v351_v43 = vpop.f32.mrb[15].mxu0  ;;  %2790 = vmatmul.mubr.bf16.gmra.mrb[72].mxu0 %v877_v17  ;;  %3242 = vmatmul.mubr.bf16.gmra.mrb[72].mxu1 %v877_v17  ;;  %v781_v52 = vmax.f32 %v346_v25, 0.0  ;;  %v461_v55 = vadd.f32 %v460_v51, %v7015_v42  ;;  %v462_v56 = vpop.f32.mrb[14].mxu1  ;;  %v6166_v25 = vld [vmem:[#allocation3 + $0x2e8] ss:$16 sps:$4 sm:$0xff]  }
 0x125   :  { %v352_v47 = vadd.f32 %v351_v43, %v7005_v37  ;;  %2859 = vmatpush1.bf16.msra.mxu0 %v6145_v22  ;;  %3311 = vmatpush1.bf16.msra.mxu1 %v6148_v23  ;;  %v782_v58 = vmax.f32 %v348_v29, 0.0  ;;  %v783_v60 = vmax.f32 %v459_v50, 0.0  ;;  %v463_v62 = vadd.f32 %v462_v56, %v7009_v39  ;;  %v464_v63 = vpop.f32.mrb[15].mxu1  ;;  %v6174_v38 = vld [vmem:[#allocation3 + $0x30c] ss:$16 sps:$4 sm:$0xff]  }
 0x126   :  { %v789_v53 = vmax.f32 %v350_v41, 0.0  ;;  %2860 = vmatprep.subr.bf16.mxu0 %v6153_v27  ;;  %3312 = vmatprep.subr.bf16.mxu1 %v6156_v1  ;;  %v784_v2 = vmax.f32 %v461_v55, 0.0  ;;  %v465_v3 = vadd.f32 %v464_v63, %v7015_v42  ;;  %v6169_v55 = vld [vmem:[#allocation3 + $0x300] ss:$16 sps:$4 sm:$0xff]   ;;  %v6172_v56 = vld [vmem:[#allocation3 + $0x308] ss:$16 sps:$4 sm:$0xff]  }
 0x127   :  { %v790_v59 = vmax.f32 %v352_v47, 0.0  ;;  %v791_v8 = vmax.f32 %v463_v62, 0.0  ;;  %v6177_v62 = vld [vmem:[#allocation3 + $0x324] ss:$16 sps:$4 sm:$0xff]   ;;  %v6180_v63 = vld [vmem:[#allocation3 + $0x32c] ss:$16 sps:$4 sm:$0xff]  }
 0x128   :  { %v885_v0 = vpack.c.bf16 %v789_v53, %v781_v52  ;;  %v792_v14 = vmax.f32 %v465_v3, 0.0 }
 0x129   :  { %v886_v4 = vpack.c.bf16 %v790_v59, %v782_v58  ;;  %v355_v5 = vpop.f32.mrb[16].mxu0  ;;  %2861 = vmatpush1.bf16.msra.mxu0 %v6151_v44  ;;  %3313 = vmatpush1.bf16.msra.mxu1 %v6154_v48  ;;  %v7062_v18 = vpack.c.bf16 %v791_v8, %v783_v60 }
 0x12a   :  { %v356_v9 = vadd.f32 %v355_v5, %v7000_v35  ;;  %v357_v10 = vpop.f32.mrb[17].mxu0  ;;  %2862 = vmatprep.subr.bf16.mxu0 %v6159_v49  ;;  %3314 = vmatprep.subr.bf16.mxu1 %v6162_v54  ;;  %v7065_v22 = vpack.c.bf16 %v792_v14, %v784_v2  ;;  %v468_v23 = vpop.f32.mrb[16].mxu1 }
 0x12b   :  { %v358_v15 = vadd.f32 %v357_v10, %v7005_v37  ;;  %v359_v17 = vpop.f32.mrb[18].mxu0  ;;  %2799 = vmatprep.mubr.bf16.mxu0 %v886_v4  ;;  %3251 = vmatprep.mubr.bf16.mxu1 %v886_v4  ;;  %v469_v27 = vadd.f32 %v468_v23, %v7009_v39  ;;  %v470_v1 = vpop.f32.mrb[17].mxu1 }
 0x12c   :  { %v360_v19 = vadd.f32 %v359_v17, %v7000_v35  ;;  %v361_v20 = vpop.f32.mrb[19].mxu0  ;;  %2800 = vmatmul.mubr.bf16.gmra.mrb[76].mxu0 %v885_v0  ;;  %3252 = vmatmul.mubr.bf16.gmra.mrb[76].mxu1 %v885_v0  ;;  %v797_v28 = vmax.f32 %v356_v9, 0.0  ;;  %v471_v41 = vadd.f32 %v470_v1, %v7015_v42  ;;  %v472_v43 = vpop.f32.mrb[18].mxu1 }
 0x12d   :  { %v362_v24 = vadd.f32 %v361_v20, %v7005_v37  ;;  %2863 = vmatpush1.bf16.msra.mxu0 %v6157_v6  ;;  %3315 = vmatpush1.bf16.msra.mxu1 %v6160_v7  ;;  %v798_v44 = vmax.f32 %v358_v15, 0.0  ;;  %v799_v47 = vmax.f32 %v469_v27, 0.0  ;;  %v473_v48 = vadd.f32 %v472_v43, %v7009_v39  ;;  %v474_v49 = vpop.f32.mrb[19].mxu1  ;;  %v6175_v7 = vld [vmem:[#allocation3 + $0x320] ss:$16 sps:$4 sm:$0xff]  }
 0x12e   :  { %v805_v29 = vmax.f32 %v360_v19, 0.0  ;;  %2864 = vmatprep.subr.bf16.mxu0 %v6165_v11  ;;  %3316 = vmatprep.subr.bf16.mxu1 %v6168_v13  ;;  %v800_v51 = vmax.f32 %v471_v41, 0.0  ;;  %v475_v52 = vadd.f32 %v474_v49, %v7015_v42  ;;  %v6178_v11 = vld [vmem:[#allocation3 + $0x328] ss:$16 sps:$4 sm:$0xff]   ;;  %v6183_v13 = vld [vmem:[#allocation3 + $0x344] ss:$16 sps:$4 sm:$0xff]  }
 0x12f   :  { %v806_v46 = vmax.f32 %v362_v24, 0.0  ;;  %v807_v58 = vmax.f32 %v473_v48, 0.0  ;;  %v6186_v20 = vld [vmem:[#allocation3 + $0x34c] ss:$16 sps:$4 sm:$0xff]  }
 0x130   :  { %v893_v50 = vpack.c.bf16 %v805_v29, %v797_v28  ;;  %v808_v0 = vmax.f32 %v475_v52, 0.0 }
 0x131   :  { %v894_v53 = vpack.c.bf16 %v806_v46, %v798_v44  ;;  %v365_v54 = vpop.f32.mrb[20].mxu0  ;;  %2865 = vmatpush1.bf16.msra.mxu0 %v6163_v21  ;;  %3317 = vmatpush1.bf16.msra.mxu1 %v6166_v25  ;;  %v7074_v4 = vpack.c.bf16 %v807_v58, %v799_v47  ;;  %v6181_v44 = vld [vmem:[#allocation3 + $0x340] ss:$16 sps:$4 sm:$0xff]   ;;  %v6184_v46 = vld [vmem:[#allocation3 + $0x348] ss:$16 sps:$4 sm:$0xff]  }
 0x132   :  { %v366_v59 = vadd.f32 %v365_v54, %v7000_v35  ;;  %v367_v60 = vpop.f32.mrb[21].mxu0  ;;  %2866 = vmatprep.subr.bf16.mxu0 %v6171_v26  ;;  %3318 = vmatprep.subr.bf16.mxu1 %v6174_v38  ;;  %v7077_v8 = vpack.c.bf16 %v808_v0, %v800_v51  ;;  %v478_v9 = vpop.f32.mrb[20].mxu1  ;;  %v6192_v51 = vld [vmem:[#allocation3 + $0x36c] ss:$16 sps:$4 sm:$0xff]   ;;  %v6190_v0 = vld [vmem:[#allocation3 + $0x368] ss:$16 sps:$4 sm:$0xff]  }
 0x133   :  { %v368_v2 = vadd.f32 %v367_v60, %v7005_v37  ;;  %v369_v3 = vpop.f32.mrb[22].mxu0  ;;  %2809 = vmatprep.mubr.bf16.mxu0 %v894_v53  ;;  %3261 = vmatprep.mubr.bf16.mxu1 %v894_v53  ;;  %v479_v14 = vadd.f32 %v478_v9, %v7009_v39  ;;  %v480_v15 = vpop.f32.mrb[21].mxu1  ;;  %v6198_v9 = vld [vmem:[#allocation3 + $0x38c] ss:$16 sps:$4 sm:$0xff]  }
 0x134   :  { %v370_v5 = vadd.f32 %v369_v3, %v7000_v35  ;;  %v371_v6 = vpop.f32.mrb[23].mxu0  ;;  %2810 = vmatmul.mubr.bf16.gmra.mrb[80].mxu0 %v893_v50  ;;  %3262 = vmatmul.mubr.bf16.gmra.mrb[80].mxu1 %v893_v50  ;;  %v813_v17 = vmax.f32 %v366_v59, 0.0  ;;  %v481_v21 = vadd.f32 %v480_v15, %v7015_v42  ;;  %v482_v23 = vpop.f32.mrb[22].mxu1  ;;  %v6189_v50 = vld [vmem:[#allocation3 + $0x364] ss:$16 sps:$4 sm:$0xff]  }
 0x135   :  { %v372_v10 = vadd.f32 %v371_v6, %v7005_v37  ;;  %2867 = vmatpush1.bf16.msra.mxu0 %v6169_v55  ;;  %3319 = vmatpush1.bf16.msra.mxu1 %v6172_v56  ;;  %v814_v24 = vmax.f32 %v368_v2, 0.0  ;;  %v815_v26 = vmax.f32 %v479_v14, 0.0  ;;  %v483_v27 = vadd.f32 %v482_v23, %v7009_v39  ;;  %v484_v1 = vpop.f32.mrb[23].mxu1  ;;  %v6187_v59 = vld [vmem:[#allocation3 + $0x360] ss:$16 sps:$4 sm:$0xff]  }
 0x136   :  { %v821_v19 = vmax.f32 %v370_v5, 0.0  ;;  %2868 = vmatprep.subr.bf16.mxu0 %v6177_v62  ;;  %3320 = vmatprep.subr.bf16.mxu1 %v6180_v63  ;;  %v816_v29 = vmax.f32 %v481_v21, 0.0  ;;  %v485_v38 = vadd.f32 %v484_v1, %v7015_v42  ;;  %v6195_v2 = vld [vmem:[#allocation3 + $0x384] ss:$16 sps:$4 sm:$0xff]   ;;  %v6193_v21 = vld [vmem:[#allocation3 + $0x380] ss:$16 sps:$4 sm:$0xff]  }
 0x137   :  { %v822_v25 = vmax.f32 %v372_v10, 0.0  ;;  %v823_v47 = vmax.f32 %v483_v27, 0.0  ;;  %v154_v23 = vsub.s32 4, %v6982_v30  ;;  %v6196_v1 = vld [vmem:[#allocation3 + $0x388] ss:$16 sps:$4 sm:$0xff]  }
 0x138   :  { %v901_v28 = vpack.c.bf16 %v821_v19, %v813_v17  ;;  %v824_v52 = vmax.f32 %v485_v38, 0.0 }
 0x139   :  { %v902_v41 = vpack.c.bf16 %v822_v25, %v814_v24  ;;  %v375_v43 = vpop.f32.mrb[24].mxu0  ;;  %2869 = vmatpush1.bf16.msra.mxu0 %v6175_v7  ;;  %3321 = vmatpush1.bf16.msra.mxu1 %v6178_v11  ;;  %v7086_v55 = vpack.c.bf16 %v823_v47, %v815_v26 }
 0x13a   :  { %v376_v48 = vadd.f32 %v375_v43, %v7000_v35  ;;  %v377_v49 = vpop.f32.mrb[25].mxu0  ;;  %2870 = vmatprep.subr.bf16.mxu0 %v6183_v13  ;;  %3322 = vmatprep.subr.bf16.mxu1 %v6186_v20  ;;  %v7089_v60 = vpack.c.bf16 %v824_v52, %v816_v29  ;;  %v488_v62 = vpop.f32.mrb[24].mxu1  ;;  %v6201_v43 = vld [vmem:[#allocation3 + $0x3a4] ss:$16 sps:$4 sm:$0xff]   ;;  %v6199_v52 = vld [vmem:[#allocation3 + $0x3a0] ss:$16 sps:$4 sm:$0xff]  }
 0x13b   :  { %v378_v53 = vadd.f32 %v377_v49, %v7005_v37  ;;  %v379_v54 = vpop.f32.mrb[26].mxu0  ;;  %2819 = vmatprep.mubr.bf16.mxu0 %v902_v41  ;;  %3271 = vmatprep.mubr.bf16.mxu1 %v902_v41  ;;  %v489_v3 = vadd.f32 %v488_v62, %v7009_v39  ;;  %v490_v5 = vpop.f32.mrb[25].mxu1  ;;  %v6207_v62 = vld [vmem:[#allocation3 + $0x3c4] ss:$16 sps:$4 sm:$0xff]  }
 0x13c   :  { %v380_v56 = vadd.f32 %v379_v54, %v7000_v35  ;;  %v381_v58 = vpop.f32.mrb[27].mxu0  ;;  %2820 = vmatmul.mubr.bf16.gmra.mrb[84].mxu0 %v901_v28  ;;  %3272 = vmatmul.mubr.bf16.gmra.mrb[84].mxu1 %v901_v28  ;;  %v829_v6 = vmax.f32 %v376_v48, 0.0  ;;  %v491_v10 = vadd.f32 %v490_v5, %v7015_v42  ;;  %v492_v11 = vpop.f32.mrb[26].mxu1  ;;  %v158_v28 = vsub.s32 5, %v6982_v30 }
 0x13d   :  { %v382_v63 = vadd.f32 %v381_v58, %v7005_v37  ;;  %2871 = vmatpush1.bf16.msra.mxu0 %v6181_v44  ;;  %3323 = vmatpush1.bf16.msra.mxu1 %v6184_v46  ;;  %v830_v13 = vmax.f32 %v378_v53, 0.0  ;;  %v831_v15 = vmax.f32 %v489_v3, 0.0  ;;  %v493_v17 = vadd.f32 %v492_v11, %v7009_v39  ;;  %v494_v19 = vpop.f32.mrb[27].mxu1  ;;  %v6204_v44 = vld [vmem:[#allocation3 + $0x3ac] ss:$16 sps:$4 sm:$0xff]  }
 0x13e   :  { %v837_v7 = vmax.f32 %v380_v56, 0.0  ;;  %2872 = vmatprep.subr.bf16.mxu0 %v6189_v50  ;;  %3324 = vmatprep.subr.bf16.mxu1 %v6192_v51  ;;  %v832_v24 = vmax.f32 %v491_v10, 0.0  ;;  %v495_v25 = vadd.f32 %v494_v19, %v7015_v42  ;;  %v7104_v53 = vrot.slane %v6990_v32, %v154_v23  ;;  %v6205_v23 = vld [vmem:[#allocation3 + $0x3c0] ss:$16 sps:$4 sm:$0xff]  }
 0x13f   :  { %v838_v14 = vmax.f32 %v382_v63, 0.0  ;;  %v839_v29 = vmax.f32 %v493_v17, 0.0  ;;  %v7110_v63 = vrot.slane %v6990_v32, %v158_v28 }
 0x140   :  { %v909_v20 = vpack.c.bf16 %v837_v7, %v829_v6  ;;  %v840_v46 = vmax.f32 %v495_v25, 0.0  ;;  %v6210_v6 = vld [vmem:[#allocation3 + $0x3cc] ss:$16 sps:$4 sm:$0xff]  }
 0x141   :  { %v910_v26 = vpack.c.bf16 %v838_v14, %v830_v13  ;;  %v385_v27 = vpop.f32.mrb[28].mxu0  ;;  %2873 = vmatpush1.bf16.msra.mxu0 %v6187_v59  ;;  %3325 = vmatpush1.bf16.msra.mxu1 %v6190_v0  ;;  %v7100_v49 = vpack.c.bf16 %v839_v29, %v831_v15  ;;  %v6202_v59 = vld [vmem:[#allocation3 + $0x3a8] ss:$16 sps:$4 sm:$0xff]  }
 0x142   :  { %v386_v38 = vadd.f32 %v385_v27, %v7000_v35  ;;  %v387_v41 = vpop.f32.mrb[29].mxu0  ;;  %2874 = vmatprep.subr.bf16.mxu0 %v6195_v2  ;;  %3326 = vmatprep.subr.bf16.mxu1 %v6198_v9  ;;  %v7106_v54 = vpack.c.bf16 %v840_v46, %v832_v24  ;;  %v498_v56 = vpop.f32.mrb[28].mxu1  ;;  %v162_v2 = vsub.s32 6, %v6982_v30  ;;  %v166_v9 = vsub.s32 7, %v6982_v30  ;;  %v6208_v24 = vld [vmem:[#allocation3 + $0x3c8] ss:$16 sps:$4 sm:$0xff]  }
 0x143   :  { %v388_v47 = vadd.f32 %v387_v41, %v7005_v37  ;;  %v389_v48 = vpop.f32.mrb[30].mxu0  ;;  %2829 = vmatprep.mubr.bf16.mxu0 %v910_v26  ;;  %3281 = vmatprep.mubr.bf16.mxu1 %v910_v26  ;;  %v500_v0 = vpop.f32.mrb[29].mxu1 }
 0x144   :  { %v390_v50 = vadd.f32 %v389_v48, %v7000_v35  ;;  %v391_v51 = vpop.f32.mrb[31].mxu0  ;;  %2830 = vmatmul.mubr.bf16.gmra.mrb[88].mxu0 %v909_v20  ;;  %3282 = vmatmul.mubr.bf16.gmra.mrb[88].mxu1 %v909_v20  ;;  %v499_v35 = vadd.f32 %v498_v56, %v7009_v39  ;;  %v845_v3 = vmax.f32 %v386_v38, 0.0  ;;  %v501_v7 = vadd.f32 %v500_v0, %v7015_v42  ;;  %v6222_v0 = vld [vmem:[#allocation3 + $0x40c] ss:$16 sps:$4 sm:$0xff]  }
 0x145   :  { %v392_v58 = vadd.f32 %v391_v51, %v7005_v37  ;;  %2875 = vmatpush1.bf16.msra.mxu0 %v6193_v21  ;;  %3327 = vmatpush1.bf16.msra.mxu1 %v6196_v1  ;;  %v502_v37 = vpop.f32.mrb[30].mxu1  ;;  %v846_v10 = vmax.f32 %v388_v47, 0.0  ;;  %v7119_v27 = vrot.slane %v6990_v32, %v162_v2  ;;  %v6213_v1 = vld [vmem:[#allocation3 + $0x3e4] ss:$16 sps:$4 sm:$0xff]   ;;  %v7123_v38 = vrot.slane %v6990_v32, %v166_v9  ;;  %v6211_v32 = vld [vmem:[#allocation3 + $0x3e0] ss:$16 sps:$4 sm:$0xff]  }
 0x146   :  { %v853_v5 = vmax.f32 %v390_v50, 0.0  ;;  %2876 = vmatprep.subr.bf16.mxu0 %v6201_v43  ;;  %3328 = vmatprep.subr.bf16.mxu1 %v6204_v44  ;;  %v847_v13 = vmax.f32 %v499_v35, 0.0  ;;  %v503_v14 = vadd.f32 %v502_v37, %v7009_v39  ;;  %v504_v15 = vpop.f32.mrb[31].mxu1  ;;  %v848_v19 = vmax.f32 %v501_v7, 0.0  ;;  %v6219_v35 = vld [vmem:[#allocation3 + $0x404] ss:$16 sps:$4 sm:$0xff]  }
 0x147   :  { %v854_v11 = vmax.f32 %v392_v58, 0.0  ;;  %v505_v20 = vadd.f32 %v504_v15, %v7015_v42  ;;  %v6216_v42 = vld [vmem:[#allocation3 + $0x3ec] ss:$16 sps:$4 sm:$0xff]   ;;  %v6220_v15 = vld [vmem:[#allocation3 + $0x408] ss:$16 sps:$4 sm:$0xff]  }
 0x148   :  { %v917_v17 = vpack.c.bf16 %v853_v5, %v845_v3  ;;  %v855_v26 = vmax.f32 %v503_v14, 0.0  ;;  %v6217_v14 = vld [vmem:[#allocation3 + $0x400] ss:$16 sps:$4 sm:$0xff]  }
 0x149   :  { %v918_v21 = vpack.c.bf16 %v854_v11, %v846_v10  ;;  %2877 = vmatpush1.bf16.msra.mxu0 %v6199_v52  ;;  %3329 = vmatpush1.bf16.msra.mxu1 %v6202_v59  ;;  %v541_v25 = vpop.f32.mrb[32].mxu0  ;;  %v856_v29 = vmax.f32 %v505_v20, 0.0  ;;  %v6214_v52 = vld [vmem:[#allocation3 + $0x3e8] ss:$16 sps:$4 sm:$0xff]  }
 0x14a   :  { %2878 = vmatprep.subr.bf16.mxu0 %v6207_v62  ;;  %3330 = vmatprep.subr.bf16.mxu1 %v6210_v6  ;;  %v542_v39 = vadd.f32 %v541_v25, %v7104_v53  ;;  %v543_v28 = vpop.f32.mrb[33].mxu0  ;;  %v7126_v44 = vpack.c.bf16 %v855_v26, %v847_v13  ;;  %v6228_v25 = vld [vmem:[#allocation3 + $0x42c] ss:$16 sps:$4 sm:$0xff]  }
 0x14b   :  { %2839 = vmatprep.mubr.bf16.mxu0 %v918_v21  ;;  %3291 = vmatprep.mubr.bf16.mxu1 %v918_v21  ;;  %v544_v41 = vadd.f32 %v543_v28, %v7110_v63  ;;  %v545_v43 = vpop.f32.mrb[34].mxu0  ;;  %v7129_v50 = vpack.c.bf16 %v856_v29, %v848_v19  ;;  %v654_v51 = vpop.f32.mrb[32].mxu1 }
 0x14c   :  { %2840 = vmatmul.mubr.bf16.gmra.mrb[92].mxu0 %v917_v17  ;;  %3292 = vmatmul.mubr.bf16.gmra.mrb[92].mxu1 %v917_v17  ;;  %v737_v46 = vmax.f32 %v542_v39, 0.0  ;;  %v546_v47 = vadd.f32 %v545_v43, %v7104_v53  ;;  %v547_v48 = vpop.f32.mrb[35].mxu0  ;;  %v655_v59 = vadd.f32 %v654_v51, %v7119_v27  ;;  %v656_v62 = vpop.f32.mrb[33].mxu1 }
 0x14d   :  { %2879 = vmatpush1.bf16.msra.mxu0 %v6205_v23  ;;  %3331 = vmatpush1.bf16.msra.mxu1 %v6208_v24  ;;  %v738_v56 = vmax.f32 %v544_v41, 0.0  ;;  %v548_v58 = vadd.f32 %v547_v48, %v7110_v63  ;;  %v657_v3 = vadd.f32 %v656_v62, %v7123_v38  ;;  %v658_v5 = vpop.f32.mrb[34].mxu1 }
 0x14e   :  { %2880 = vmatprep.subr.bf16.mxu0 %v6213_v1  ;;  %2882 = vmatprep.mubr.bf16.mxu0 %v7029_v16  ;;  %v745_v2 = vmax.f32 %v546_v47, 0.0  ;;  %v739_v7 = vmax.f32 %v655_v59, 0.0  ;;  %v659_v37 = vadd.f32 %v658_v5, %v7119_v27  ;;  %v660_v9 = vpop.f32.mrb[35].mxu1  ;;  %v6226_v47 = vld [vmem:[#allocation3 + $0x428] ss:$16 sps:$4 sm:$0xff]  }
 0x14f   :  { %3332 = vmatprep.subr.bf16.mxu1 %v6216_v42  ;;  %3334 = vmatprep.mubr.bf16.mxu1 %v7029_v16  ;;  %v746_v6 = vmax.f32 %v548_v58, 0.0  ;;  %v740_v11 = vmax.f32 %v657_v3, 0.0  ;;  %v661_v13 = vadd.f32 %v660_v9, %v7123_v38  ;;  %v6225_v16 = vld [vmem:[#allocation3 + $0x424] ss:$16 sps:$4 sm:$0xff]   ;;  %v6232_v9 = vld [vmem:[#allocation3 + $0x448] ss:$16 sps:$4 sm:$0xff]  }
 0x150   :  { %v7137_v10 = vpack.c.bf16 %v745_v2, %v737_v46  ;;  %v747_v20 = vmax.f32 %v659_v37, 0.0  ;;  %v6223_v46 = vld [vmem:[#allocation3 + $0x420] ss:$16 sps:$4 sm:$0xff]  }
 0x151   :  { %2881 = vmatpush1.bf16.msra.mxu0 %v6211_v32  ;;  %3333 = vmatpush1.bf16.msra.mxu1 %v6214_v52  ;;  %v7140_v17 = vpack.c.bf16 %v746_v6, %v738_v56  ;;  %v551_v19 = vpop.f32.mrb[36].mxu0  ;;  %v748_v24 = vmax.f32 %v661_v13, 0.0  ;;  %v6234_v56 = vld [vmem:[#allocation3 + $0x44c] ss:$16 sps:$4 sm:$0xff]   ;;  %v6229_v37 = vld [vmem:[#allocation3 + $0x440] ss:$16 sps:$4 sm:$0xff]  }
 0x152   :  { %2963 = vmatprep.subr.bf16.mxu0 %v6219_v35  ;;  %3415 = vmatprep.subr.bf16.mxu1 %v6222_v0  ;;  %v552_v21 = vadd.f32 %v551_v19, %v7104_v53  ;;  %v553_v23 = vpop.f32.mrb[37].mxu0  ;;  %v7144_v39 = vpack.c.bf16 %v747_v20, %v739_v7 }
 0x153   :  { %v554_v26 = vadd.f32 %v553_v23, %v7110_v63  ;;  %v555_v1 = vpop.f32.mrb[38].mxu0  ;;  %v7149_v41 = vpack.c.bf16 %v748_v24, %v740_v11  ;;  %v664_v43 = vpop.f32.mrb[36].mxu1 }
 0x154   :  { %2883 = vmatmul.mubr.bf16.vlgmr.msra.gmra.mrb[64].mxu0 %v7026_v12  ;;  %3335 = vmatmul.mubr.bf16.vlgmr.msra.gmra.mrb[64].mxu1 %v7026_v12  ;;  %v753_v28 = vmax.f32 %v552_v21, 0.0  ;;  %v556_v29 = vadd.f32 %v555_v1, %v7104_v53  ;;  %v557_v42 = vpop.f32.mrb[39].mxu0  ;;  %v665_v32 = vadd.f32 %v664_v43, %v7119_v27  ;;  %v666_v52 = vpop.f32.mrb[37].mxu1  ;;  %v6231_v12 = vld [vmem:[#allocation3 + $0x444] ss:$16 sps:$4 sm:$0xff]  }
 0x155   :  { %2964 = vmatpush1.bf16.msra.mxu0 %v6217_v14  ;;  %3416 = vmatpush1.bf16.msra.mxu1 %v6220_v15  ;;  %v754_v48 = vmax.f32 %v554_v26, 0.0  ;;  %v558_v51 = vadd.f32 %v557_v42, %v7110_v63  ;;  %v667_v59 = vadd.f32 %v666_v52, %v7123_v38  ;;  %v668_v62 = vpop.f32.mrb[38].mxu1  ;;  %v6235_v42 = vld [vmem:[#allocation3 + $0x460] ss:$16 sps:$4 sm:$0xff]   ;;  %v6238_v43 = vld [vmem:[#allocation3 + $0x468] ss:$16 sps:$4 sm:$0xff]  }
 0x156   :  { %2892 = vmatprep.mubr.bf16.mxu0 %v7041_v61  ;;  %2965 = vmatprep.subr.bf16.mxu0 %v6225_v16  ;;  %v761_v58 = vmax.f32 %v556_v29, 0.0  ;;  %v755_v0 = vmax.f32 %v665_v32, 0.0  ;;  %v669_v2 = vadd.f32 %v668_v62, %v7119_v27  ;;  %v670_v3 = vpop.f32.mrb[39].mxu1  ;;  %v6240_v16 = vld [vmem:[#allocation3 + $0x46c] ss:$16 sps:$4 sm:$0xff]  }
 0x157   :  { %3344 = vmatprep.mubr.bf16.mxu1 %v7041_v61  ;;  %3417 = vmatprep.subr.bf16.mxu1 %v6228_v25  ;;  %v762_v35 = vmax.f32 %v558_v51, 0.0  ;;  %v756_v6 = vmax.f32 %v667_v59, 0.0  ;;  %v671_v7 = vadd.f32 %v670_v3, %v7123_v38  ;;  %v6237_v61 = vld [vmem:[#allocation3 + $0x464] ss:$16 sps:$4 sm:$0xff]   ;;  %v6246_v32 = vld [vmem:[#allocation3 + $0x48c] ss:$16 sps:$4 sm:$0xff]  }
 0x158   :  { %v7157_v5 = vpack.c.bf16 %v761_v58, %v753_v28  ;;  %v763_v14 = vmax.f32 %v669_v2, 0.0 }
 0x159   :  { %2966 = vmatpush1.bf16.msra.mxu0 %v6223_v46  ;;  %3418 = vmatpush1.bf16.msra.mxu1 %v6226_v47  ;;  %v7160_v11 = vpack.c.bf16 %v762_v35, %v754_v48  ;;  %v561_v13 = vpop.f32.mrb[40].mxu0  ;;  %v764_v20 = vmax.f32 %v671_v7, 0.0  ;;  %v6244_v7 = vld [vmem:[#allocation3 + $0x488] ss:$16 sps:$4 sm:$0xff]  }
 0x15a   :  { %2967 = vmatprep.subr.bf16.mxu0 %v6231_v12  ;;  %3419 = vmatprep.subr.bf16.mxu1 %v6234_v56  ;;  %v562_v15 = vadd.f32 %v561_v13, %v7104_v53  ;;  %v563_v19 = vpop.f32.mrb[41].mxu0  ;;  %v7164_v24 = vpack.c.bf16 %v763_v14, %v755_v0 }
 0x15b   :  { %v564_v21 = vadd.f32 %v563_v19, %v7110_v63  ;;  %v565_v23 = vpop.f32.mrb[42].mxu0  ;;  %v7169_v28 = vpack.c.bf16 %v764_v20, %v756_v6  ;;  %v674_v29 = vpop.f32.mrb[40].mxu1  ;;  %v6241_v6 = vld [vmem:[#allocation3 + $0x480] ss:$16 sps:$4 sm:$0xff]   ;;  %v6252_v19 = vld [vmem:[#allocation3 + $0x4ac] ss:$16 sps:$4 sm:$0xff]  }
 0x15c   :  { %2893 = vmatmul.mubr.bf16.gmra.mrb[68].mxu0 %v7038_v57  ;;  %3345 = vmatmul.mubr.bf16.gmra.mrb[68].mxu1 %v7038_v57  ;;  %v769_v25 = vmax.f32 %v562_v15, 0.0  ;;  %v566_v26 = vadd.f32 %v565_v23, %v7104_v53  ;;  %v567_v1 = vpop.f32.mrb[43].mxu0  ;;  %v675_v48 = vadd.f32 %v674_v29, %v7119_v27  ;;  %v676_v51 = vpop.f32.mrb[41].mxu1  ;;  %v6243_v57 = vld [vmem:[#allocation3 + $0x484] ss:$16 sps:$4 sm:$0xff]  }
 0x15d   :  { %2968 = vmatpush1.bf16.msra.mxu0 %v6229_v37  ;;  %3420 = vmatpush1.bf16.msra.mxu1 %v6232_v9  ;;  %v770_v46 = vmax.f32 %v564_v21, 0.0  ;;  %v568_v47 = vadd.f32 %v567_v1, %v7110_v63  ;;  %v677_v12 = vadd.f32 %v676_v51, %v7123_v38  ;;  %v678_v56 = vpop.f32.mrb[42].mxu1 }
 0x15e   :  { %2902 = vmatprep.mubr.bf16.mxu0 %v7053_v45  ;;  %2969 = vmatprep.subr.bf16.mxu0 %v6237_v61  ;;  %v777_v52 = vmax.f32 %v566_v26, 0.0  ;;  %v771_v59 = vmax.f32 %v675_v48, 0.0  ;;  %v679_v62 = vadd.f32 %v678_v56, %v7119_v27  ;;  %v680_v35 = vpop.f32.mrb[43].mxu1 }
 0x15f   :  { %3354 = vmatprep.mubr.bf16.mxu1 %v7053_v45  ;;  %3421 = vmatprep.subr.bf16.mxu1 %v6240_v16  ;;  %v778_v58 = vmax.f32 %v568_v47, 0.0  ;;  %v772_v2 = vmax.f32 %v677_v12, 0.0  ;;  %v681_v3 = vadd.f32 %v680_v35, %v7123_v38  ;;  %v6249_v45 = vld [vmem:[#allocation3 + $0x4a4] ss:$16 sps:$4 sm:$0xff]  }
 0x160   :  { %v7177_v0 = vpack.c.bf16 %v777_v52, %v769_v25  ;;  %v779_v13 = vmax.f32 %v679_v62, 0.0 }
 0x161   :  { %2970 = vmatpush1.bf16.msra.mxu0 %v6235_v42  ;;  %3422 = vmatpush1.bf16.msra.mxu1 %v6238_v43  ;;  %v7180_v37 = vpack.c.bf16 %v778_v58, %v770_v46  ;;  %v571_v9 = vpop.f32.mrb[44].mxu0  ;;  %v780_v15 = vmax.f32 %v681_v3, 0.0  ;;  %v6247_v42 = vld [vmem:[#allocation3 + $0x4a0] ss:$16 sps:$4 sm:$0xff]   ;;  %v6250_v43 = vld [vmem:[#allocation3 + $0x4a8] ss:$16 sps:$4 sm:$0xff]  }
 0x162   :  { %2971 = vmatprep.subr.bf16.mxu0 %v6243_v57  ;;  %3423 = vmatprep.subr.bf16.mxu1 %v6246_v32  ;;  %v572_v14 = vadd.f32 %v571_v9, %v7104_v53  ;;  %v573_v61 = vpop.f32.mrb[45].mxu0  ;;  %v7184_v21 = vpack.c.bf16 %v779_v13, %v771_v59  ;;  %v6258_v57 = vld [vmem:[#allocation3 + $0x4cc] ss:$16 sps:$4 sm:$0xff]  }
 0x163   :  { %v574_v20 = vadd.f32 %v573_v61, %v7110_v63  ;;  %v575_v16 = vpop.f32.mrb[46].mxu0  ;;  %v7189_v1 = vpack.c.bf16 %v780_v15, %v772_v2  ;;  %v684_v29 = vpop.f32.mrb[44].mxu1 }
 0x164   :  { %2903 = vmatmul.mubr.bf16.gmra.mrb[72].mxu0 %v7050_v40  ;;  %3355 = vmatmul.mubr.bf16.gmra.mrb[72].mxu1 %v7050_v40  ;;  %v785_v23 = vmax.f32 %v572_v14, 0.0  ;;  %v576_v25 = vadd.f32 %v575_v16, %v7104_v53  ;;  %v577_v26 = vpop.f32.mrb[47].mxu0  ;;  %v685_v48 = vadd.f32 %v684_v29, %v7119_v27  ;;  %v686_v51 = vpop.f32.mrb[45].mxu1  ;;  %v6255_v40 = vld [vmem:[#allocation3 + $0x4c4] ss:$16 sps:$4 sm:$0xff]  }
 0x165   :  { %2972 = vmatpush1.bf16.msra.mxu0 %v6241_v6  ;;  %3424 = vmatpush1.bf16.msra.mxu1 %v6244_v7  ;;  %v786_v46 = vmax.f32 %v574_v20, 0.0  ;;  %v578_v47 = vadd.f32 %v577_v26, %v7110_v63  ;;  %v687_v52 = vadd.f32 %v686_v51, %v7123_v38  ;;  %v688_v12 = vpop.f32.mrb[46].mxu1  ;;  %v6253_v6 = vld [vmem:[#allocation3 + $0x4c0] ss:$16 sps:$4 sm:$0xff]   ;;  %v6256_v7 = vld [vmem:[#allocation3 + $0x4c8] ss:$16 sps:$4 sm:$0xff]  }
 0x166   :  { %2912 = vmatprep.mubr.bf16.mxu0 %v7065_v22  ;;  %2973 = vmatprep.subr.bf16.mxu0 %v6249_v45  ;;  %v793_v32 = vmax.f32 %v576_v25, 0.0  ;;  %v787_v58 = vmax.f32 %v685_v48, 0.0  ;;  %v689_v59 = vadd.f32 %v688_v12, %v7119_v27  ;;  %v690_v62 = vpop.f32.mrb[47].mxu1 }
 0x167   :  { %3364 = vmatprep.mubr.bf16.mxu1 %v7065_v22  ;;  %3425 = vmatprep.subr.bf16.mxu1 %v6252_v19  ;;  %v794_v56 = vmax.f32 %v578_v47, 0.0  ;;  %v788_v2 = vmax.f32 %v687_v52, 0.0  ;;  %v691_v3 = vadd.f32 %v690_v62, %v7123_v38  ;;  %v6261_v22 = vld [vmem:[#allocation3 + $0x4e4] ss:$16 sps:$4 sm:$0xff]   ;;  %v6264_v19 = vld [vmem:[#allocation3 + $0x4ec] ss:$16 sps:$4 sm:$0xff]  }
 0x168   :  { %v7197_v35 = vpack.c.bf16 %v793_v32, %v785_v23  ;;  %v795_v45 = vmax.f32 %v689_v59, 0.0  ;;  %v6262_v47 = vld [vmem:[#allocation3 + $0x4e8] ss:$16 sps:$4 sm:$0xff]   ;;  %v6270_v32 = vld [vmem:[#allocation3 + $0x50c] ss:$16 sps:$4 sm:$0xff]  }
 0x169   :  { %2974 = vmatpush1.bf16.msra.mxu0 %v6247_v42  ;;  %3426 = vmatpush1.bf16.msra.mxu1 %v6250_v43  ;;  %v7200_v9 = vpack.c.bf16 %v794_v56, %v786_v46  ;;  %v581_v13 = vpop.f32.mrb[48].mxu0  ;;  %v796_v15 = vmax.f32 %v691_v3, 0.0  ;;  %v6259_v46 = vld [vmem:[#allocation3 + $0x4e0] ss:$16 sps:$4 sm:$0xff]  }
 0x16a   :  { %2975 = vmatprep.subr.bf16.mxu0 %v6255_v40  ;;  %3427 = vmatprep.subr.bf16.mxu1 %v6258_v57  ;;  %v582_v14 = vadd.f32 %v581_v13, %v7104_v53  ;;  %v583_v61 = vpop.f32.mrb[49].mxu0  ;;  %v7204_v23 = vpack.c.bf16 %v795_v45, %v787_v58  ;;  %v6265_v13 = vld [vmem:[#allocation3 + $0x500] ss:$16 sps:$4 sm:$0xff]   ;;  %v6268_v45 = vld [vmem:[#allocation3 + $0x508] ss:$16 sps:$4 sm:$0xff]  }
 0x16b   :  { %v584_v20 = vadd.f32 %v583_v61, %v7110_v63  ;;  %v585_v16 = vpop.f32.mrb[50].mxu0  ;;  %v7209_v42 = vpack.c.bf16 %v796_v15, %v788_v2  ;;  %v694_v43 = vpop.f32.mrb[48].mxu1 }
 0x16c   :  { %2913 = vmatmul.mubr.bf16.gmra.mrb[76].mxu0 %v7062_v18  ;;  %3365 = vmatmul.mubr.bf16.gmra.mrb[76].mxu1 %v7062_v18  ;;  %v801_v25 = vmax.f32 %v582_v14, 0.0  ;;  %v586_v26 = vadd.f32 %v585_v16, %v7104_v53  ;;  %v587_v29 = vpop.f32.mrb[51].mxu0  ;;  %v695_v40 = vadd.f32 %v694_v43, %v7119_v27  ;;  %v696_v57 = vpop.f32.mrb[49].mxu1  ;;  %v6267_v18 = vld [vmem:[#allocation3 + $0x504] ss:$16 sps:$4 sm:$0xff]  }
 0x16d   :  { %2976 = vmatpush1.bf16.msra.mxu0 %v6253_v6  ;;  %3428 = vmatpush1.bf16.msra.mxu1 %v6256_v7  ;;  %v802_v48 = vmax.f32 %v584_v20, 0.0  ;;  %v588_v51 = vadd.f32 %v587_v29, %v7110_v63  ;;  %v697_v12 = vadd.f32 %v696_v57, %v7123_v38  ;;  %v698_v56 = vpop.f32.mrb[50].mxu1  ;;  %v6276_v16 = vld [vmem:[#allocation3 + $0x52c] ss:$16 sps:$4 sm:$0xff]   ;;  %v6274_v57 = vld [vmem:[#allocation3 + $0x528] ss:$16 sps:$4 sm:$0xff]  }
 0x16e   :  { %2922 = vmatprep.mubr.bf16.mxu0 %v7077_v8  ;;  %2977 = vmatprep.subr.bf16.mxu0 %v6261_v22  ;;  %v809_v52 = vmax.f32 %v586_v26, 0.0  ;;  %v803_v59 = vmax.f32 %v695_v40, 0.0  ;;  %v699_v62 = vadd.f32 %v698_v56, %v7119_v27  ;;  %v700_v2 = vpop.f32.mrb[51].mxu1  ;;  %v6271_v40 = vld [vmem:[#allocation3 + $0x520] ss:$16 sps:$4 sm:$0xff]  }
 0x16f   :  { %3374 = vmatprep.mubr.bf16.mxu1 %v7077_v8  ;;  %3429 = vmatprep.subr.bf16.mxu1 %v6264_v19  ;;  %v810_v58 = vmax.f32 %v588_v51, 0.0  ;;  %v804_v6 = vmax.f32 %v697_v12, 0.0  ;;  %v701_v7 = vadd.f32 %v700_v2, %v7123_v38  ;;  %v6273_v8 = vld [vmem:[#allocation3 + $0x524] ss:$16 sps:$4 sm:$0xff]   ;;  %v6282_v56 = vld [vmem:[#allocation3 + $0x54c] ss:$16 sps:$4 sm:$0xff]  }
 0x170   :  { %v7217_v3 = vpack.c.bf16 %v809_v52, %v801_v25  ;;  %v811_v61 = vmax.f32 %v699_v62, 0.0 }
 0x171   :  { %2978 = vmatpush1.bf16.msra.mxu0 %v6259_v46  ;;  %3430 = vmatpush1.bf16.msra.mxu1 %v6262_v47  ;;  %v7220_v22 = vpack.c.bf16 %v810_v58, %v802_v48  ;;  %v591_v14 = vpop.f32.mrb[52].mxu0  ;;  %v812_v20 = vmax.f32 %v701_v7, 0.0 }
 0x172   :  { %2979 = vmatprep.subr.bf16.mxu0 %v6267_v18  ;;  %3431 = vmatprep.subr.bf16.mxu1 %v6270_v32  ;;  %v592_v15 = vadd.f32 %v591_v14, %v7104_v53  ;;  %v593_v19 = vpop.f32.mrb[53].mxu0  ;;  %v7224_v29 = vpack.c.bf16 %v811_v61, %v803_v59 }
 0x173   :  { %v594_v25 = vadd.f32 %v593_v19, %v7110_v63  ;;  %v595_v26 = vpop.f32.mrb[54].mxu0  ;;  %v7229_v48 = vpack.c.bf16 %v812_v20, %v804_v6  ;;  %v704_v51 = vpop.f32.mrb[52].mxu1 }
 0x174   :  { %2923 = vmatmul.mubr.bf16.gmra.mrb[80].mxu0 %v7074_v4  ;;  %3375 = vmatmul.mubr.bf16.gmra.mrb[80].mxu1 %v7074_v4  ;;  %v817_v43 = vmax.f32 %v592_v15, 0.0  ;;  %v596_v46 = vadd.f32 %v595_v26, %v7104_v53  ;;  %v597_v47 = vpop.f32.mrb[55].mxu0  ;;  %v705_v52 = vadd.f32 %v704_v51, %v7119_v27  ;;  %v706_v12 = vpop.f32.mrb[53].mxu1  ;;  %v6279_v4 = vld [vmem:[#allocation3 + $0x544] ss:$16 sps:$4 sm:$0xff]  }
 0x175   :  { %2980 = vmatpush1.bf16.msra.mxu0 %v6265_v13  ;;  %3432 = vmatpush1.bf16.msra.mxu1 %v6268_v45  ;;  %v818_v18 = vmax.f32 %v594_v25, 0.0  ;;  %v598_v32 = vadd.f32 %v597_v47, %v7110_v63  ;;  %v707_v59 = vadd.f32 %v706_v12, %v7123_v38  ;;  %v708_v62 = vpop.f32.mrb[54].mxu1  ;;  %v6280_v15 = vld [vmem:[#allocation3 + $0x548] ss:$16 sps:$4 sm:$0xff]  }
 0x176   :  { %2932 = vmatprep.mubr.bf16.mxu0 %v7089_v60  ;;  %2981 = vmatprep.subr.bf16.mxu0 %v6273_v8  ;;  %v825_v58 = vmax.f32 %v596_v46, 0.0  ;;  %v819_v6 = vmax.f32 %v705_v52, 0.0  ;;  %v709_v7 = vadd.f32 %v708_v62, %v7119_v27  ;;  %v710_v13 = vpop.f32.mrb[55].mxu1  ;;  %v6277_v8 = vld [vmem:[#allocation3 + $0x540] ss:$16 sps:$4 sm:$0xff]  }
 0x177   :  { %3384 = vmatprep.mubr.bf16.mxu1 %v7089_v60  ;;  %3433 = vmatprep.subr.bf16.mxu1 %v6276_v16  ;;  %v826_v2 = vmax.f32 %v598_v32, 0.0  ;;  %v820_v14 = vmax.f32 %v707_v59, 0.0  ;;  %v711_v61 = vadd.f32 %v710_v13, %v7123_v38  ;;  %v6285_v60 = vld [vmem:[#allocation3 + $0x564] ss:$16 sps:$4 sm:$0xff]  }
 0x178   :  { %v7237_v45 = vpack.c.bf16 %v825_v58, %v817_v43  ;;  %v827_v25 = vmax.f32 %v709_v7, 0.0  ;;  %v6288_v43 = vld [vmem:[#allocation3 + $0x56c] ss:$16 sps:$4 sm:$0xff]  }
 0x179   :  { %2982 = vmatpush1.bf16.msra.mxu0 %v6271_v40  ;;  %3434 = vmatpush1.bf16.msra.mxu1 %v6274_v57  ;;  %v7240_v19 = vpack.c.bf16 %v826_v2, %v818_v18  ;;  %v601_v20 = vpop.f32.mrb[56].mxu0  ;;  %v828_v46 = vmax.f32 %v711_v61, 0.0 }
 0x17a   :  { %2983 = vmatprep.subr.bf16.mxu0 %v6279_v4  ;;  %3435 = vmatprep.subr.bf16.mxu1 %v6282_v56  ;;  %v602_v16 = vadd.f32 %v601_v20, %v7104_v53  ;;  %v603_v26 = vpop.f32.mrb[57].mxu0  ;;  %v7244_v32 = vpack.c.bf16 %v827_v25, %v819_v6  ;;  %v6283_v4 = vld [vmem:[#allocation3 + $0x560] ss:$16 sps:$4 sm:$0xff]   ;;  %v6286_v56 = vld [vmem:[#allocation3 + $0x568] ss:$16 sps:$4 sm:$0xff]  }
 0x17b   :  { %v604_v47 = vadd.f32 %v603_v26, %v7110_v63  ;;  %v605_v51 = vpop.f32.mrb[58].mxu0  ;;  %v7249_v52 = vpack.c.bf16 %v828_v46, %v820_v14  ;;  %v714_v12 = vpop.f32.mrb[56].mxu1  ;;  %v6294_v6 = vld [vmem:[#allocation3 + $0x58c] ss:$16 sps:$4 sm:$0xff]   ;;  %v6292_v46 = vld [vmem:[#allocation3 + $0x588] ss:$16 sps:$4 sm:$0xff]  }
 0x17c   :  { %2933 = vmatmul.mubr.bf16.gmra.mrb[84].mxu0 %v7086_v55  ;;  %3385 = vmatmul.mubr.bf16.gmra.mrb[84].mxu1 %v7086_v55  ;;  %v833_v40 = vmax.f32 %v602_v16, 0.0  ;;  %v606_v57 = vadd.f32 %v605_v51, %v7104_v53  ;;  %v607_v18 = vpop.f32.mrb[59].mxu0  ;;  %v715_v62 = vadd.f32 %v714_v12, %v7119_v27  ;;  %v716_v2 = vpop.f32.mrb[57].mxu1  ;;  %v6291_v55 = vld [vmem:[#allocation3 + $0x584] ss:$16 sps:$4 sm:$0xff]  }
 0x17d   :  { %2984 = vmatpush1.bf16.msra.mxu0 %v6277_v8  ;;  %3436 = vmatpush1.bf16.msra.mxu1 %v6280_v15  ;;  %v834_v58 = vmax.f32 %v604_v47, 0.0  ;;  %v608_v59 = vadd.f32 %v607_v18, %v7110_v63  ;;  %v717_v13 = vadd.f32 %v716_v2, %v7123_v38  ;;  %v718_v14 = vpop.f32.mrb[58].mxu1 }
 0x17e   :  { %2942 = vmatprep.mubr.bf16.mxu0 %v7106_v54  ;;  %2985 = vmatprep.subr.bf16.mxu0 %v6285_v60  ;;  %v841_v7 = vmax.f32 %v606_v57, 0.0  ;;  %v835_v8 = vmax.f32 %v715_v62, 0.0  ;;  %v719_v15 = vadd.f32 %v718_v14, %v7119_v27  ;;  %v720_v20 = vpop.f32.mrb[59].mxu1  ;;  %v6289_v60 = vld [vmem:[#allocation3 + $0x580] ss:$16 sps:$4 sm:$0xff]  }
 0x17f   :  { %3394 = vmatprep.mubr.bf16.mxu1 %v7106_v54  ;;  %3437 = vmatprep.subr.bf16.mxu1 %v6288_v43  ;;  %v842_v61 = vmax.f32 %v608_v59, 0.0  ;;  %v836_v16 = vmax.f32 %v717_v13, 0.0  ;;  %v721_v26 = vadd.f32 %v720_v20, %v7123_v38  ;;  %v6297_v54 = vld [vmem:[#allocation3 + $0x5a4] ss:$16 sps:$4 sm:$0xff]   ;;  %v6298_v13 = vld [vmem:[#allocation3 + $0x5a8] ss:$16 sps:$4 sm:$0xff]  }
 0x180   :  { %v7257_v25 = vpack.c.bf16 %v841_v7, %v833_v40  ;;  %v843_v57 = vmax.f32 %v719_v15, 0.0  ;;  %v6300_v40 = vld [vmem:[#allocation3 + $0x5ac] ss:$16 sps:$4 sm:$0xff]   ;;  %v6295_v7 = vld [vmem:[#allocation3 + $0x5a0] ss:$16 sps:$4 sm:$0xff]  }
 0x181   :  { %2986 = vmatpush1.bf16.msra.mxu0 %v6283_v4  ;;  %3438 = vmatpush1.bf16.msra.mxu1 %v6286_v56  ;;  %v7260_v47 = vpack.c.bf16 %v842_v61, %v834_v58  ;;  %v611_v51 = vpop.f32.mrb[60].mxu0  ;;  %v844_v12 = vmax.f32 %v721_v26, 0.0  ;;  %v6306_v20 = vld [vmem:[#allocation3 + $0x5cc] ss:$16 sps:$4 sm:$0xff]  }
 0x182   :  { %2987 = vmatprep.subr.bf16.mxu0 %v6291_v55  ;;  %3439 = vmatprep.subr.bf16.mxu1 %v6294_v6  ;;  %v612_v43 = vadd.f32 %v611_v51, %v7104_v53  ;;  %v613_v18 = vpop.f32.mrb[61].mxu0  ;;  %v7264_v2 = vpack.c.bf16 %v843_v57, %v835_v8 }
 0x183   :  { %v614_v59 = vadd.f32 %v613_v18, %v7110_v63  ;;  %v615_v62 = vpop.f32.mrb[62].mxu0  ;;  %v7269_v55 = vpack.c.bf16 %v844_v12, %v836_v16  ;;  %v724_v6 = vpop.f32.mrb[60].mxu1 }
 0x184   :  { %2943 = vmatmul.mubr.bf16.gmra.mrb[88].mxu0 %v7100_v49  ;;  %3395 = vmatmul.mubr.bf16.gmra.mrb[88].mxu1 %v7100_v49  ;;  %v849_v4 = vmax.f32 %v612_v43, 0.0  ;;  %v616_v56 = vadd.f32 %v615_v62, %v7104_v53  ;;  %v617_v58 = vpop.f32.mrb[63].mxu0  ;;  %v725_v8 = vadd.f32 %v724_v6, %v7119_v27  ;;  %v726_v15 = vpop.f32.mrb[61].mxu1  ;;  %v6303_v49 = vld [vmem:[#allocation3 + $0x5c4] ss:$16 sps:$4 sm:$0xff]  }
 0x185   :  { %2988 = vmatpush1.bf16.msra.mxu0 %v6289_v60  ;;  %3440 = vmatpush1.bf16.msra.mxu1 %v6292_v46  ;;  %v850_v14 = vmax.f32 %v614_v59, 0.0  ;;  %v618_v61 = vadd.f32 %v617_v58, %v7110_v63  ;;  %v727_v16 = vadd.f32 %v726_v15, %v7123_v38  ;;  %v728_v26 = vpop.f32.mrb[62].mxu1  ;;  %v6304_v62 = vld [vmem:[#allocation3 + $0x5c8] ss:$16 sps:$4 sm:$0xff]   ;;  %v6315_v6 = vld [vmem:[#allocation3 + $0x604] ss:$16 sps:$4 sm:$0xff]  }
 0x186   :  { %2952 = vmatprep.mubr.bf16.mxu0 %v7129_v50  ;;  %2989 = vmatprep.subr.bf16.mxu0 %v6297_v54  ;;  %v857_v53 = vmax.f32 %v616_v56, 0.0  ;;  %v851_v46 = vmax.f32 %v725_v8, 0.0  ;;  %v729_v51 = vadd.f32 %v728_v26, %v7119_v27  ;;  %v730_v63 = vpop.f32.mrb[63].mxu1  ;;  %v6301_v54 = vld [vmem:[#allocation3 + $0x5c0] ss:$16 sps:$4 sm:$0xff]  }
 0x187   :  { %3404 = vmatprep.mubr.bf16.mxu1 %v7129_v50  ;;  %3441 = vmatprep.subr.bf16.mxu1 %v6300_v40  ;;  %v858_v60 = vmax.f32 %v618_v61, 0.0  ;;  %v852_v43 = vmax.f32 %v727_v16, 0.0  ;;  %v731_v18 = vadd.f32 %v730_v63, %v7123_v38  ;;  %v6309_v40 = vld [vmem:[#allocation3 + $0x5e4] ss:$16 sps:$4 sm:$0xff]   ;;  %v6312_v56 = vld [vmem:[#allocation3 + $0x5ec] ss:$16 sps:$4 sm:$0xff]  }
 0x188   :  { %v7277_v57 = vpack.c.bf16 %v857_v53, %v849_v4  ;;  %v859_v59 = vmax.f32 %v729_v51, 0.0  ;;  %v6307_v38 = vld [vmem:[#allocation3 + $0x5e0] ss:$16 sps:$4 sm:$0xff]   ;;  %v6310_v4 = vld [vmem:[#allocation3 + $0x5e8] ss:$16 sps:$4 sm:$0xff]  }
 0x189   :  { %2990 = vmatpush1.bf16.msra.mxu0 %v6295_v7  ;;  %3442 = vmatpush1.bf16.msra.mxu1 %v6298_v13  ;;  %v7280_v12 = vpack.c.bf16 %v858_v60, %v850_v14  ;;  %v860_v50 = vmax.f32 %v731_v18, 0.0  ;;  %v6318_v7 = vld [vmem:[#allocation3 + $0x60c] ss:$16 sps:$4 sm:$0xff]   ;;  %v6313_v13 = vld [vmem:[#allocation3 + $0x600] ss:$16 sps:$4 sm:$0xff]  }
 0x18a   :  { %2991 = vmatprep.subr.bf16.mxu0 %v6303_v49  ;;  %3443 = vmatprep.subr.bf16.mxu1 %v6306_v20  ;;  %v7282_v58 = vpack.c.bf16 %v859_v59, %v851_v46  ;;  %v6316_v14 = vld [vmem:[#allocation3 + $0x608] ss:$16 sps:$4 sm:$0xff]   ;;  %v6324_v61 = vld [vmem:[#allocation3 + $0x62c] ss:$16 sps:$4 sm:$0xff]   ;;  %v6327_v15 = vld [vmem:[#allocation3 + $0x644] ss:$16 sps:$4 sm:$0xff]  }
 0x18b   :  { %v7286_v27 = vpack.c.bf16 %v860_v50, %v852_v43  ;;  %v6322_v8 = vld [vmem:[#allocation3 + $0x628] ss:$16 sps:$4 sm:$0xff]   ;;  %v6330_v49 = vld [vmem:[#allocation3 + $0x64c] ss:$16 sps:$4 sm:$0xff]   ;;  %v6325_v20 = vld [vmem:[#allocation3 + $0x640] ss:$16 sps:$4 sm:$0xff]  }
 0x18c   :  { %2953 = vmatmul.mubr.bf16.gmra.mrb[92].mxu0 %v7126_v44  ;;  %3405 = vmatmul.mubr.bf16.gmra.mrb[92].mxu1 %v7126_v44  ;;  %v6321_v44 = vld [vmem:[#allocation3 + $0x624] ss:$16 sps:$4 sm:$0xff]   ;;  %v6328_v53 = vld [vmem:[#allocation3 + $0x648] ss:$16 sps:$4 sm:$0xff]   ;;  %v6342_v46 = vld [vmem:[#allocation3 + $0x68c] ss:$16 sps:$4 sm:$0xff]  }
 0x18d   :  { %2992 = vmatpush1.bf16.msra.mxu0 %v6301_v54  ;;  %2995 = vmatprep.mubr.bf16.mxu0 %v7140_v17  ;;  %v6333_v16 = vld [vmem:[#allocation3 + $0x664] ss:$16 sps:$4 sm:$0xff]   ;;  %v6334_v26 = vld [vmem:[#allocation3 + $0x668] ss:$16 sps:$4 sm:$0xff]   ;;  %v6337_v51 = vld [vmem:[#allocation3 + $0x680] ss:$16 sps:$4 sm:$0xff]  }
 0x18e   :  { %3444 = vmatpush1.bf16.msra.mxu1 %v6304_v62  ;;  %3447 = vmatprep.mubr.bf16.mxu1 %v7140_v17  ;;  %v6319_v17 = vld [vmem:[#allocation3 + $0x620] ss:$16 sps:$4 sm:$0xff]   ;;  %v6339_v60 = vld [vmem:[#allocation3 + $0x684] ss:$16 sps:$4 sm:$0xff]   ;;  %v6340_v63 = vld [vmem:[#allocation3 + $0x688] ss:$16 sps:$4 sm:$0xff]  }
 0x18f   :  { %2993 = vmatprep.subr.bf16.mxu0 %v6309_v40  ;;  %3445 = vmatprep.subr.bf16.mxu1 %v6312_v56  ;;  %v6345_v43 = vld [vmem:[#allocation3 + $0x6a4] ss:$16 sps:$4 sm:$0xff]   ;;  %v6346_v18 = vld [vmem:[#allocation3 + $0x6a8] ss:$16 sps:$4 sm:$0xff]   ;;  %v6354_v59 = vld [vmem:[#allocation3 + $0x6cc] ss:$16 sps:$4 sm:$0xff]  }
 0x190   :  { %v6351_v54 = vld [vmem:[#allocation3 + $0x6c4] ss:$16 sps:$4 sm:$0xff]   ;;  %v6349_v62 = vld [vmem:[#allocation3 + $0x6c0] ss:$16 sps:$4 sm:$0xff]   ;;  %v6352_v50 = vld [vmem:[#allocation3 + $0x6c8] ss:$16 sps:$4 sm:$0xff]  }
 0x191   :  { %2994 = vmatpush1.bf16.msra.mxu0 %v6307_v38  ;;  %v6357_v40 = vld [vmem:[#allocation3 + $0x6e4] ss:$16 sps:$4 sm:$0xff]   ;;  %v6358_v56 = vld [vmem:[#allocation3 + $0x6e8] ss:$16 sps:$4 sm:$0xff]  }
 0x192   :  { %3446 = vmatpush1.bf16.msra.mxu1 %v6310_v4  ;;  %3076 = vmatprep.subr.bf16.mxu0 %v6315_v6  ;;  %v6363_v38 = vld [vmem:[#allocation3 + $0x704] ss:$16 sps:$4 sm:$0xff]   ;;  %v6366_v4 = vld [vmem:[#allocation3 + $0x70c] ss:$16 sps:$4 sm:$0xff]   ;;  %v6361_v6 = vld [vmem:[#allocation3 + $0x700] ss:$16 sps:$4 sm:$0xff]  }
 0x193   :  { %3528 = vmatprep.subr.bf16.mxu1 %v6318_v7  ;;  %v6364_v7 = vld [vmem:[#allocation3 + $0x708] ss:$16 sps:$4 sm:$0xff]  }
 0x194   :  { %2996 = vmatmul.mubr.bf16.vlgmr.msra.gmra.mrb[64].mxu0 %v7137_v10 }
 0x195   :  { %3448 = vmatmul.mubr.bf16.vlgmr.msra.gmra.mrb[64].mxu1 %v7137_v10  ;;  %3005 = vmatprep.mubr.bf16.mxu0 %v7160_v11  ;;  %v6336_v10 = vld [vmem:[#allocation3 + $0x66c] ss:$16 sps:$4 sm:$0xff]  }
 0x196   :  { %3077 = vmatpush1.bf16.msra.mxu0 %v6313_v13  ;;  %3457 = vmatprep.mubr.bf16.mxu1 %v7160_v11  ;;  %v6331_v11 = vld [vmem:[#allocation3 + $0x660] ss:$16 sps:$4 sm:$0xff]   ;;  %v6369_v13 = vld [vmem:[#allocation3 + $0x724] ss:$16 sps:$4 sm:$0xff]  }
 0x197   :  { %3529 = vmatpush1.bf16.msra.mxu1 %v6316_v14  ;;  %3078 = vmatprep.subr.bf16.mxu0 %v6321_v44  ;;  %v6370_v14 = vld [vmem:[#allocation3 + $0x728] ss:$16 sps:$4 sm:$0xff]   ;;  %v6375_v44 = vld [vmem:[#allocation3 + $0x744] ss:$16 sps:$4 sm:$0xff]  }
 0x198   :  { %3530 = vmatprep.subr.bf16.mxu1 %v6324_v61  ;;  %v6378_v61 = vld [vmem:[#allocation3 + $0x74c] ss:$16 sps:$4 sm:$0xff]  }
 0x19a   :  { %3079 = vmatpush1.bf16.msra.mxu0 %v6319_v17  ;;  %v6373_v17 = vld [vmem:[#allocation3 + $0x740] ss:$16 sps:$4 sm:$0xff]  }
 0x19b   :  { %3531 = vmatpush1.bf16.msra.mxu1 %v6322_v8  ;;  %3080 = vmatprep.subr.bf16.mxu0 %v6327_v15  ;;  %v6376_v8 = vld [vmem:[#allocation3 + $0x748] ss:$16 sps:$4 sm:$0xff]   ;;  %v6381_v15 = vld [vmem:[#allocation3 + $0x764] ss:$16 sps:$4 sm:$0xff]  }
 0x19c   :  { %3006 = vmatmul.mubr.bf16.gmra.mrb[68].mxu0 %v7157_v5  ;;  %3532 = vmatprep.subr.bf16.mxu1 %v6330_v49  ;;  %v6382_v49 = vld [vmem:[#allocation3 + $0x768] ss:$16 sps:$4 sm:$0xff]  }
 0x19d   :  { %3458 = vmatmul.mubr.bf16.gmra.mrb[68].mxu1 %v7157_v5  ;;  %3015 = vmatprep.mubr.bf16.mxu0 %v7180_v37  ;;  %v6348_v5 = vld [vmem:[#allocation3 + $0x6ac] ss:$16 sps:$4 sm:$0xff]  }
 0x19e   :  { %3081 = vmatpush1.bf16.msra.mxu0 %v6325_v20  ;;  %3467 = vmatprep.mubr.bf16.mxu1 %v7180_v37  ;;  %v6343_v37 = vld [vmem:[#allocation3 + $0x6a0] ss:$16 sps:$4 sm:$0xff]   ;;  %v6387_v20 = vld [vmem:[#allocation3 + $0x784] ss:$16 sps:$4 sm:$0xff]  }
 0x19f   :  { %3533 = vmatpush1.bf16.msra.mxu1 %v6328_v53  ;;  %3082 = vmatprep.subr.bf16.mxu0 %v6333_v16  ;;  %v6390_v53 = vld [vmem:[#allocation3 + $0x78c] ss:$16 sps:$4 sm:$0xff]   ;;  %v6385_v16 = vld [vmem:[#allocation3 + $0x780] ss:$16 sps:$4 sm:$0xff]  }
 0x1a0   :  { %3534 = vmatprep.subr.bf16.mxu1 %v6336_v10  ;;  %v6388_v10 = vld [vmem:[#allocation3 + $0x788] ss:$16 sps:$4 sm:$0xff]  }
 0x1a2   :  { %3083 = vmatpush1.bf16.msra.mxu0 %v6331_v11  ;;  %v6393_v11 = vld [vmem:[#allocation3 + $0x7a4] ss:$16 sps:$4 sm:$0xff]  }
 0x1a3   :  { %3535 = vmatpush1.bf16.msra.mxu1 %v6334_v26  ;;  %3084 = vmatprep.subr.bf16.mxu0 %v6339_v60  ;;  %v6394_v26 = vld [vmem:[#allocation3 + $0x7a8] ss:$16 sps:$4 sm:$0xff]   ;;  %v6399_v60 = vld [vmem:[#allocation3 + $0x7c4] ss:$16 sps:$4 sm:$0xff]  }
 0x1a4   :  { %3016 = vmatmul.mubr.bf16.gmra.mrb[72].mxu0 %v7177_v0  ;;  %3536 = vmatprep.subr.bf16.mxu1 %v6342_v46  ;;  %v6402_v46 = vld [vmem:[#allocation3 + $0x7cc] ss:$16 sps:$4 sm:$0xff]  }
 0x1a5   :  { %3468 = vmatmul.mubr.bf16.gmra.mrb[72].mxu1 %v7177_v0  ;;  %3025 = vmatprep.mubr.bf16.mxu0 %v7200_v9  ;;  %v6360_v0 = vld [vmem:[#allocation3 + $0x6ec] ss:$16 sps:$4 sm:$0xff]  }
 0x1a6   :  { %3085 = vmatpush1.bf16.msra.mxu0 %v6337_v51  ;;  %3477 = vmatprep.mubr.bf16.mxu1 %v7200_v9  ;;  %v6355_v9 = vld [vmem:[#allocation3 + $0x6e0] ss:$16 sps:$4 sm:$0xff]  }
 0x1a7   :  { %3537 = vmatpush1.bf16.msra.mxu1 %v6340_v63  ;;  %3086 = vmatprep.subr.bf16.mxu0 %v6345_v43  ;;  %v6397_v51 = vld [vmem:[#allocation3 + $0x7c0] ss:$16 sps:$4 sm:$0xff]   ;;  %v6400_v63 = vld [vmem:[#allocation3 + $0x7c8] ss:$16 sps:$4 sm:$0xff]   ;;  %v6405_v43 = vld [vmem:[#allocation3 + $0x7e4] ss:$16 sps:$4 sm:$0xff]  }
 0x1a8   :  { %3538 = vmatprep.subr.bf16.mxu1 %v6348_v5  ;;  %v6406_v5 = vld [vmem:[#allocation3 + $0x7e8] ss:$16 sps:$4 sm:$0xff]  }
 0x1aa   :  { %3087 = vmatpush1.bf16.msra.mxu0 %v6343_v37  ;;  %v6411_v37 = vld [vmem:[#allocation6 + $0x4] ss:$12 sps:$4 sm:$0xff]  }
 0x1ab   :  { %3539 = vmatpush1.bf16.msra.mxu1 %v6346_v18  ;;  %3088 = vmatprep.subr.bf16.mxu0 %v6351_v54  ;;  %v6412_v18 = vld [vmem:[#allocation6 + $0xc8] ss:$12 sps:$4 sm:$0xff]   ;;  %v6409_v54 = vld [vmem:[#allocation6] ss:$12 sps:$4 sm:$0xff]  }
 0x1ac   :  { %3026 = vmatmul.mubr.bf16.gmra.mrb[76].mxu0 %v7197_v35  ;;  %3540 = vmatprep.subr.bf16.mxu1 %v6354_v59  ;;  %v6413_v59 = vld [vmem:[#allocation6 + $0x8] ss:$12 sps:$4 sm:$0xff]  }
 0x1ad   :  { %3478 = vmatmul.mubr.bf16.gmra.mrb[76].mxu1 %v7197_v35  ;;  %3035 = vmatprep.mubr.bf16.mxu0 %v7220_v22  ;;  %v6372_v35 = vld [vmem:[#allocation3 + $0x72c] ss:$16 sps:$4 sm:$0xff]  }
 0x1ae   :  { %3089 = vmatpush1.bf16.msra.mxu0 %v6349_v62  ;;  %3487 = vmatprep.mubr.bf16.mxu1 %v7220_v22  ;;  %v6367_v22 = vld [vmem:[#allocation3 + $0x720] ss:$16 sps:$4 sm:$0xff]   ;;  %v6416_v62 = vld [vmem:[#allocation6 + $0x1c] ss:$12 sps:$4 sm:$0xff]  }
 0x1af   :  { %3541 = vmatpush1.bf16.msra.mxu1 %v6352_v50  ;;  %3090 = vmatprep.subr.bf16.mxu0 %v6357_v40  ;;  %v6419_v50 = vld [vmem:[#allocation6 + $0x34] ss:$12 sps:$4 sm:$0xff]  }
 0x1b0   :  { %3542 = vmatprep.subr.bf16.mxu1 %v6360_v0  ;;  %v6421_v40 = vld [vmem:[#allocation6 + $0x20] ss:$12 sps:$4 sm:$0xff]   ;;  %v6428_v0 = vld [vmem:[#allocation6 + $0xf8] ss:$12 sps:$4 sm:$0xff]  }
 0x1b2   :  { %3091 = vmatpush1.bf16.msra.mxu0 %v6355_v9  ;;  %v6417_v9 = vld [vmem:[#allocation6 + $0x30] ss:$12 sps:$4 sm:$0xff]  }
 0x1b3   :  { %3543 = vmatpush1.bf16.msra.mxu1 %v6358_v56  ;;  %3092 = vmatprep.subr.bf16.mxu0 %v6363_v38  ;;  %v6424_v56 = vld [vmem:[#allocation6 + $0x4c] ss:$12 sps:$4 sm:$0xff]  }
 0x1b4   :  { %3036 = vmatmul.mubr.bf16.gmra.mrb[80].mxu0 %v7217_v3  ;;  %3544 = vmatprep.subr.bf16.mxu1 %v6366_v4  ;;  %v6429_v38 = vld [vmem:[#allocation6 + $0x38] ss:$12 sps:$4 sm:$0xff]  }
 0x1b5   :  { %3488 = vmatmul.mubr.bf16.gmra.mrb[80].mxu1 %v7217_v3  ;;  %3045 = vmatprep.mubr.bf16.mxu0 %v7240_v19  ;;  %v6384_v3 = vld [vmem:[#allocation3 + $0x76c] ss:$16 sps:$4 sm:$0xff]   ;;  %v6427_v4 = vld [vmem:[#allocation6 + $0x64] ss:$12 sps:$4 sm:$0xff]  }
 0x1b6   :  { %3093 = vmatpush1.bf16.msra.mxu0 %v6361_v6  ;;  %3497 = vmatprep.mubr.bf16.mxu1 %v7240_v19  ;;  %v6379_v19 = vld [vmem:[#allocation3 + $0x760] ss:$16 sps:$4 sm:$0xff]  }
 0x1b7   :  { %3545 = vmatpush1.bf16.msra.mxu1 %v6364_v7  ;;  %3094 = vmatprep.subr.bf16.mxu0 %v6369_v13  ;;  %v6437_v6 = vld [vmem:[#allocation6 + $0x50] ss:$12 sps:$4 sm:$0xff]   ;;  %v6444_v7 = vld [vmem:[#allocation6 + $0x128] ss:$12 sps:$4 sm:$0xff]   ;;  %v6425_v13 = vld [vmem:[#allocation6 + $0x60] ss:$12 sps:$4 sm:$0xff]  }
 0x1b8   :  { %3546 = vmatprep.subr.bf16.mxu1 %v6372_v35  ;;  %v6432_v35 = vld [vmem:[#allocation6 + $0x7c] ss:$12 sps:$4 sm:$0xff]  }
 0x1ba   :  { %3095 = vmatpush1.bf16.msra.mxu0 %v6367_v22  ;;  %v6445_v22 = vld [vmem:[#allocation6 + $0x68] ss:$12 sps:$4 sm:$0xff]  }
 0x1bb   :  { %3547 = vmatpush1.bf16.msra.mxu1 %v6370_v14  ;;  %3096 = vmatprep.subr.bf16.mxu0 %v6375_v44  ;;  %v6435_v14 = vld [vmem:[#allocation6 + $0x94] ss:$12 sps:$4 sm:$0xff]  }
 0x1bc   :  { %3046 = vmatmul.mubr.bf16.gmra.mrb[84].mxu0 %v7237_v45  ;;  %3548 = vmatprep.subr.bf16.mxu1 %v6378_v61  ;;  %v6453_v44 = vld [vmem:[#allocation6 + $0x80] ss:$12 sps:$4 sm:$0xff]   ;;  %v6460_v61 = vld [vmem:[#allocation6 + $0x158] ss:$12 sps:$4 sm:$0xff]  }
 0x1bd   :  { %3498 = vmatmul.mubr.bf16.gmra.mrb[84].mxu1 %v7237_v45  ;;  %3055 = vmatprep.mubr.bf16.mxu0 %v7260_v47  ;;  %v6396_v45 = vld [vmem:[#allocation3 + $0x7ac] ss:$16 sps:$4 sm:$0xff]  }
 0x1be   :  { %3097 = vmatpush1.bf16.msra.mxu0 %v6373_v17  ;;  %3507 = vmatprep.mubr.bf16.mxu1 %v7260_v47  ;;  %v6391_v47 = vld [vmem:[#allocation3 + $0x7a0] ss:$16 sps:$4 sm:$0xff]  }
 0x1bf   :  { %3549 = vmatpush1.bf16.msra.mxu1 %v6376_v8  ;;  %3098 = vmatprep.subr.bf16.mxu0 %v6381_v15  ;;  %v6433_v17 = vld [vmem:[#allocation6 + $0x90] ss:$12 sps:$4 sm:$0xff]   ;;  %v6440_v8 = vld [vmem:[#allocation6 + $0xac] ss:$12 sps:$4 sm:$0xff]  }
 0x1c0   :  { %3550 = vmatprep.subr.bf16.mxu1 %v6384_v3  ;;  %v6461_v15 = vld [vmem:[#allocation6 + $0x98] ss:$12 sps:$4 sm:$0xff]   ;;  %v6441_v3 = vld [vmem:[#allocation6 + $0xc0] ss:$12 sps:$4 sm:$0xff]  }
 0x1c2   :  { %3099 = vmatpush1.bf16.msra.mxu0 %v6379_v19  ;;  %v6448_v19 = vld [vmem:[#allocation6 + $0xdc] ss:$12 sps:$4 sm:$0xff]  }
 0x1c3   :  { %3551 = vmatpush1.bf16.msra.mxu1 %v6382_v49  ;;  %3100 = vmatprep.subr.bf16.mxu0 %v6387_v20  ;;  %v6449_v49 = vld [vmem:[#allocation6 + $0xf0] ss:$12 sps:$4 sm:$0xff]   ;;  %v6456_v20 = vld [vmem:[#allocation6 + $0x10c] ss:$12 sps:$4 sm:$0xff]  }
 0x1c4   :  { %3056 = vmatmul.mubr.bf16.gmra.mrb[88].mxu0 %v7257_v25  ;;  %3552 = vmatprep.subr.bf16.mxu1 %v6390_v53  ;;  %v6457_v53 = vld [vmem:[#allocation6 + $0x120] ss:$12 sps:$4 sm:$0xff]  }
 0x1c5   :  { %3508 = vmatmul.mubr.bf16.gmra.mrb[88].mxu1 %v7257_v25  ;;  %3065 = vmatprep.mubr.bf16.mxu0 %v7280_v12  ;;  %v6408_v25 = vld [vmem:[#allocation3 + $0x7ec] ss:$16 sps:$4 sm:$0xff]  }
 0x1c6   :  { %3101 = vmatpush1.bf16.msra.mxu0 %v6385_v16  ;;  %3517 = vmatprep.mubr.bf16.mxu1 %v7280_v12  ;;  %v6403_v12 = vld [vmem:[#allocation3 + $0x7e0] ss:$16 sps:$4 sm:$0xff]   ;;  %v6464_v16 = vld [vmem:[#allocation6 + $0x13c] ss:$12 sps:$4 sm:$0xff]  }
 0x1c7   :  { %3553 = vmatpush1.bf16.msra.mxu1 %v6388_v10  ;;  %3102 = vmatprep.subr.bf16.mxu0 %v6393_v11  ;;  %v6465_v10 = vld [vmem:[#allocation6 + $0x150] ss:$12 sps:$4 sm:$0xff]  }
 0x1c8   :  { %3554 = vmatprep.subr.bf16.mxu1 %v6396_v45  ;;  %v6468_v11 = vld [vmem:[#allocation6 + $0x170] ss:$12 sps:$4 sm:$0xff]   ;;  %v6472_v45 = vld [vmem:[#allocation6 + $0x16c] ss:$12 sps:$4 sm:$0xff]  }
 0x1ca   :  { %3103 = vmatpush1.bf16.msra.mxu0 %v6391_v47  ;;  %v6469_v47 = vld [vmem:[#allocation6 + $0xb0] ss:$12 sps:$4 sm:$0xff]  }
 0x1cb   :  { %3555 = vmatpush1.bf16.msra.mxu1 %v6394_v26  ;;  %3104 = vmatprep.subr.bf16.mxu0 %v6399_v60  ;;  %v6476_v26 = vld [vmem:[#allocation6 + $0x248] ss:$12 sps:$4 sm:$0xff]  }
 0x1cc   :  { %3066 = vmatmul.mubr.bf16.gmra.mrb[92].mxu0 %v7277_v57  ;;  %3556 = vmatprep.subr.bf16.mxu1 %v6402_v46 }
 0x1cd   :  { %3518 = vmatmul.mubr.bf16.gmra.mrb[92].mxu1 %v7277_v57  ;;  %3108 = vmatprep.mubr.bf16.mxu0 %v7149_v41  ;;  %v6420_v57 = vld [vmem:[#allocation6 + $0xe0] ss:$12 sps:$4 sm:$0xff]  }
 0x1ce   :  { %3105 = vmatpush1.bf16.msra.mxu0 %v6397_v51  ;;  %3560 = vmatprep.mubr.bf16.mxu1 %v7149_v41  ;;  %v6414_v41 = vld [vmem:[#allocation6 + $0x18] ss:$12 sps:$4 sm:$0xff]  }
 0x1cf   :  { %3557 = vmatpush1.bf16.msra.mxu1 %v6400_v63  ;;  %3106 = vmatprep.subr.bf16.mxu0 %v6405_v43 }
 0x1d0   :  { %3558 = vmatprep.subr.bf16.mxu1 %v6408_v25 }
 0x1d2   :  { %3107 = vmatpush1.bf16.msra.mxu0 %v6403_v12 }
 0x1d3   :  { %3559 = vmatpush1.bf16.msra.mxu1 %v6406_v5  ;;  %4480 = vmatprep.subr.bf16.mxu0 %v6411_v37 }
 0x1d4   :  { %5530 = vmatprep.subr.bf16.mxu1 %v6412_v18 }
 0x1d5   :  { %3109 = vmatmul.mubr.bf16.vlgmr.msra.gmra.mrb[64].mxu0 %v7144_v39 }
 0x1d6   :  { %3561 = vmatmul.mubr.bf16.vlgmr.msra.gmra.mrb[64].mxu1 %v7144_v39  ;;  %3118 = vmatprep.mubr.bf16.mxu0 %v7169_v28  ;;  %v6436_v39 = vld [vmem:[#allocation6 + $0x110] ss:$12 sps:$4 sm:$0xff]  }
 0x1d7   :  { %3570 = vmatprep.mubr.bf16.mxu1 %v7169_v28  ;;  %4481 = vmatpush1.bf16.msra.mxu0 %v6409_v54  ;;  %v6422_v28 = vld [vmem:[#allocation6 + $0x48] ss:$12 sps:$4 sm:$0xff]  }
 0x1d8   :  { %5531 = vmatpush3.bf16.msra.mxu1 %v6413_v59  ;;  %4482 = vmatprep.subr.bf16.mxu0 %v6416_v62 }
 0x1d9   :  { %5532 = vmatprep.subr.bf16.mxu1 %v6420_v57 }
 0x1db   :  { %4483 = vmatpush1.bf16.msra.mxu0 %v6414_v41 }
 0x1dc   :  { %4484 = vmatprep.subr.bf16.mxu0 %v6419_v50  ;;  %5533 = vmatpush3.bf16.msra.mxu1 %v6421_v40 }
 0x1dd   :  { %3119 = vmatmul.mubr.bf16.gmra.mrb[68].mxu0 %v7164_v24  ;;  %5534 = vmatprep.subr.bf16.mxu1 %v6428_v0 }
 0x1de   :  { %3571 = vmatmul.mubr.bf16.gmra.mrb[68].mxu1 %v7164_v24  ;;  %3128 = vmatprep.mubr.bf16.mxu0 %v7189_v1  ;;  %v6452_v24 = vld [vmem:[#allocation6 + $0x140] ss:$12 sps:$4 sm:$0xff]  }
 0x1df   :  { %3580 = vmatprep.mubr.bf16.mxu1 %v7189_v1  ;;  %4485 = vmatpush1.bf16.msra.mxu0 %v6417_v9  ;;  %v6430_v1 = vld [vmem:[#allocation6 + $0x78] ss:$12 sps:$4 sm:$0xff]  }
 0x1e0   :  { %4486 = vmatprep.subr.bf16.mxu0 %v6424_v56  ;;  %5535 = vmatpush3.bf16.msra.mxu1 %v6429_v38 }
 0x1e1   :  { %5536 = vmatprep.subr.bf16.mxu1 %v6436_v39 }
 0x1e3   :  { %4487 = vmatpush1.bf16.msra.mxu0 %v6422_v28 }
 0x1e4   :  { %4488 = vmatprep.subr.bf16.mxu0 %v6427_v4  ;;  %5537 = vmatpush3.bf16.msra.mxu1 %v6437_v6 }
 0x1e5   :  { %3129 = vmatmul.mubr.bf16.gmra.mrb[72].mxu0 %v7184_v21  ;;  %5538 = vmatprep.subr.bf16.mxu1 %v6444_v7 }
 0x1e6   :  { %3581 = vmatmul.mubr.bf16.gmra.mrb[72].mxu1 %v7184_v21  ;;  %3138 = vmatprep.mubr.bf16.mxu0 %v7209_v42  ;;  %v6438_v21 = vld [vmem:[#allocation6 + $0xa8] ss:$12 sps:$4 sm:$0xff]  }
 0x1e7   :  { %3590 = vmatprep.mubr.bf16.mxu1 %v7209_v42  ;;  %4489 = vmatpush1.bf16.msra.mxu0 %v6425_v13  ;;  %v6443_v42 = vld [vmem:[#allocation6 + $0xc4] ss:$12 sps:$4 sm:$0xff]  }
 0x1e8   :  { %4490 = vmatprep.subr.bf16.mxu0 %v6432_v35  ;;  %5539 = vmatpush3.bf16.msra.mxu1 %v6445_v22 }
 0x1e9   :  { %5540 = vmatprep.subr.bf16.mxu1 %v6452_v24 }
 0x1eb   :  { %4491 = vmatpush1.bf16.msra.mxu0 %v6430_v1 }
 0x1ec   :  { %4492 = vmatprep.subr.bf16.mxu0 %v6435_v14  ;;  %5541 = vmatpush3.bf16.msra.mxu1 %v6453_v44  ;;  %v6473_v14 = vld [vmem:[#allocation6 + $0x180] ss:$12 sps:$4 sm:$0xff]   ;;  %v6477_v44 = vld [vmem:[#allocation6 + $0x188] ss:$12 sps:$4 sm:$0xff]  }
 0x1ed   :  { %3139 = vmatmul.mubr.bf16.gmra.mrb[76].mxu0 %v7204_v23  ;;  %5542 = vmatprep.subr.bf16.mxu1 %v6460_v61 }
 0x1ee   :  { %3591 = vmatmul.mubr.bf16.gmra.mrb[76].mxu1 %v7204_v23  ;;  %3148 = vmatprep.mubr.bf16.mxu0 %v7229_v48  ;;  %v6446_v23 = vld [vmem:[#allocation6 + $0xd8] ss:$12 sps:$4 sm:$0xff]  }
 0x1ef   :  { %3600 = vmatprep.mubr.bf16.mxu1 %v7229_v48  ;;  %4493 = vmatpush1.bf16.msra.mxu0 %v6433_v17  ;;  %v6451_v48 = vld [vmem:[#allocation6 + $0xf4] ss:$12 sps:$4 sm:$0xff]  }
 0x1f0   :  { %4494 = vmatprep.subr.bf16.mxu0 %v6440_v8  ;;  %5543 = vmatpush3.bf16.msra.mxu1 %v6461_v15 }
 0x1f1   :  { %5544 = vmatprep.subr.bf16.mxu1 %v6468_v11 }
 0x1f3   :  { %4495 = vmatpush1.bf16.msra.mxu0 %v6438_v21  ;;  %v6480_v21 = vld [vmem:[#allocation6 + $0x19c] ss:$12 sps:$4 sm:$0xff]  }
 0x1f4   :  { %4496 = vmatprep.subr.bf16.mxu0 %v6443_v42  ;;  %5545 = vmatpush3.bf16.msra.mxu1 %v6469_v47  ;;  %v6484_v42 = vld [vmem:[#allocation6 + $0x260] ss:$12 sps:$4 sm:$0xff]  }
 0x1f5   :  { %3149 = vmatmul.mubr.bf16.gmra.mrb[80].mxu0 %v7224_v29  ;;  %5594 = vmatprep.subr.bf16.mxu1 %v6476_v26 }
 0x1f6   :  { %3601 = vmatmul.mubr.bf16.gmra.mrb[80].mxu1 %v7224_v29  ;;  %3158 = vmatprep.mubr.bf16.mxu0 %v7249_v52  ;;  %v6454_v29 = vld [vmem:[#allocation6 + $0x108] ss:$12 sps:$4 sm:$0xff]  }
 0x1f7   :  { %3610 = vmatprep.mubr.bf16.mxu1 %v7249_v52  ;;  %4497 = vmatpush1.bf16.msra.mxu0 %v6441_v3  ;;  %v6459_v52 = vld [vmem:[#allocation6 + $0x124] ss:$12 sps:$4 sm:$0xff]  }
 0x1f8   :  { %4498 = vmatprep.subr.bf16.mxu0 %v6448_v19 }
 0x1fb   :  { %4499 = vmatpush1.bf16.msra.mxu0 %v6446_v23 }
 0x1fc   :  { %4500 = vmatprep.subr.bf16.mxu0 %v6451_v48 }
 0x1fd   :  { %3159 = vmatmul.mubr.bf16.gmra.mrb[84].mxu0 %v7244_v32 }
 0x1fe   :  { %3611 = vmatmul.mubr.bf16.gmra.mrb[84].mxu1 %v7244_v32  ;;  %3168 = vmatprep.mubr.bf16.mxu0 %v7269_v55  ;;  %v6462_v32 = vld [vmem:[#allocation6 + $0x138] ss:$12 sps:$4 sm:$0xff]  }
 0x1ff   :  { %3620 = vmatprep.mubr.bf16.mxu1 %v7269_v55  ;;  %4501 = vmatpush1.bf16.msra.mxu0 %v6449_v49  ;;  %v6467_v55 = vld [vmem:[#allocation6 + $0x154] ss:$12 sps:$4 sm:$0xff]  }
 0x200   :  { %4502 = vmatprep.subr.bf16.mxu0 %v6456_v20 }
 0x203   :  { %4503 = vmatpush1.bf16.msra.mxu0 %v6454_v29 }
 0x204   :  { %4504 = vmatprep.subr.bf16.mxu0 %v6459_v52 }
 0x205   :  { %3169 = vmatmul.mubr.bf16.gmra.mrb[88].mxu0 %v7264_v2 }
 0x206   :  { %3621 = vmatmul.mubr.bf16.gmra.mrb[88].mxu1 %v7264_v2  ;;  %3178 = vmatprep.mubr.bf16.mxu0 %v7286_v27  ;;  %v6470_v2 = vld [vmem:[#allocation6 + $0x168] ss:$12 sps:$4 sm:$0xff]  }
 0x207   :  { %3630 = vmatprep.mubr.bf16.mxu1 %v7286_v27  ;;  %4505 = vmatpush1.bf16.msra.mxu0 %v6457_v53  ;;  %v6475_v27 = vld [vmem:[#allocation6 + $0x184] ss:$12 sps:$4 sm:$0xff]  }
 0x208   :  { %4506 = vmatprep.subr.bf16.mxu0 %v6464_v16 }
 0x20b   :  { %4507 = vmatpush1.bf16.msra.mxu0 %v6462_v32 }
 0x20c   :  { %4508 = vmatprep.subr.bf16.mxu0 %v6467_v55  ;;  %v6478_v55 = vld [vmem:[#allocation6 + $0x198] ss:$12 sps:$4 sm:$0xff]  }
 0x20d   :  { %3179 = vmatmul.mubr.bf16.gmra.mrb[92].mxu0 %v7282_v58 }
 0x20e   :  { %3631 = vmatmul.mubr.bf16.gmra.mrb[92].mxu1 %v7282_v58  ;;  %v3641_v58 = vld [vmem:[%s7633_s6] sm:$0xf] }
 0x20f   :  { %4509 = vmatpush1.bf16.msra.mxu0 %v6465_v10  ;;  %v7356_v60 = vrot.slane %v3641_v58, %v6985_v31  ;;  %v7359_v46 = vrot.slane %v3641_v58, %v6996_v34  ;;  %v7362_v51 = vrot.slane %v3641_v58, %v6993_v33  ;;  %v7366_v63 = vrot.slane %v3641_v58, %v150_v36  ;;  %v6485_v10 = vld [vmem:[#allocation6 + $0x1a0] ss:$12 sps:$4 sm:$0xff]  }
 0x210   :  { %4510 = vmatprep.subr.bf16.mxu0 %v6472_v45 }
 0x213   :  { %4511 = vmatpush1.bf16.msra.mxu0 %v6470_v2  ;;  %v6483_v2 = vld [vmem:[#allocation6 + $0x1b4] ss:$12 sps:$4 sm:$0xff]  }
 0x214   :  { %4593 = vmatprep.subr.bf16.mxu0 %v6475_v27  ;;  %v6492_v27 = vld [vmem:[#allocation6 + $0x278] ss:$12 sps:$4 sm:$0xff]  }
 0x2a8   :  { %v3110_v43 = vpop.f32.mrb[64].mxu0 }
 0x2a9   :  { %v3663_v25 = vadd.f32 %v7356_v60, %v3110_v43  ;;  %v3562_v12 = vpop.f32.mrb[64].mxu1  ;;  %v3112_v5 = vpop.f32.mrb[65].mxu0 }
 0x2aa   :  { %v3665_v37 = vadd.f32 %v7359_v46, %v3562_v12  ;;  %v3664_v18 = vadd.f32 %v7362_v51, %v3112_v5  ;;  %v3564_v54 = vpop.f32.mrb[65].mxu1  ;;  %v3114_v59 = vpop.f32.mrb[66].mxu0 }
 0x2ab   :  { %v3666_v62 = vadd.f32 %v7366_v63, %v3564_v54  ;;  %v3667_v57 = vadd.f32 %v7356_v60, %v3114_v59  ;;  %v3566_v41 = vpop.f32.mrb[66].mxu1  ;;  %v3116_v50 = vpop.f32.mrb[67].mxu0  ;;  %v3727_v9 = vmax.f32 %v3663_v25, 0.0 }
 0x2ac   :  { %v3669_v36 = vadd.f32 %v7359_v46, %v3566_v41  ;;  %v3668_v40 = vadd.f32 %v7362_v51, %v3116_v50  ;;  %v3568_v0 = vpop.f32.mrb[67].mxu1  ;;  %v3729_v39 = vmax.f32 %v3665_v37, 0.0  ;;  %v3728_v28 = vmax.f32 %v3664_v18, 0.0 }
 0x2ad   :  { %v3731_v56 = vmax.f32 %v3667_v57, 0.0  ;;  %v3670_v38 = vadd.f32 %v7366_v63, %v3568_v0  ;;  %v3730_v7 = vmax.f32 %v3666_v62, 0.0  ;;  %v6481_v62 = vld [vmem:[#allocation6 + $0x1b0] ss:$12 sps:$4 sm:$0xff]   ;;  %v6493_v57 = vld [vmem:[#allocation6 + $0x1b8] ss:$12 sps:$4 sm:$0xff]  }
 0x2ae   :  { %v3733_v4 = vmax.f32 %v3669_v36, 0.0  ;;  %v3732_v6 = vmax.f32 %v3668_v40, 0.0  ;;  %v6488_v0 = vld [vmem:[#allocation6 + $0x1cc] ss:$12 sps:$4 sm:$0xff]  }
 0x2af   :  { %v3791_v13 = vpack.c.bf16 %v3731_v56, %v3727_v9  ;;  %v3734_v35 = vmax.f32 %v3670_v38, 0.0  ;;  %v6500_v9 = vld [vmem:[#allocation6 + $0x290] ss:$12 sps:$4 sm:$0xff]  }
 0x2b0   :  { %v7376_v22 = vpack.c.bf16 %v3733_v4, %v3729_v39  ;;  %v3792_v24 = vpack.c.bf16 %v3732_v6, %v3728_v28  ;;  %v3120_v1 = vpop.f32.mrb[68].mxu0 }
 0x2b1   :  { %v7378_v61 = vpack.c.bf16 %v3734_v35, %v3730_v7  ;;  %v3671_v17 = vadd.f32 %v7356_v60, %v3120_v1  ;;  %v3572_v8 = vpop.f32.mrb[68].mxu1  ;;  %v3122_v15 = vpop.f32.mrb[69].mxu0 }
 0x2b2   :  { %v3673_v3 = vadd.f32 %v7359_v46, %v3572_v8  ;;  %v3672_v19 = vadd.f32 %v7362_v51, %v3122_v15  ;;  %v3574_v23 = vpop.f32.mrb[69].mxu1  ;;  %v3124_v48 = vpop.f32.mrb[70].mxu0  ;;  %4512 = vmatprep.mubr.bf16.mxu0 %v3792_v24  ;;  %4738 = vmatprep.mubr.bf16.mxu1 %v3792_v24 }
 0x2b3   :  { %v3674_v49 = vadd.f32 %v7366_v63, %v3574_v23  ;;  %v3675_v20 = vadd.f32 %v7356_v60, %v3124_v48  ;;  %v3576_v29 = vpop.f32.mrb[70].mxu1  ;;  %v3126_v52 = vpop.f32.mrb[71].mxu0  ;;  %4513 = vmatmul.mubr.bf16.vlgmr.msra.gmra.mrb[96].mxu0 %v3791_v13  ;;  %4739 = vmatmul.mubr.bf16.vlgmr.msra.gmra.mrb[96].mxu1 %v3791_v13  ;;  %v3735_v11 = vmax.f32 %v3671_v17, 0.0 }
 0x2b4   :  { %v3677_v53 = vadd.f32 %v7359_v46, %v3576_v29  ;;  %v3676_v16 = vadd.f32 %v7362_v51, %v3126_v52  ;;  %v3578_v32 = vpop.f32.mrb[71].mxu1  ;;  %4594 = vmatpush1.bf16.msra.mxu0 %v6473_v14  ;;  %5595 = vmatpush3.bf16.msra.mxu1 %v6477_v44  ;;  %v3737_v26 = vmax.f32 %v3673_v3, 0.0  ;;  %v3736_v58 = vmax.f32 %v3672_v19, 0.0  ;;  %v6486_v14 = vld [vmem:[#allocation6 + $0x1c8] ss:$12 sps:$4 sm:$0xff]  }
 0x2b5   :  { %v3739_v45 = vmax.f32 %v3675_v20, 0.0  ;;  %v3678_v47 = vadd.f32 %v7366_v63, %v3578_v32  ;;  %4595 = vmatprep.subr.bf16.mxu0 %v6480_v21  ;;  %5596 = vmatprep.subr.bf16.mxu1 %v6484_v42  ;;  %v3738_v12 = vmax.f32 %v3674_v49, 0.0  ;;  %v6501_v44 = vld [vmem:[#allocation6 + $0x1d0] ss:$12 sps:$4 sm:$0xff]   ;;  %v6508_v42 = vld [vmem:[#allocation6 + $0x2a8] ss:$12 sps:$4 sm:$0xff]  }
 0x2b6   :  { %v3741_v43 = vmax.f32 %v3677_v53, 0.0  ;;  %v3740_v25 = vmax.f32 %v3676_v16, 0.0  ;;  %v6491_v21 = vld [vmem:[#allocation6 + $0x1e4] ss:$12 sps:$4 sm:$0xff]   ;;  %v6489_v32 = vld [vmem:[#allocation6 + $0x1e0] ss:$12 sps:$4 sm:$0xff]  }
 0x2b7   :  { %v3795_v5 = vpack.c.bf16 %v3739_v45, %v3735_v11  ;;  %v3742_v37 = vmax.f32 %v3678_v47, 0.0 }
 0x2b8   :  { %v7388_v18 = vpack.c.bf16 %v3741_v43, %v3737_v26  ;;  %v3796_v54 = vpack.c.bf16 %v3740_v25, %v3736_v58  ;;  %v3130_v59 = vpop.f32.mrb[72].mxu0  ;;  %4596 = vmatpush1.bf16.msra.mxu0 %v6478_v55  ;;  %5597 = vmatpush3.bf16.msra.mxu1 %v6485_v10  ;;  %v6509_v55 = vld [vmem:[#allocation6 + $0x1e8] ss:$12 sps:$4 sm:$0xff]  }
 0x2b9   :  { %v7390_v41 = vpack.c.bf16 %v3742_v37, %v3738_v12  ;;  %v3679_v50 = vadd.f32 %v7356_v60, %v3130_v59  ;;  %v3582_v36 = vpop.f32.mrb[72].mxu1  ;;  %v3132_v40 = vpop.f32.mrb[73].mxu0  ;;  %4597 = vmatprep.subr.bf16.mxu0 %v6483_v2  ;;  %5598 = vmatprep.subr.bf16.mxu1 %v6492_v27  ;;  %v6496_v2 = vld [vmem:[#allocation6 + $0x1fc] ss:$12 sps:$4 sm:$0xff]   ;;  %v6516_v27 = vld [vmem:[#allocation6 + $0x2c0] ss:$12 sps:$4 sm:$0xff]  }
 0x2ba   :  { %v3681_v56 = vadd.f32 %v7359_v46, %v3582_v36  ;;  %v3680_v38 = vadd.f32 %v7362_v51, %v3132_v40  ;;  %v3584_v39 = vpop.f32.mrb[73].mxu1  ;;  %v3134_v28 = vpop.f32.mrb[74].mxu0  ;;  %4522 = vmatprep.mubr.bf16.mxu0 %v3796_v54  ;;  %4746 = vmatprep.mubr.bf16.mxu1 %v3796_v54  ;;  %v6517_v36 = vld [vmem:[#allocation6 + $0x200] ss:$12 sps:$4 sm:$0xff]  }
 0x2bb   :  { %v3682_v4 = vadd.f32 %v7366_v63, %v3584_v39  ;;  %v3683_v6 = vadd.f32 %v7356_v60, %v3134_v28  ;;  %v3586_v7 = vpop.f32.mrb[74].mxu1  ;;  %v3136_v13 = vpop.f32.mrb[75].mxu0  ;;  %4523 = vmatmul.mubr.bf16.gmra.mrb[100].mxu0 %v3795_v5  ;;  %4747 = vmatmul.mubr.bf16.gmra.mrb[100].mxu1 %v3795_v5  ;;  %v3743_v17 = vmax.f32 %v3679_v50, 0.0  ;;  %v6494_v50 = vld [vmem:[#allocation6 + $0x1f8] ss:$12 sps:$4 sm:$0xff]  }
 0x2bc   :  { %v3685_v35 = vadd.f32 %v7359_v46, %v3586_v7  ;;  %v3684_v24 = vadd.f32 %v7362_v51, %v3136_v13  ;;  %v3588_v1 = vpop.f32.mrb[75].mxu1  ;;  %4598 = vmatpush1.bf16.msra.mxu0 %v6481_v62  ;;  %5599 = vmatpush3.bf16.msra.mxu1 %v6493_v57  ;;  %v3745_v3 = vmax.f32 %v3681_v56, 0.0  ;;  %v3744_v19 = vmax.f32 %v3680_v38, 0.0  ;;  %v6499_v56 = vld [vmem:[#allocation6 + $0x214] ss:$12 sps:$4 sm:$0xff]  }
 0x2bd   :  { %v3747_v8 = vmax.f32 %v3683_v6, 0.0  ;;  %v3686_v15 = vadd.f32 %v7366_v63, %v3588_v1  ;;  %4599 = vmatprep.subr.bf16.mxu0 %v6488_v0  ;;  %5600 = vmatprep.subr.bf16.mxu1 %v6500_v9  ;;  %v3746_v49 = vmax.f32 %v3682_v4, 0.0  ;;  %v6524_v38 = vld [vmem:[#allocation6 + $0x2d8] ss:$12 sps:$4 sm:$0xff]  }
 0x2be   :  { %v3749_v23 = vmax.f32 %v3685_v35, 0.0  ;;  %v3748_v48 = vmax.f32 %v3684_v24, 0.0 }
 0x2bf   :  { %v3799_v20 = vpack.c.bf16 %v3747_v8, %v3743_v17  ;;  %v3750_v29 = vmax.f32 %v3686_v15, 0.0  ;;  %v6525_v17 = vld [vmem:[#allocation6 + $0x218] ss:$12 sps:$4 sm:$0xff]  }
 0x2c0   :  { %v7400_v52 = vpack.c.bf16 %v3749_v23, %v3745_v3  ;;  %v3800_v53 = vpack.c.bf16 %v3748_v48, %v3744_v19  ;;  %v3140_v16 = vpop.f32.mrb[76].mxu0  ;;  %4600 = vmatpush1.bf16.msra.mxu0 %v6486_v14  ;;  %5601 = vmatpush3.bf16.msra.mxu1 %v6501_v44  ;;  %v6497_v44 = vld [vmem:[#allocation6 + $0x210] ss:$12 sps:$4 sm:$0xff]   ;;  %v6504_v3 = vld [vmem:[#allocation6 + $0x22c] ss:$12 sps:$4 sm:$0xff]  }
 0x2c1   :  { %v7402_v10 = vpack.c.bf16 %v3750_v29, %v3746_v49  ;;  %v3687_v11 = vadd.f32 %v7356_v60, %v3140_v16  ;;  %v3592_v45 = vpop.f32.mrb[76].mxu1  ;;  %v3142_v47 = vpop.f32.mrb[77].mxu0  ;;  %4601 = vmatprep.subr.bf16.mxu0 %v6491_v21  ;;  %5602 = vmatprep.subr.bf16.mxu1 %v6508_v42  ;;  %v6532_v19 = vld [vmem:[#allocation6 + $0x2f0] ss:$12 sps:$4 sm:$0xff]  }
 0x2c2   :  { %v3689_v26 = vadd.f32 %v7359_v46, %v3592_v45  ;;  %v3688_v58 = vadd.f32 %v7362_v51, %v3142_v47  ;;  %v3594_v43 = vpop.f32.mrb[77].mxu1  ;;  %v3144_v25 = vpop.f32.mrb[78].mxu0  ;;  %4532 = vmatprep.mubr.bf16.mxu0 %v3800_v53  ;;  %4754 = vmatprep.mubr.bf16.mxu1 %v3800_v53  ;;  %v6502_v47 = vld [vmem:[#allocation6 + $0x228] ss:$12 sps:$4 sm:$0xff]  }
 0x2c3   :  { %v3690_v12 = vadd.f32 %v7366_v63, %v3594_v43  ;;  %v3691_v5 = vadd.f32 %v7356_v60, %v3144_v25  ;;  %v3596_v37 = vpop.f32.mrb[78].mxu1  ;;  %v3146_v54 = vpop.f32.mrb[79].mxu0  ;;  %4533 = vmatmul.mubr.bf16.gmra.mrb[104].mxu0 %v3799_v20  ;;  %4755 = vmatmul.mubr.bf16.gmra.mrb[104].mxu1 %v3799_v20  ;;  %v3751_v40 = vmax.f32 %v3687_v11, 0.0  ;;  %v6507_v43 = vld [vmem:[#allocation6 + $0x244] ss:$12 sps:$4 sm:$0xff]  }
 0x2c4   :  { %v3693_v59 = vadd.f32 %v7359_v46, %v3596_v37  ;;  %v3692_v62 = vadd.f32 %v7362_v51, %v3146_v54  ;;  %v3598_v57 = vpop.f32.mrb[79].mxu1  ;;  %4602 = vmatpush1.bf16.msra.mxu0 %v6489_v32  ;;  %5603 = vmatpush3.bf16.msra.mxu1 %v6509_v55  ;;  %v3753_v39 = vmax.f32 %v3689_v26, 0.0  ;;  %v3752_v28 = vmax.f32 %v3688_v58, 0.0 }
 0x2c5   :  { %v3755_v0 = vmax.f32 %v3691_v5, 0.0  ;;  %v3694_v9 = vadd.f32 %v7366_v63, %v3598_v57  ;;  %4603 = vmatprep.subr.bf16.mxu0 %v6496_v2  ;;  %5604 = vmatprep.subr.bf16.mxu1 %v6516_v27  ;;  %v3754_v7 = vmax.f32 %v3690_v12, 0.0  ;;  %v6533_v2 = vld [vmem:[#allocation6 + $0x230] ss:$12 sps:$4 sm:$0xff]  }
 0x2c6   :  { %v3757_v4 = vmax.f32 %v3693_v59, 0.0  ;;  %v3756_v6 = vmax.f32 %v3692_v62, 0.0 }
 0x2c7   :  { %v3803_v13 = vpack.c.bf16 %v3755_v0, %v3751_v40  ;;  %v3758_v35 = vmax.f32 %v3694_v9, 0.0  ;;  %v6505_v40 = vld [vmem:[#allocation6 + $0x240] ss:$12 sps:$4 sm:$0xff]  }
 0x2c8   :  { %v7412_v24 = vpack.c.bf16 %v3757_v4, %v3753_v39  ;;  %v3804_v1 = vpack.c.bf16 %v3756_v6, %v3752_v28  ;;  %v3150_v14 = vpop.f32.mrb[80].mxu0  ;;  %4604 = vmatpush1.bf16.msra.mxu0 %v6494_v50  ;;  %5605 = vmatpush3.bf16.msra.mxu1 %v6517_v36  ;;  %v6512_v39 = vld [vmem:[#allocation6 + $0x25c] ss:$12 sps:$4 sm:$0xff]  }
 0x2c9   :  { %v7414_v8 = vpack.c.bf16 %v3758_v35, %v3754_v7  ;;  %v3695_v15 = vadd.f32 %v7356_v60, %v3150_v14  ;;  %v3602_v21 = vpop.f32.mrb[80].mxu1  ;;  %v3152_v42 = vpop.f32.mrb[81].mxu0  ;;  %4605 = vmatprep.subr.bf16.mxu0 %v6499_v56  ;;  %5606 = vmatprep.subr.bf16.mxu1 %v6524_v38 }
 0x2ca   :  { %v3697_v23 = vadd.f32 %v7359_v46, %v3602_v21  ;;  %v3696_v48 = vadd.f32 %v7362_v51, %v3152_v42  ;;  %v3604_v49 = vpop.f32.mrb[81].mxu1  ;;  %v3154_v20 = vpop.f32.mrb[82].mxu0  ;;  %4542 = vmatprep.mubr.bf16.mxu0 %v3804_v1  ;;  %4762 = vmatprep.mubr.bf16.mxu1 %v3804_v1  ;;  %v6510_v21 = vld [vmem:[#allocation6 + $0x258] ss:$12 sps:$4 sm:$0xff]  }
 0x2cb   :  { %v3698_v29 = vadd.f32 %v7366_v63, %v3604_v49  ;;  %v3699_v53 = vadd.f32 %v7356_v60, %v3154_v20  ;;  %v3606_v16 = vpop.f32.mrb[82].mxu1  ;;  %v3156_v32 = vpop.f32.mrb[83].mxu0  ;;  %4543 = vmatmul.mubr.bf16.gmra.mrb[108].mxu0 %v3803_v13  ;;  %4763 = vmatmul.mubr.bf16.gmra.mrb[108].mxu1 %v3803_v13  ;;  %v3759_v27 = vmax.f32 %v3695_v15, 0.0 }
 0x2cc   :  { %v3701_v55 = vadd.f32 %v7359_v46, %v3606_v16  ;;  %v3700_v11 = vadd.f32 %v7362_v51, %v3156_v32  ;;  %v3608_v45 = vpop.f32.mrb[83].mxu1  ;;  %4606 = vmatpush1.bf16.msra.mxu0 %v6497_v44  ;;  %5607 = vmatpush3.bf16.msra.mxu1 %v6525_v17  ;;  %v3761_v25 = vmax.f32 %v3697_v23, 0.0  ;;  %v3760_v12 = vmax.f32 %v3696_v48, 0.0  ;;  %v6515_v23 = vld [vmem:[#allocation6 + $0x274] ss:$12 sps:$4 sm:$0xff]  }
 0x2cd   :  { %v3763_v26 = vmax.f32 %v3699_v53, 0.0  ;;  %v3702_v58 = vadd.f32 %v7366_v63, %v3608_v45  ;;  %4607 = vmatprep.subr.bf16.mxu0 %v6504_v3  ;;  %5608 = vmatprep.subr.bf16.mxu1 %v6532_v19  ;;  %v3762_v54 = vmax.f32 %v3698_v29, 0.0 }
 0x2ce   :  { %v3765_v5 = vmax.f32 %v3701_v55, 0.0  ;;  %v3764_v37 = vmax.f32 %v3700_v11, 0.0 }
 0x2cf   :  { %v3807_v59 = vpack.c.bf16 %v3763_v26, %v3759_v27  ;;  %v3766_v62 = vmax.f32 %v3702_v58, 0.0 }
 0x2d0   :  { %v7424_v57 = vpack.c.bf16 %v3765_v5, %v3761_v25  ;;  %v3808_v50 = vpack.c.bf16 %v3764_v37, %v3760_v12  ;;  %v3160_v36 = vpop.f32.mrb[84].mxu0  ;;  %4608 = vmatpush1.bf16.msra.mxu0 %v6502_v47  ;;  %5609 = vmatpush3.bf16.msra.mxu1 %v6533_v2  ;;  %v6513_v47 = vld [vmem:[#allocation6 + $0x270] ss:$12 sps:$4 sm:$0xff]  }
 0x2d1   :  { %v7426_v0 = vpack.c.bf16 %v3766_v62, %v3762_v54  ;;  %v3703_v9 = vadd.f32 %v7356_v60, %v3160_v36  ;;  %v3612_v56 = vpop.f32.mrb[84].mxu1  ;;  %v3162_v38 = vpop.f32.mrb[85].mxu0  ;;  %4609 = vmatprep.subr.bf16.mxu0 %v6507_v43  ;;  %v6520_v43 = vld [vmem:[#allocation6 + $0x28c] ss:$12 sps:$4 sm:$0xff]  }
 0x2d2   :  { %v3705_v28 = vadd.f32 %v7359_v46, %v3612_v56  ;;  %v3704_v4 = vadd.f32 %v7362_v51, %v3162_v38  ;;  %v3614_v6 = vpop.f32.mrb[85].mxu1  ;;  %v3164_v7 = vpop.f32.mrb[86].mxu0  ;;  %4552 = vmatprep.mubr.bf16.mxu0 %v3808_v50  ;;  %4770 = vmatprep.mubr.bf16.mxu1 %v3808_v50  ;;  %v6518_v56 = vld [vmem:[#allocation6 + $0x288] ss:$12 sps:$4 sm:$0xff]  }
 0x2d3   :  { %v3706_v13 = vadd.f32 %v7366_v63, %v3614_v6  ;;  %v3707_v35 = vadd.f32 %v7356_v60, %v3164_v7  ;;  %v3616_v1 = vpop.f32.mrb[86].mxu1  ;;  %v3166_v14 = vpop.f32.mrb[87].mxu0  ;;  %4553 = vmatmul.mubr.bf16.gmra.mrb[112].mxu0 %v3807_v59  ;;  %4771 = vmatmul.mubr.bf16.gmra.mrb[112].mxu1 %v3807_v59  ;;  %v3767_v42 = vmax.f32 %v3703_v9, 0.0 }
 0x2d4   :  { %v3709_v44 = vadd.f32 %v7359_v46, %v3616_v1  ;;  %v3708_v17 = vadd.f32 %v7362_v51, %v3166_v14  ;;  %v3618_v15 = vpop.f32.mrb[87].mxu1  ;;  %4610 = vmatpush1.bf16.msra.mxu0 %v6505_v40  ;;  %v3769_v48 = vmax.f32 %v3705_v28, 0.0  ;;  %v3768_v49 = vmax.f32 %v3704_v4, 0.0  ;;  %v6523_v4 = vld [vmem:[#allocation6 + $0x2a4] ss:$12 sps:$4 sm:$0xff]  }
 0x2d5   :  { %v3771_v3 = vmax.f32 %v3707_v35, 0.0  ;;  %v3710_v19 = vadd.f32 %v7366_v63, %v3618_v15  ;;  %4611 = vmatprep.subr.bf16.mxu0 %v6512_v39  ;;  %v3770_v53 = vmax.f32 %v3706_v13, 0.0 }
 0x2d6   :  { %v3773_v20 = vmax.f32 %v3709_v44, 0.0  ;;  %v3772_v29 = vmax.f32 %v3708_v17, 0.0 }
 0x2d7   :  { %v3811_v16 = vpack.c.bf16 %v3771_v3, %v3767_v42  ;;  %v3774_v32 = vmax.f32 %v3710_v19, 0.0  ;;  %v6521_v42 = vld [vmem:[#allocation6 + $0x2a0] ss:$12 sps:$4 sm:$0xff]  }
 0x2d8   :  { %v7436_v55 = vpack.c.bf16 %v3773_v20, %v3769_v48  ;;  %v3812_v11 = vpack.c.bf16 %v3772_v29, %v3768_v49  ;;  %v3170_v45 = vpop.f32.mrb[88].mxu0  ;;  %4612 = vmatpush1.bf16.msra.mxu0 %v6510_v21  ;;  %v6528_v49 = vld [vmem:[#allocation6 + $0x2bc] ss:$12 sps:$4 sm:$0xff]  }
 0x2d9   :  { %v7438_v2 = vpack.c.bf16 %v3774_v32, %v3770_v53  ;;  %v3711_v27 = vadd.f32 %v7356_v60, %v3170_v45  ;;  %v3622_v26 = vpop.f32.mrb[88].mxu1  ;;  %v3172_v58 = vpop.f32.mrb[89].mxu0  ;;  %4613 = vmatprep.subr.bf16.mxu0 %v6515_v23 }
 0x2da   :  { %v3713_v25 = vadd.f32 %v7359_v46, %v3622_v26  ;;  %v3712_v12 = vadd.f32 %v7362_v51, %v3172_v58  ;;  %v3624_v5 = vpop.f32.mrb[89].mxu1  ;;  %v3174_v37 = vpop.f32.mrb[90].mxu0  ;;  %4562 = vmatprep.mubr.bf16.mxu0 %v3812_v11  ;;  %4778 = vmatprep.mubr.bf16.mxu1 %v3812_v11 }
 0x2db   :  { %v3714_v54 = vadd.f32 %v7366_v63, %v3624_v5  ;;  %v3715_v59 = vadd.f32 %v7356_v60, %v3174_v37  ;;  %v3626_v62 = vpop.f32.mrb[90].mxu1  ;;  %v3176_v50 = vpop.f32.mrb[91].mxu0  ;;  %4563 = vmatmul.mubr.bf16.gmra.mrb[116].mxu0 %v3811_v16  ;;  %4779 = vmatmul.mubr.bf16.gmra.mrb[116].mxu1 %v3811_v16  ;;  %v3775_v38 = vmax.f32 %v3711_v27, 0.0  ;;  %v6531_v37 = vld [vmem:[#allocation6 + $0x2d4] ss:$12 sps:$4 sm:$0xff]  }
 0x2dc   :  { %v3717_v36 = vadd.f32 %v7359_v46, %v3626_v62  ;;  %v3716_v40 = vadd.f32 %v7362_v51, %v3176_v50  ;;  %v3628_v9 = vpop.f32.mrb[91].mxu1  ;;  %4614 = vmatpush1.bf16.msra.mxu0 %v6513_v47  ;;  %v3777_v6 = vmax.f32 %v3713_v25, 0.0  ;;  %v3776_v7 = vmax.f32 %v3712_v12, 0.0 }
 0x2dd   :  { %v3779_v39 = vmax.f32 %v3715_v59, 0.0  ;;  %v3718_v28 = vadd.f32 %v7366_v63, %v3628_v9  ;;  %4615 = vmatprep.subr.bf16.mxu0 %v6520_v43  ;;  %v3778_v1 = vmax.f32 %v3714_v54, 0.0  ;;  %v6526_v43 = vld [vmem:[#allocation6 + $0x2b8] ss:$12 sps:$4 sm:$0xff]  }
 0x2de   :  { %v3781_v13 = vmax.f32 %v3717_v36, 0.0  ;;  %v3780_v35 = vmax.f32 %v3716_v40, 0.0 }
 0x2df   :  { %v3815_v14 = vpack.c.bf16 %v3779_v39, %v3775_v38  ;;  %v3782_v44 = vmax.f32 %v3718_v28, 0.0  ;;  %v6536_v38 = vld [vmem:[#allocation6 + $0x2ec] ss:$12 sps:$4 sm:$0xff]  }
 0x2e0   :  { %v7448_v17 = vpack.c.bf16 %v3781_v13, %v3777_v6  ;;  %v3816_v15 = vpack.c.bf16 %v3780_v35, %v3776_v7  ;;  %v3180_v21 = vpop.f32.mrb[92].mxu0  ;;  %4616 = vmatpush1.bf16.msra.mxu0 %v6518_v56 }
 0x2e1   :  { %v7450_v3 = vpack.c.bf16 %v3782_v44, %v3778_v1  ;;  %v3719_v19 = vadd.f32 %v7356_v60, %v3180_v21  ;;  %v3632_v23 = vpop.f32.mrb[92].mxu1  ;;  %v3182_v48 = vpop.f32.mrb[93].mxu0  ;;  %4617 = vmatprep.subr.bf16.mxu0 %v6523_v4 }
 0x2e2   :  { %v3721_v20 = vadd.f32 %v7359_v46, %v3632_v23  ;;  %v3720_v29 = vadd.f32 %v7362_v51, %v3182_v48  ;;  %v3634_v53 = vpop.f32.mrb[93].mxu1  ;;  %v3184_v16 = vpop.f32.mrb[94].mxu0  ;;  %4572 = vmatprep.mubr.bf16.mxu0 %v3816_v15  ;;  %4786 = vmatprep.mubr.bf16.mxu1 %v3816_v15 }
 0x2e3   :  { %v3722_v32 = vadd.f32 %v7366_v63, %v3634_v53  ;;  %v3723_v11 = vadd.f32 %v7356_v60, %v3184_v16  ;;  %v3636_v45 = vpop.f32.mrb[94].mxu1  ;;  %v3186_v47 = vpop.f32.mrb[95].mxu0  ;;  %4573 = vmatmul.mubr.bf16.gmra.mrb[120].mxu0 %v3815_v14  ;;  %4787 = vmatmul.mubr.bf16.gmra.mrb[120].mxu1 %v3815_v14  ;;  %v3783_v25 = vmax.f32 %v3719_v19, 0.0  ;;  %v4973_v14 = vld [vmem:[#allocation2] sm:$0x1] }
 0x2e4   :  { %v3725_v27 = vadd.f32 %v7359_v46, %v3636_v45  ;;  %v3724_v26 = vadd.f32 %v7362_v51, %v3186_v47  ;;  %v3638_v58 = vpop.f32.mrb[95].mxu1  ;;  %4618 = vmatpush1.bf16.msra.mxu0 %v6521_v42  ;;  %v3785_v54 = vmax.f32 %v3721_v20, 0.0  ;;  %v3784_v59 = vmax.f32 %v3720_v29, 0.0  ;;  %v6529_v51 = vld [vmem:[#allocation6 + $0x2d0] ss:$12 sps:$4 sm:$0xff]   ;;  %4976 = vperm.xlu0 %6020, %v4973_v14  }
 0x2e5   :  { %v3787_v12 = vmax.f32 %v3723_v11, 0.0  ;;  %v3726_v5 = vadd.f32 %v7366_v63, %v3638_v58  ;;  %4619 = vmatprep.subr.bf16.mxu0 %v6528_v49  ;;  %v3786_v50 = vmax.f32 %v3722_v32, 0.0  ;;  %v6534_v63 = vld [vmem:[#allocation6 + $0x2e8] ss:$12 sps:$4 sm:$0xff]  }
 0x2e6   :  { %v3789_v60 = vmax.f32 %v3725_v27, 0.0  ;;  %v3788_v62 = vmax.f32 %v3724_v26, 0.0 }
 0x2e7   :  { %v3819_v36 = vpack.c.bf16 %v3787_v12, %v3783_v25  ;;  %v3790_v40 = vmax.f32 %v3726_v5, 0.0 }
 0x2e8   :  { %v3821_v9 = vpack.c.bf16 %v3789_v60, %v3785_v54  ;;  %v3820_v46 = vpack.c.bf16 %v3788_v62, %v3784_v59  ;;  %4620 = vmatpush1.bf16.msra.mxu0 %v6526_v43 }
 0x2e9   :  { %v3822_v56 = vpack.c.bf16 %v3790_v40, %v3786_v50  ;;  %4621 = vmatprep.subr.bf16.mxu0 %v6531_v37 }
 0x2ea   :  { %4582 = vmatprep.mubr.bf16.mxu0 %v3820_v46  ;;  %4794 = vmatprep.mubr.bf16.mxu1 %v3820_v46  ;;  %v3951_v46 = vld [vmem:[%s7635_s8] sm:$0x7]  ;;  %s6619_s8 = smov [#allocation8]  }
 0x2eb   :  { %4583 = vmatmul.mubr.bf16.gmra.mrb[124].mxu0 %v3819_v36  ;;  %4795 = vmatmul.mubr.bf16.gmra.mrb[124].mxu1 %v3819_v36  ;;  %s5097_s13 = sshll.u32 %s6619_s8, 4  ;;  %s5098_s13 = int_to_ptr.vmem [resolvable:$true] %s5097_s13 }
 0x2ec   :  { %4622 = vmatpush1.bf16.msra.mxu0 %v6529_v51  ;;  %4625 = vmatprep.mubr.bf16.mxu0 %v7378_v61  ;;  %s6581_s14 = scalar_lea.vmem %s5098_s13, 16  ;;  %s6585_s15 = scalar_lea.vmem %s5098_s13, 32 }
 0x2ed   :  { %4835 = vmatprep.mubr.bf16.mxu1 %v7378_v61  ;;  %4623 = vmatprep.subr.bf16.mxu0 %v6536_v38  ;;  %v7532_v38 = vrot.slane %v3951_v46, %v6985_v31  ;;  %p6582_p2 = scmp.ne.s32.totalorder %s5098_s13, %s6581_s14  ;;  %p6586_p3 = scmp.lt.s32.totalorder %s5098_s13, %s5098_s13 }
 0x2ee   :  { %p6587_p4 = scmp.lt.s32.totalorder %s6585_s15, %s6581_s14 }
 0x2f0   :  { %4624 = vmatpush1.bf16.msra.mxu0 %v6534_v63  ;;  %v7535_v63 = vrot.slane %v3951_v46, %v6996_v34  ;;  %p6588_p5 = por %p6587_p4, %p6586_p3 }
 0x2f2   :  { %p6589_p6 = pnand %p6588_p5, %p6582_p2 }
 0x2f3   :  { %4626 = vmatmul.mubr.bf16.vlgmr.msra.gmra.mrb[96].mxu0 %v7376_v22  ;;  %4836 = vmatmul.mubr.bf16.vlgmr.msra.gmra.mrb[128].mxu1 %v7376_v22  ;;  %v6616_v22 = vmov 0.0  }
 0x2f4   :  { %4635 = vmatprep.mubr.bf16.mxu0 %v7390_v41  ;;  %4843 = vmatprep.mubr.bf16.mxu1 %v7390_v41 }
 0x2f5   :  { %5667 = vmatprep.subr.bf16.mxu0 %v6616_v22 }
 0x2fb   :  { %4636 = vmatmul.mubr.bf16.gmra.mrb[100].mxu0 %v7388_v18  ;;  %4844 = vmatmul.mubr.bf16.gmra.mrb[132].mxu1 %v7388_v18 }
 0x2fc   :  { %4645 = vmatprep.mubr.bf16.mxu0 %v7402_v10  ;;  %4851 = vmatprep.mubr.bf16.mxu1 %v7402_v10  ;;  %v6617_v10 = vmov 1966171168  }
 0x303   :  { %4646 = vmatmul.mubr.bf16.gmra.mrb[104].mxu0 %v7400_v52  ;;  %4852 = vmatmul.mubr.bf16.gmra.mrb[136].mxu1 %v7400_v52 }
 0x304   :  { %4655 = vmatprep.mubr.bf16.mxu0 %v7414_v8  ;;  %4859 = vmatprep.mubr.bf16.mxu1 %v7414_v8 }
 0x30b   :  { %4656 = vmatmul.mubr.bf16.gmra.mrb[108].mxu0 %v7412_v24  ;;  %4860 = vmatmul.mubr.bf16.gmra.mrb[140].mxu1 %v7412_v24  ;;  %v4993_v24 = vunpack.c.l.s4 %v6617_v10 }
 0x30c   :  { %4665 = vmatprep.mubr.bf16.mxu0 %v7426_v0  ;;  %4867 = vmatprep.mubr.bf16.mxu1 %v7426_v0  ;;  %v5529_v0 = vld.sshfl [vmem:[%s7636_s9] sm:$0x13 pattern:$0x75316420] }
 0x313   :  { %4666 = vmatmul.mubr.bf16.gmra.mrb[112].mxu0 %v7424_v57  ;;  %4868 = vmatmul.mubr.bf16.gmra.mrb[144].mxu1 %v7424_v57 }
 0x314   :  { %4675 = vmatprep.mubr.bf16.mxu0 %v7438_v2  ;;  %4875 = vmatprep.mubr.bf16.mxu1 %v7438_v2  ;;  %v4991_v2 = vcombine.high %v5529_v0, %v5529_v0 }
 0x31b   :  { %4676 = vmatmul.mubr.bf16.gmra.mrb[116].mxu0 %v7436_v55  ;;  %4876 = vmatmul.mubr.bf16.gmra.mrb[148].mxu1 %v7436_v55  ;;  %v4994_v55 = vunpack.c.0.s8 %v4993_v24 }
 0x31c   :  { %4685 = vmatprep.mubr.bf16.mxu0 %v7450_v3  ;;  %4883 = vmatprep.mubr.bf16.mxu1 %v7450_v3 }
 0x31d   :  { %v4997_v39 = vsub.s32 %v4994_v55, %v6982_v30 }
 0x31f   :  { %v7497_v4 = vrot.slane %v5529_v0, %v4997_v39  ;;  %v5005_v6 = vrot.slane %v4991_v2, %v4997_v39 }
 0x323   :  { %4686 = vmatmul.mubr.bf16.gmra.mrb[120].mxu0 %v7448_v17  ;;  %4884 = vmatmul.mubr.bf16.gmra.mrb[152].mxu1 %v7448_v17 }
 0x324   :  { %4695 = vmatprep.mubr.bf16.mxu0 %v3822_v56  ;;  %4891 = vmatprep.mubr.bf16.mxu1 %v3822_v56 }
 0x32b   :  { %4696 = vmatmul.mubr.bf16.gmra.mrb[124].mxu0 %v3821_v9  ;;  %4892 = vmatmul.mubr.bf16.gmra.mrb[156].mxu1 %v3821_v9 }
 0x32c   :  { %5042 = vmatprep.mubr.bf16.mxu1 %v5005_v6  ;;  %5683 = vmatprep.mubr.msk.bf16.mxu0 %vm6618_vm3, %v6616_v22 }
 0x386   :  { %v5546_v61 = vpop.f32.mrb[96].mxu1 }
 0x387   :  { %v5547_v18 = vpop.f32.mrb[97].mxu1 }
 0x388   :  { %v7489_v41 = vadd.f32 %v5547_v18, %v5546_v61  ;;  %v5549_v52 = vpop.f32.mrb[98].mxu1  ;;  %v7538_v61 = vrot.slane %v3951_v46, %v6993_v33 }
 0x389   :  { %v5550_v8 = vpop.f32.mrb[99].mxu1 }
 0x38a   :  { %v7491_v57 = vadd.f32 %v5550_v8, %v5549_v52  ;;  %v4741_v0 = vadd.f32 %v7489_v41, %v7535_v63 }
 0x38c   :  { %v4744_v33 = vadd.f32 %v7491_v57, %v7535_v63 }
 0x38e   :  { %v5552_v28 = vpop.f32.mrb[100].mxu1 }
 0x38f   :  { %v5553_v7 = vpop.f32.mrb[101].mxu1 }
 0x390   :  { %v7499_v13 = vadd.f32 %v5553_v7, %v5552_v28  ;;  %v5555_v35 = vpop.f32.mrb[102].mxu1 }
 0x391   :  { %v5556_v1 = vpop.f32.mrb[103].mxu1 }
 0x392   :  { %v7502_v44 = vadd.f32 %v5556_v1, %v5555_v35  ;;  %v4749_v57 = vadd.f32 %v7499_v13, %v7535_v63 }
 0x396   :  { %v5558_v17 = vpop.f32.mrb[104].mxu1 }
 0x397   :  { %v5559_v15 = vpop.f32.mrb[105].mxu1 }
 0x398   :  { %v7504_v30 = vadd.f32 %v5559_v15, %v5558_v17  ;;  %v5561_v21 = vpop.f32.mrb[106].mxu1 }
 0x399   :  { %v5562_v42 = vpop.f32.mrb[107].mxu1 }
 0x39a   :  { %v7506_v3 = vadd.f32 %v5562_v42, %v5561_v21 }
 0x39e   :  { %v5564_v19 = vpop.f32.mrb[108].mxu1 }
 0x39f   :  { %v5565_v23 = vpop.f32.mrb[109].mxu1 }
 0x3a0   :  { %v7508_v48 = vadd.f32 %v5565_v23, %v5564_v19  ;;  %v5567_v49 = vpop.f32.mrb[110].mxu1 }
 0x3a1   :  { %v5568_v20 = vpop.f32.mrb[111].mxu1 }
 0x3a2   :  { %v7510_v29 = vadd.f32 %v5568_v20, %v5567_v49 }
 0x3a6   :  { %v5570_v53 = vpop.f32.mrb[112].mxu1 }
 0x3a7   :  { %v5571_v16 = vpop.f32.mrb[113].mxu1 }
 0x3a8   :  { %v7512_v32 = vadd.f32 %v5571_v16, %v5570_v53  ;;  %v5573_v11 = vpop.f32.mrb[114].mxu1 }
 0x3a9   :  { %v5574_v45 = vpop.f32.mrb[115].mxu1 }
 0x3aa   :  { %v7514_v47 = vadd.f32 %v5574_v45, %v5573_v11 }
 0x3ae   :  { %v5576_v27 = vpop.f32.mrb[116].mxu1 }
 0x3af   :  { %v5577_v26 = vpop.f32.mrb[117].mxu1 }
 0x3b0   :  { %v7516_v58 = vadd.f32 %v5577_v26, %v5576_v27  ;;  %v5579_v43 = vpop.f32.mrb[118].mxu1 }
 0x3b1   :  { %v5580_v25 = vpop.f32.mrb[119].mxu1 }
 0x3b2   :  { %v7518_v12 = vadd.f32 %v5580_v25, %v5579_v43 }
 0x3b6   :  { %v5582_v5 = vpop.f32.mrb[120].mxu1 }
 0x3b7   :  { %v5583_v37 = vpop.f32.mrb[121].mxu1 }
 0x3b8   :  { %v7520_v54 = vadd.f32 %v5583_v37, %v5582_v5  ;;  %v5585_v59 = vpop.f32.mrb[122].mxu1 }
 0x3b9   :  { %v5586_v60 = vpop.f32.mrb[123].mxu1 }
 0x3ba   :  { %v7522_v62 = vadd.f32 %v5586_v60, %v5585_v59 }
 0x3be   :  { %v5588_v50 = vpop.f32.mrb[124].mxu1 }
 0x3bf   :  { %v5589_v36 = vpop.f32.mrb[125].mxu1 }
 0x3c0   :  { %v7524_v40 = vadd.f32 %v5589_v36, %v5588_v50  ;;  %v5591_v9 = vpop.f32.mrb[126].mxu1  ;;  %v4752_v36 = vadd.f32 %v7502_v44, %v7535_v63 }
 0x3c1   :  { %v5592_v51 = vpop.f32.mrb[127].mxu1 }
 0x3c2   :  { %v7529_v56 = vadd.f32 %v5592_v51, %v5591_v9 }
 0x3c6   :  { %v4627_v18 = vpop.f32.mrb[96].mxu0  ;;  %v5610_v52 = vpop.f32.mrb[128].mxu1 }
 0x3c7   :  { %v5687_v10 = vadd.f32 %v4627_v18, %v7532_v38  ;;  %v4629_v24 = vpop.f32.mrb[97].mxu0  ;;  %v5611_v8 = vpop.f32.mrb[129].mxu1 }
 0x3c8   :  { %v5688_v55 = vadd.f32 %v4629_v24, %v7538_v61  ;;  %v5612_v2 = vadd.f32 %v5611_v8, %v5610_v52  ;;  %v4631_v39 = vpop.f32.mrb[98].mxu0  ;;  %v5613_v28 = vpop.f32.mrb[130].mxu1 }
 0x3c9   :  { %v5689_v34 = vadd.f32 %v4631_v39, %v7532_v38  ;;  %v4633_v6 = vpop.f32.mrb[99].mxu0  ;;  %v5614_v7 = vpop.f32.mrb[131].mxu1  ;;  %v4900_v17 = vmax.f32 %v5687_v10, 0.0 }
 0x3ca   :  { %v4838_v35 = vadd.f32 %v5612_v2, %v4741_v0  ;;  %v5690_v1 = vadd.f32 %v4633_v6, %v7538_v61  ;;  %v5615_v14 = vadd.f32 %v5614_v7, %v5613_v28  ;;  %v4901_v21 = vmax.f32 %v5688_v55, 0.0 }
 0x3cb   :  { %v4903_v15 = vmax.f32 %v5689_v34, 0.0  ;;  %v4757_v7 = vadd.f32 %v7504_v30, %v7535_v63 }
 0x3cc   :  { %v4904_v41 = vmax.f32 %v5690_v1, 0.0  ;;  %v4841_v42 = vadd.f32 %v5615_v14, %v4744_v33  ;;  %v4902_v23 = vmax.f32 %v4838_v35, 0.0 }
 0x3cd   :  { %v4948_v19 = vpack.c.bf16 %v4903_v15, %v4900_v17 }
 0x3ce   :  { %v4949_v49 = vpack.c.bf16 %v4904_v41, %v4901_v21  ;;  %v4905_v20 = vmax.f32 %v4841_v42, 0.0  ;;  %v4637_v53 = vpop.f32.mrb[100].mxu0  ;;  %v5616_v16 = vpop.f32.mrb[132].mxu1  ;;  %v4760_v42 = vadd.f32 %v7506_v3, %v7535_v63 }
 0x3cf   :  { %v5691_v11 = vadd.f32 %v4637_v53, %v7532_v38  ;;  %v4639_v45 = vpop.f32.mrb[101].mxu0  ;;  %v5617_v27 = vpop.f32.mrb[133].mxu1 }
 0x3d0   :  { %v4950_v26 = vpack.c.bf16 %v4905_v20, %v4902_v23  ;;  %v5692_v43 = vadd.f32 %v4639_v45, %v7538_v61  ;;  %v5618_v25 = vadd.f32 %v5617_v27, %v5616_v16  ;;  %v4641_v5 = vpop.f32.mrb[102].mxu0  ;;  %v5619_v37 = vpop.f32.mrb[134].mxu1  ;;  %5010 = vmatprep.subr.bf16.mxu1 %v4949_v49 }
 0x3d1   :  { %v5693_v59 = vadd.f32 %v4641_v5, %v7532_v38  ;;  %v4643_v60 = vpop.f32.mrb[103].mxu0  ;;  %v5620_v50 = vpop.f32.mrb[135].mxu1  ;;  %5011 = vmatpush1.bf16.xpose.msra.mxu1 %v4948_v19  ;;  %v4906_v13 = vmax.f32 %v5691_v11, 0.0 }
 0x3d2   :  { %v4846_v9 = vadd.f32 %v5618_v25, %v4749_v57  ;;  %v5694_v46 = vadd.f32 %v4643_v60, %v7538_v61  ;;  %v5621_v51 = vadd.f32 %v5620_v50, %v5619_v37  ;;  %5668 = vmatpush3.bf16.xpose.msra.mxu0 %v4950_v26  ;;  %v4907_v52 = vmax.f32 %v5692_v43, 0.0 }
 0x3d3   :  { %v4909_v18 = vmax.f32 %v5693_v59, 0.0  ;;  %5669 = vmatprep.subr.bf16.mxu0 %v6616_v22  ;;  %v4765_v59 = vadd.f32 %v7508_v48, %v7535_v63 }
 0x3d4   :  { %v4910_v10 = vmax.f32 %v5694_v46, 0.0  ;;  %v4849_v24 = vadd.f32 %v5621_v51, %v4752_v36  ;;  %v4908_v0 = vmax.f32 %v4846_v9, 0.0 }
 0x3d5   :  { %v4951_v8 = vpack.c.bf16 %v4909_v18, %v4906_v13 }
 0x3d6   :  { %v4952_v55 = vpack.c.bf16 %v4910_v10, %v4907_v52  ;;  %v4911_v2 = vmax.f32 %v4849_v24, 0.0  ;;  %v4647_v39 = vpop.f32.mrb[104].mxu0  ;;  %v5622_v28 = vpop.f32.mrb[136].mxu1  ;;  %v4768_v52 = vadd.f32 %v7510_v29, %v7535_v63 }
 0x3d7   :  { %v5695_v44 = vadd.f32 %v4647_v39, %v7532_v38  ;;  %v4649_v34 = vpop.f32.mrb[105].mxu0  ;;  %v5623_v6 = vpop.f32.mrb[137].mxu1 }
 0x3d8   :  { %v4953_v33 = vpack.c.bf16 %v4911_v2, %v4908_v0  ;;  %v5696_v35 = vadd.f32 %v4649_v34, %v7538_v61  ;;  %v5624_v1 = vadd.f32 %v5623_v6, %v5622_v28  ;;  %v4651_v14 = vpop.f32.mrb[106].mxu0  ;;  %v5625_v17 = vpop.f32.mrb[138].mxu1  ;;  %5012 = vmatprep.subr.bf16.mxu1 %v4952_v55 }
 0x3d9   :  { %v5697_v15 = vadd.f32 %v4651_v14, %v7532_v38  ;;  %v4653_v21 = vpop.f32.mrb[107].mxu0  ;;  %v5626_v41 = vpop.f32.mrb[139].mxu1  ;;  %5013 = vmatpush1.bf16.xpose.msra.mxu1 %v4951_v8  ;;  %v4912_v30 = vmax.f32 %v5695_v44, 0.0  ;;  %v4773_v14 = vadd.f32 %v7512_v32, %v7535_v63 }
 0x3da   :  { %v4854_v19 = vadd.f32 %v5624_v1, %v4757_v7  ;;  %v5698_v23 = vadd.f32 %v4653_v21, %v7538_v61  ;;  %v5627_v49 = vadd.f32 %v5626_v41, %v5625_v17  ;;  %5670 = vmatpush3.bf16.xpose.msra.mxu0 %v4953_v33  ;;  %v4913_v53 = vmax.f32 %v5696_v35, 0.0 }
 0x3db   :  { %v4915_v20 = vmax.f32 %v5697_v15, 0.0  ;;  %5671 = vmatprep.subr.bf16.mxu0 %v6616_v22 }
 0x3dc   :  { %v4916_v16 = vmax.f32 %v5698_v23, 0.0  ;;  %v4857_v11 = vadd.f32 %v5627_v49, %v4760_v42  ;;  %v4914_v27 = vmax.f32 %v4854_v19, 0.0 }
 0x3dd   :  { %v4954_v45 = vpack.c.bf16 %v4915_v20, %v4912_v30  ;;  %v4776_v30 = vadd.f32 %v7514_v47, %v7535_v63 }
 0x3de   :  { %v4955_v57 = vpack.c.bf16 %v4916_v16, %v4913_v53  ;;  %v4917_v26 = vmax.f32 %v4857_v11, 0.0  ;;  %v4657_v43 = vpop.f32.mrb[108].mxu0  ;;  %v5628_v25 = vpop.f32.mrb[140].mxu1 }
 0x3df   :  { %v5699_v3 = vadd.f32 %v4657_v43, %v7532_v38  ;;  %v4659_v5 = vpop.f32.mrb[109].mxu0  ;;  %v5629_v37 = vpop.f32.mrb[141].mxu1 }
 0x3e0   :  { %v4956_v60 = vpack.c.bf16 %v4917_v26, %v4914_v27  ;;  %v5700_v50 = vadd.f32 %v4659_v5, %v7538_v61  ;;  %v5630_v36 = vadd.f32 %v5629_v37, %v5628_v25  ;;  %v4661_v9 = vpop.f32.mrb[110].mxu0  ;;  %v5631_v46 = vpop.f32.mrb[142].mxu1  ;;  %5014 = vmatprep.subr.bf16.mxu1 %v4955_v57 }
 0x3e1   :  { %v5701_v51 = vadd.f32 %v4661_v9, %v7532_v38  ;;  %v4663_v13 = vpop.f32.mrb[111].mxu0  ;;  %v5632_v18 = vpop.f32.mrb[143].mxu1  ;;  %5015 = vmatpush1.bf16.xpose.msra.mxu1 %v4954_v45  ;;  %v4918_v48 = vmax.f32 %v5699_v3, 0.0 }
 0x3e2   :  { %v4862_v10 = vadd.f32 %v5630_v36, %v4765_v59  ;;  %v5702_v24 = vadd.f32 %v4663_v13, %v7538_v61  ;;  %v5633_v8 = vadd.f32 %v5632_v18, %v5631_v46  ;;  %5672 = vmatpush3.bf16.xpose.msra.mxu0 %v4956_v60  ;;  %v4919_v55 = vmax.f32 %v5700_v50, 0.0 }
 0x3e3   :  { %v4921_v0 = vmax.f32 %v5701_v51, 0.0  ;;  %5673 = vmatprep.subr.bf16.mxu0 %v6616_v22  ;;  %v4781_v50 = vadd.f32 %v7516_v58, %v7535_v63 }
 0x3e4   :  { %v4922_v2 = vmax.f32 %v5702_v24, 0.0  ;;  %v4865_v39 = vadd.f32 %v5633_v8, %v4768_v52  ;;  %v4920_v44 = vmax.f32 %v4862_v10, 0.0  ;;  %v4784_v24 = vadd.f32 %v7518_v12, %v7535_v63 }
 0x3e5   :  { %v4957_v28 = vpack.c.bf16 %v4921_v0, %v4918_v48 }
 0x3e6   :  { %v4958_v34 = vpack.c.bf16 %v4922_v2, %v4919_v55  ;;  %v4923_v6 = vmax.f32 %v4865_v39, 0.0  ;;  %v4667_v7 = vpop.f32.mrb[112].mxu0  ;;  %v5634_v33 = vpop.f32.mrb[144].mxu1 }
 0x3e7   :  { %v5703_v29 = vadd.f32 %v4667_v7, %v7532_v38  ;;  %v4669_v35 = vpop.f32.mrb[113].mxu0  ;;  %v5635_v1 = vpop.f32.mrb[145].mxu1 }
 0x3e8   :  { %v4959_v17 = vpack.c.bf16 %v4923_v6, %v4920_v44  ;;  %v5704_v15 = vadd.f32 %v4669_v35, %v7538_v61  ;;  %v5636_v21 = vadd.f32 %v5635_v1, %v5634_v33  ;;  %v4671_v41 = vpop.f32.mrb[114].mxu0  ;;  %v5637_v42 = vpop.f32.mrb[146].mxu1  ;;  %5016 = vmatprep.subr.bf16.mxu1 %v4958_v34 }
 0x3e9   :  { %v5705_v19 = vadd.f32 %v4671_v41, %v7532_v38  ;;  %v4673_v23 = vpop.f32.mrb[115].mxu0  ;;  %v5638_v49 = vpop.f32.mrb[147].mxu1  ;;  %5017 = vmatpush1.bf16.xpose.msra.mxu1 %v4957_v28  ;;  %v4924_v32 = vmax.f32 %v5703_v29, 0.0 }
 0x3ea   :  { %v4870_v20 = vadd.f32 %v5636_v21, %v4773_v14  ;;  %v5706_v53 = vadd.f32 %v4673_v23, %v7538_v61  ;;  %v5639_v16 = vadd.f32 %v5638_v49, %v5637_v42  ;;  %5674 = vmatpush3.bf16.xpose.msra.mxu0 %v4959_v17  ;;  %v4925_v45 = vmax.f32 %v5704_v15, 0.0 }
 0x3eb   :  { %v4927_v11 = vmax.f32 %v5705_v19, 0.0  ;;  %5675 = vmatprep.subr.bf16.mxu0 %v6616_v22  ;;  %v4789_v14 = vadd.f32 %v7520_v54, %v7535_v63 }
 0x3ec   :  { %v4928_v27 = vmax.f32 %v5706_v53, 0.0  ;;  %v4873_v57 = vadd.f32 %v5639_v16, %v4776_v30  ;;  %v4926_v43 = vmax.f32 %v4870_v20, 0.0  ;;  %v4792_v30 = vadd.f32 %v7522_v62, %v7535_v63 }
 0x3ed   :  { %v4960_v26 = vpack.c.bf16 %v4927_v11, %v4924_v32 }
 0x3ee   :  { %v4961_v25 = vpack.c.bf16 %v4928_v27, %v4925_v45  ;;  %v4929_v3 = vmax.f32 %v4873_v57, 0.0  ;;  %v4677_v5 = vpop.f32.mrb[116].mxu0  ;;  %v5640_v37 = vpop.f32.mrb[148].mxu1 }
 0x3ef   :  { %v5707_v47 = vadd.f32 %v4677_v5, %v7532_v38  ;;  %v4679_v59 = vpop.f32.mrb[117].mxu0  ;;  %v5641_v60 = vpop.f32.mrb[149].mxu1 }
 0x3f0   :  { %v4962_v36 = vpack.c.bf16 %v4929_v3, %v4926_v43  ;;  %v5708_v9 = vadd.f32 %v4679_v59, %v7538_v61  ;;  %v5642_v46 = vadd.f32 %v5641_v60, %v5640_v37  ;;  %v4681_v51 = vpop.f32.mrb[118].mxu0  ;;  %v5643_v13 = vpop.f32.mrb[150].mxu1  ;;  %5018 = vmatprep.subr.bf16.mxu1 %v4961_v25  ;;  %v4797_v59 = vadd.f32 %v7524_v40, %v7535_v63 }
 0x3f1   :  { %v5709_v18 = vadd.f32 %v4681_v51, %v7532_v38  ;;  %v4683_v52 = vpop.f32.mrb[119].mxu0  ;;  %v5644_v10 = vpop.f32.mrb[151].mxu1  ;;  %5019 = vmatpush1.bf16.xpose.msra.mxu1 %v4960_v26  ;;  %v4930_v58 = vmax.f32 %v5707_v47, 0.0 }
 0x3f2   :  { %v4878_v8 = vadd.f32 %v5642_v46, %v4781_v50  ;;  %v5710_v48 = vadd.f32 %v4683_v52, %v7538_v61  ;;  %v5645_v0 = vadd.f32 %v5644_v10, %v5643_v13  ;;  %5676 = vmatpush3.bf16.xpose.msra.mxu0 %v4962_v36  ;;  %v4931_v2 = vmax.f32 %v5708_v9, 0.0 }
 0x3f3   :  { %v4933_v55 = vmax.f32 %v5709_v18, 0.0  ;;  %5677 = vmatprep.subr.bf16.mxu0 %v6616_v22  ;;  %v4800_v52 = vadd.f32 %v7529_v56, %v7535_v63  ;;  %v5006_v56 = vcombine.high %v7497_v4, %v7497_v4  ;;  %v4977_v63 = vpop.permute.xlu0 %4976 }
 0x3f4   :  { %v4934_v39 = vmax.f32 %v5710_v48, 0.0  ;;  %v4881_v28 = vadd.f32 %v5645_v0, %v4784_v24  ;;  %v4932_v34 = vmax.f32 %v4878_v8, 0.0 }
 0x3f5   :  { %v4963_v44 = vpack.c.bf16 %v4933_v55, %v4930_v58 }
 0x3f6   :  { %v4964_v6 = vpack.c.bf16 %v4934_v39, %v4931_v2  ;;  %v4935_v7 = vmax.f32 %v4881_v28, 0.0  ;;  %v4687_v33 = vpop.f32.mrb[120].mxu0  ;;  %v5646_v29 = vpop.f32.mrb[152].mxu1 }
 0x3f7   :  { %v5711_v12 = vadd.f32 %v4687_v33, %v7532_v38  ;;  %v4689_v35 = vpop.f32.mrb[121].mxu0  ;;  %v5647_v1 = vpop.f32.mrb[153].mxu1 }
 0x3f8   :  { %v4965_v17 = vpack.c.bf16 %v4935_v7, %v4932_v34  ;;  %v5712_v15 = vadd.f32 %v4689_v35, %v7538_v61  ;;  %v5648_v21 = vadd.f32 %v5647_v1, %v5646_v29  ;;  %v4691_v41 = vpop.f32.mrb[122].mxu0  ;;  %v5649_v42 = vpop.f32.mrb[154].mxu1  ;;  %5020 = vmatprep.subr.bf16.mxu1 %v4964_v6 }
 0x3f9   :  { %v5713_v19 = vadd.f32 %v4691_v41, %v7532_v38  ;;  %v4693_v23 = vpop.f32.mrb[123].mxu0  ;;  %v5650_v49 = vpop.f32.mrb[155].mxu1  ;;  %5021 = vmatpush1.bf16.xpose.msra.mxu1 %v4963_v44  ;;  %v4936_v54 = vmax.f32 %v5711_v12, 0.0 }
 0x3fa   :  { %v4886_v20 = vadd.f32 %v5648_v21, %v4789_v14  ;;  %v5714_v53 = vadd.f32 %v4693_v23, %v7538_v61  ;;  %v5651_v16 = vadd.f32 %v5650_v49, %v5649_v42  ;;  %5678 = vmatpush3.bf16.xpose.msra.mxu0 %v4965_v17  ;;  %v4937_v11 = vmax.f32 %v5712_v15, 0.0 }
 0x3fb   :  { %v4939_v32 = vmax.f32 %v5713_v19, 0.0  ;;  %5679 = vmatprep.subr.bf16.mxu0 %v6616_v22 }
 0x3fc   :  { %v4940_v45 = vmax.f32 %v5714_v53, 0.0  ;;  %v4889_v27 = vadd.f32 %v5651_v16, %v4792_v30  ;;  %v4938_v26 = vmax.f32 %v4886_v20, 0.0 }
 0x3fd   :  { %v4966_v57 = vpack.c.bf16 %v4939_v32, %v4936_v54 }
 0x3fe   :  { %v4967_v43 = vpack.c.bf16 %v4940_v45, %v4937_v11  ;;  %v4941_v25 = vmax.f32 %v4889_v27, 0.0  ;;  %v4697_v3 = vpop.f32.mrb[124].mxu0  ;;  %v5652_v5 = vpop.f32.mrb[156].mxu1 }
 0x3ff   :  { %v5715_v62 = vadd.f32 %v4697_v3, %v7532_v38  ;;  %v4699_v37 = vpop.f32.mrb[125].mxu0  ;;  %v5653_v47 = vpop.f32.mrb[157].mxu1 }
 0x400   :  { %v4968_v60 = vpack.c.bf16 %v4941_v25, %v4938_v26  ;;  %v5716_v50 = vadd.f32 %v4699_v37, %v7538_v61  ;;  %v5654_v36 = vadd.f32 %v5653_v47, %v5652_v5  ;;  %v4701_v9 = vpop.f32.mrb[126].mxu0  ;;  %v5655_v46 = vpop.f32.mrb[158].mxu1  ;;  %5022 = vmatprep.subr.bf16.mxu1 %v4967_v43 }
 0x401   :  { %v5717_v51 = vadd.f32 %v4701_v9, %v7532_v38  ;;  %v4703_v13 = vpop.f32.mrb[127].mxu0  ;;  %v5656_v18 = vpop.f32.mrb[159].mxu1  ;;  %5023 = vmatpush1.bf16.xpose.msra.mxu1 %v4966_v57  ;;  %v4942_v40 = vmax.f32 %v5715_v62, 0.0 }
 0x402   :  { %v4894_v10 = vadd.f32 %v5654_v36, %v4797_v59  ;;  %v5718_v24 = vadd.f32 %v4703_v13, %v7538_v61  ;;  %v5657_v8 = vadd.f32 %v5656_v18, %v5655_v46  ;;  %5680 = vmatpush3.bf16.xpose.msra.mxu0 %v4968_v60  ;;  %v4943_v0 = vmax.f32 %v5716_v50, 0.0 }
 0x403   :  { %v4945_v48 = vmax.f32 %v5717_v51, 0.0  ;;  %5681 = vmatprep.subr.bf16.mxu0 %v6616_v22  ;;  %v4982_v22 = vrot.slane %v4977_v63, %v6985_v31 }
 0x404   :  { %v4946_v58 = vmax.f32 %v5718_v24, 0.0  ;;  %v4897_v55 = vadd.f32 %v5657_v8, %v4800_v52  ;;  %v4944_v38 = vmax.f32 %v4894_v10, 0.0 }
 0x405   :  { %v4969_v2 = vpack.c.bf16 %v4945_v48, %v4942_v40 }
 0x406   :  { %v4970_v39 = vpack.c.bf16 %v4946_v58, %v4943_v0  ;;  %v4947_v28 = vmax.f32 %v4897_v55, 0.0 }
 0x408   :  { %v4971_v44 = vpack.c.bf16 %v4947_v28, %v4944_v38  ;;  %5024 = vmatprep.subr.bf16.mxu1 %v4970_v39 }
 0x409   :  { %5025 = vmatpush1.bf16.xpose.msra.mxu1 %v4969_v2 }
 0x40a   :  { %5682 = vmatpush3.bf16.xpose.msra.mxu0 %v4971_v44 }
 0x410   :  { %5043 = vmatmul.mubr.bf16.vlgmr.msra.gmra.mrb[160].mxu1 %v7497_v4 }
 0x411   :  { %5684 = vmatmul.mubr.bf16.vlgmr.msra.gmra.mrb[128].mxu0 %v5006_v56 }
 0x4e3   :  { %v5044_v61 = vpop.f32.mrb[160].mxu1 }
 0x4e4   :  { %v5045_v34 = vadd.f32 %v5044_v61, %v4982_v22  ;;  %v5046_v6 = vpop.f32.mrb[161].mxu1  ;;  %v5084_v7 = vpop.f32.mrb[128].mxu0 }
 0x4e5   :  { %v5047_v33 = vpop.f32.mrb[162].mxu1  ;;  %v5685_v29 = vpop.f32.mrb[129].mxu0 }
 0x4e6   :  { %v5085_v12 = vadd.f32 %v5084_v7, %v5045_v34  ;;  %v5048_v35 = vpop.f32.mrb[163].mxu1  ;;  %v5087_v1 = vpop.f32.mrb[130].mxu0 }
 0x4e7   :  { %v5686_v14 = vpop.f32.mrb[131].mxu0 }
 0x4e8   :  { %5090 = vst [vmem:[#allocation8] sm:$0x1] %v5085_v12 }
 0x4e9   :  { %6592 = shalt.err (!%p6589_p6)
}
 0x4ea   :  { %s6593_s18 = scalar_lea.hbm %s7638_s11, 16 }
 0x4eb   :  { %p6594_p7 = scmp.ne.s32.totalorder %s7638_s11, %s6593_s18  ;;  %p6597_p8 = scmp.lt.u32.totalorder %s6593_s18, %s7638_s11 }
 0x4ed   :  { %p6599_p9 = pnand %p6597_p8, %p6594_p7 }
 0x4ef   :  { %6602 = shalt.err (!%p6599_p9)
}
 0x4f0   :  { %5100 = dma.vmem_to_hbm [thread:$0]  %s5098_s13, 16, %s7638_s11, [#allocation5]  }
 0x4f1   :  { %6607 = dma.done.wait [#allocation5], 16  }
 0x4f2   :  { %6608 = vsyncadd [#allocation5], 4294967280 }
 0x4f3   :  { %5104 = vsyncpa [#allocation4], 1 }
 0x4f4   :  { %5105 = vsyncpa [#allocation7], 1 }
 0x4f5   :  { %5106 = vsyncpa [#allocation5], 1 }

</bundles_post_ra>
